<compile_context>
chip_gen: v7x
topology: tpu7x:2x2x1
jax: 0.10.0
libtpu: 0.0.40
codegen_flags: <defaults>
</compile_context>

<pallas_src>
import jax
import jax.numpy as jnp
from jax import lax
from jax.experimental import pallas as pl
from jax.experimental.pallas import tpu as pltpu

_LANES = 128
_SUBLANES = 8
_BLOCK_BYTES = 4 * 1024 * 1024        # ~4 MiB per input block (perf review)
_VMEM_LIMIT_BYTES = 32 * 1024 * 1024  # raises v5e's 16 MiB default; == v6e/v7x default
_TINY_BYTES = 64 * 1024               # below this, fused XLA reduction is as fast


def _loss_kernel(recon_ref, x_ref, mu_ref, logvar_ref, o_ref, acc_ref):
    c = pl.program_id(0)   # TensorCore shard ("parallel")
    s = pl.program_id(1)   # row-tile step  ("arbitrary" reduction, last)

    @pl.when(s == 0)
    def _init():
        acc_ref[...] = jnp.zeros_like(acc_ref)

    # Hot loop: pure-VPU accumulate into a single (8,128) vreg-sized scratch.
    # reshape splits rows on the (8,128) tile grid -> free; sum over axis 0 is
    # elementwise vreg adds (no XLU / cross-lane movement).
    diff = recon_ref[...].astype(jnp.float32) - x_ref[...].astype(jnp.float32)
    sq = diff * diff
    acc_ref[...] += jnp.sum(sq.reshape(-1, _SUBLANES, _LANES), axis=0)

    @pl.when(s == pl.num_programs(1) - 1)
    def _epilogue():
        # One cross-sublane reduce per shard; keep per-lane partials.
        lane_part = jnp.sum(acc_ref[...], axis=0).reshape(1, 1, _LANES)
        o_ref[...] = lane_part

        @pl.when(c == 0)
        def _kld():
            # KLD = -0.5 * sum(1 + logvar - mu^2 - exp(logvar)); shard 0 only,
            # added to lane 0 so jnp.sum(out) yields MSE + KLD.
            mu = mu_ref[...].astype(jnp.float32)
            lv = logvar_ref[...].astype(jnp.float32)
            kld = -0.5 * jnp.sum(1.0 + lv - mu * mu - jnp.exp(lv))
            lane0 = lax.broadcasted_iota(jnp.int32, (1, 1, _LANES), 2) == 0
            o_ref[...] = o_ref[...] + jnp.where(lane0, kld, 0.0)


def _num_tensorcores():
    """Best-effort TensorCore-per-device count; conservative fallback = 1."""
    try:
        info = pltpu.get_tpu_info()
        for name in ("num_tensorcores", "tensorcore_count", "num_cores",
                     "cores_per_chip"):
            v = getattr(info, name, None)
            if isinstance(v, int) and 1 <= v <= 8:
                return v
    except Exception:
        pass
    try:
        kind = jax.devices()[0].device_kind.lower()
        if any(tag in kind for tag in ("v4", "v5p", "7")):
            return 2
    except Exception:
        pass
    return 1


def _as_rows128(a):
    """Flatten to a [rows, 128] lane-dense view plus a (<128,) element tail."""
    flat = a.reshape(-1)
    n = flat.shape[0]
    rows = n // _LANES
    if rows * _LANES == n:
        return flat.reshape(rows, _LANES), flat[:0]
    return flat[: rows * _LANES].reshape(rows, _LANES), flat[rows * _LANES:]


def _sq_sum(a, b):
    d = a.astype(jnp.float32) - b.astype(jnp.float32)
    return jnp.sum(d * d)


def _kld_ref(mu, logvar):
    mu = mu.astype(jnp.float32)
    lv = logvar.astype(jnp.float32)
    return -0.5 * jnp.sum(1.0 + lv - mu * mu - jnp.exp(lv))


def vae_loss(recon_x, x, mu, logvar):
    itemsize = jnp.dtype(recon_x.dtype).itemsize
    total_bytes = int(recon_x.size) * itemsize
    if total_bytes < _TINY_BYTES:
        # Tiny input: pallas_call launch + pipeline prologue would dominate.
        return _sq_sum(recon_x, x) + _kld_ref(mu, logvar)

    recon2d, recon_tail = _as_rows128(recon_x)
    x2d, x_tail = _as_rows128(x)
    total_rows = recon2d.shape[0]
    rows8 = (total_rows // _SUBLANES) * _SUBLANES
    if rows8 == 0:
        return _sq_sum(recon_x, x) + _kld_ref(mu, logvar)

    # --- Static tile / shard selection (shape- and dtype-dependent) ---------
    block_rows_max = max(
        _SUBLANES,
        (_BLOCK_BYTES // (_LANES * itemsize)) // _SUBLANES * _SUBLANES)
    num_shards = _num_tensorcores()
    if rows8 < _SUBLANES * num_shards:
        num_shards = 1
    steps = max(1, -(-rows8 // (num_shards * block_rows_max)))   # ceil-div
    # Largest multiple-of-8 block s.t. the grid stays inside the array; this
    # covers >= rows8 - 8*num_shards*steps rows (>~99% for big inputs).
    block_rows = (rows8 // (num_shards * steps)) // _SUBLANES * _SUBLANES
    used_rows = num_shards * steps * block_rows

    mu2d = mu.reshape(1, -1)
    lv2d = logvar.reshape(1, -1)

    row_map = lambda c, s: (c * steps + s, 0)

    n_cov = used_rows * _LANES
    cost = pl.CostEstimate(
        flops=3 * n_cov + 5 * int(mu.size),
        transcendentals=int(mu.size),
        bytes_accessed=2 * n_cov * itemsize
        + (int(mu.size) + int(logvar.size)) * 4
        + num_shards * _LANES * 4,
    )

    out = pl.pallas_call(
        _loss_kernel,
        out_shape=jax.ShapeDtypeStruct((num_shards, 1, _LANES), jnp.float32),
        grid_spec=pltpu.PrefetchScalarGridSpec(
            num_scalar_prefetch=0,
            grid=(num_shards, steps),
            in_specs=[
                pl.BlockSpec((block_rows, _LANES), row_map),
                pl.BlockSpec((block_rows, _LANES), row_map),
                pl.BlockSpec(mu2d.shape, lambda c, s: (0, 0)),   # resident
                pl.BlockSpec(lv2d.shape, lambda c, s: (0, 0)),   # resident
            ],
            out_specs=pl.BlockSpec((1, 1, _LANES), lambda c, s: (c, 0, 0)),
            scratch_shapes=[pltpu.VMEM((_SUBLANES, _LANES), jnp.float32)],
        ),
        compiler_params=pltpu.CompilerParams(
            dimension_semantics=("parallel", "arbitrary"),
            vmem_limit_bytes=_VMEM_LIMIT_BYTES),
        cost_estimate=cost,
    )(recon2d, x2d, mu2d, lv2d)

    loss = jnp.sum(out)
    # Sub-block sliver of rows not covered by full blocks (< 8*shards*steps rows).
    if used_rows < total_rows:
        loss = loss + _sq_sum(recon2d[used_rows:], x2d[used_rows:])
    # Sub-128-element tail (only when numel % 128 != 0).
    if recon_tail.shape[0] > 0:
        loss = loss + _sq_sum(recon_tail, x_tail)
    return loss


def _reference(recon_x, x, mu, logvar):
    mse = jnp.sum((recon_x.astype(jnp.float32) - x.astype(jnp.float32)) ** 2)
    return mse + _kld_ref(mu, logvar)


def _run_case(key, img_shape, z):
    k1, k2, k3, k4 = jax.random.split(key, 4)
    b = img_shape[0]
    recon_x = jax.random.normal(k1, img_shape, dtype=jnp.float32)
    x = jax.random.normal(k2, img_shape, dtype=jnp.float32)
    mu = jax.random.normal(k3, (b, z), dtype=jnp.float32) * 0.5
    logvar = jax.random.normal(k4, (b, z), dtype=jnp.float32) * 0.1

    loss = vae_loss(recon_x, x, mu, logvar)
    jax.block_until_ready(loss)
    ref = _reference(recon_x, x, mu, logvar)
    assert jnp.allclose(loss, ref, rtol=1e-5, atol=1e-4), (img_shape, loss, ref)


if __name__ == "__main__":
    key = jax.random.PRNGKey(0)
    k0, k1, k2, k3 = jax.random.split(key, 4)

    # Primary small case matching the PyTorch module's NCHW + [B, Z] inputs
    # (tiny -> plain-JAX fast path by design).
    _run_case(k0, (2, 4, 16, 16), 32)
    # Larger case: exercises the Pallas streaming kernel, multi-row blocks and
    # (on multi-TC chips) the 2-shard "parallel" path.
    _run_case(k1, (8, 16, 64, 64), 32)       # 524288 elems -> 4096 rows
    # Odd-sized medium case: kernel path with remainder rows + <128-elem tail.
    _run_case(k2, (3, 5, 67, 41), 16)        # 41205 elems -> 321 rows + 117 tail
    # Tiny odd case: plain-JAX fast path.
    _run_case(k3, (3, 5, 7, 11), 16)         # 1155 elems

    print("KERNEL_OK")
</pallas_src>

<mosaic_0001>
module attributes {stable_mosaic.version = 11 : i64} {
  func.func @_loss_kernel(%arg0: i32, %arg1: i32, %arg2: memref<4096x128xf32, #tpu.memory_space<vmem>>, %arg3: memref<4096x128xf32, #tpu.memory_space<vmem>>, %arg4: memref<1x256xf32, #tpu.memory_space<vmem>>, %arg5: memref<1x256xf32, #tpu.memory_space<vmem>>, %arg6: memref<1x1x128xf32, #tpu.memory_space<vmem>>, %arg7: memref<8x128xf32, #tpu.memory_space<vmem>>) attributes {dimension_semantics = [#tpu.dimension_semantics<parallel>, #tpu.dimension_semantics<arbitrary>], iteration_bounds = array<i64: 1, 1>, scalar_prefetch = 0 : i64, scratch_operands = 1 : i64, tpu.core_type = #tpu.core_type<tc>, window_params = [{transform_indices = @transform_0, window_bounds = array<i64: 4096, 128>}, {transform_indices = @transform_1, window_bounds = array<i64: 4096, 128>}, {pipeline_mode = #tpu.pipeline_mode<synchronous>, transform_indices = @transform_2, window_bounds = array<i64: 1, 256>}, {pipeline_mode = #tpu.pipeline_mode<synchronous>, transform_indices = @transform_3, window_bounds = array<i64: 1, 256>}, {transform_indices = @transform_4, window_bounds = array<i64: 1, 1, 128>}]} {
    %c0_i32 = arith.constant 0 : i32
    %0 = arith.cmpi eq, %arg1, %c0_i32 : i32
    %1 = arith.extui %0 : i1 to i32
    %c0_i32_0 = arith.constant 0 : i32
    %2 = arith.cmpi ne, %1, %c0_i32_0 : i32
    scf.if %2 {
      %cst_10 = arith.constant 0.000000e+00 : f32
      %15 = vector.broadcast %cst_10 : f32 to vector<8x128xf32>
      %c0_11 = arith.constant 0 : index
      %c0_12 = arith.constant 0 : index
      %16 = vector.load %arg7[%c0_11, %c0_12] : memref<8x128xf32, #tpu.memory_space<vmem>>, vector<8x128xf32>
      tpu.vector_store %arg7[%c0_11, %c0_12], %15 {strides = array<i32>} : memref<8x128xf32, #tpu.memory_space<vmem>>, vector<8x128xf32>,
    } else {
    }
    %c0 = arith.constant 0 : index
    %c0_1 = arith.constant 0 : index
    %3 = vector.load %arg2[%c0, %c0_1] : memref<4096x128xf32, #tpu.memory_space<vmem>>, vector<4096x128xf32>
    %c0_2 = arith.constant 0 : index
    %c0_3 = arith.constant 0 : index
    %4 = vector.load %arg3[%c0_2, %c0_3] : memref<4096x128xf32, #tpu.memory_space<vmem>>, vector<4096x128xf32>
    %5 = arith.subf %3, %4 : vector<4096x128xf32>
    %6 = arith.mulf %5, %5 : vector<4096x128xf32>
    %c0_4 = arith.constant 0 : index
    %c0_5 = arith.constant 0 : index
    %7 = vector.load %arg7[%c0_4, %c0_5] : memref<8x128xf32, #tpu.memory_space<vmem>>, vector<8x128xf32>
    %8 = vector.shape_cast %6 : vector<4096x128xf32> to vector<512x8x128xf32>
    %cst = arith.constant dense<0.000000e+00> : vector<8x128xf32>
    %9 = vector.multi_reduction <add>, %8, %cst [0] : vector<512x8x128xf32> to vector<8x128xf32>
    %10 = arith.addf %7, %9 : vector<8x128xf32>
    %c0_6 = arith.constant 0 : index
    %c0_7 = arith.constant 0 : index
    %11 = vector.load %arg7[%c0_6, %c0_7] : memref<8x128xf32, #tpu.memory_space<vmem>>, vector<8x128xf32>
    tpu.vector_store %arg7[%c0_6, %c0_7], %10 {strides = array<i32>} : memref<8x128xf32, #tpu.memory_space<vmem>>, vector<8x128xf32>,
    %c0_i32_8 = arith.constant 0 : i32
    %12 = arith.cmpi eq, %arg1, %c0_i32_8 : i32
    %13 = arith.extui %12 : i1 to i32
    %c0_i32_9 = arith.constant 0 : i32
    %14 = arith.cmpi ne, %13, %c0_i32_9 : i32
    scf.if %14 {
      %c0_10 = arith.constant 0 : index
      %c0_11 = arith.constant 0 : index
      %15 = vector.load %arg7[%c0_10, %c0_11] : memref<8x128xf32, #tpu.memory_space<vmem>>, vector<8x128xf32>
      %cst_12 = arith.constant dense<0.000000e+00> : vector<128xf32>
      %16 = vector.multi_reduction <add>, %15, %cst_12 [0] : vector<8x128xf32> to vector<128xf32>
      %17 = vector.shape_cast %16 : vector<128xf32> to vector<1x1x128xf32>
      %c0_13 = arith.constant 0 : index
      %c0_14 = arith.constant 0 : index
      %c0_15 = arith.constant 0 : index
      %18 = vector.load %arg6[%c0_13, %c0_14, %c0_15] : memref<1x1x128xf32, #tpu.memory_space<vmem>>, vector<1x1x128xf32>
      tpu.vector_store %arg6[%c0_13, %c0_14, %c0_15], %17 {strides = array<i32>} : memref<1x1x128xf32, #tpu.memory_space<vmem>>, vector<1x1x128xf32>,
      %c0_i32_16 = arith.constant 0 : i32
      %19 = arith.cmpi eq, %arg0, %c0_i32_16 : i32
      %20 = arith.extui %19 : i1 to i32
      %c0_i32_17 = arith.constant 0 : i32
      %21 = arith.cmpi ne, %20, %c0_i32_17 : i32
      scf.if %21 {
        %c0_18 = arith.constant 0 : index
        %c0_19 = arith.constant 0 : index
        %22 = vector.load %arg4[%c0_18, %c0_19] : memref<1x256xf32, #tpu.memory_space<vmem>>, vector<1x256xf32>
        %c0_20 = arith.constant 0 : index
        %c0_21 = arith.constant 0 : index
        %23 = vector.load %arg5[%c0_20, %c0_21] : memref<1x256xf32, #tpu.memory_space<vmem>>, vector<1x256xf32>
        %cst_22 = arith.constant 1.000000e+00 : f32
        %24 = vector.broadcast %cst_22 : f32 to vector<1x256xf32>
        %25 = arith.addf %24, %23 : vector<1x256xf32>
        %26 = arith.mulf %22, %22 : vector<1x256xf32>
        %27 = arith.subf %25, %26 : vector<1x256xf32>
        %28 = math.exp %23 : vector<1x256xf32>
        %29 = arith.subf %27, %28 : vector<1x256xf32>
        %30 = vector.shape_cast %29 : vector<1x256xf32> to vector<1x1x256xf32>
        %cst_23 = arith.constant dense<0.000000e+00> : vector<1xf32>
        %31 = vector.multi_reduction <add>, %30, %cst_23 [1, 2] : vector<1x1x256xf32> to vector<1xf32>
        %32 = vector.shape_cast %31 : vector<1xf32> to vector<1x1x1xf32>
        %33 = vector.extract %32[0, 0, 0] : f32 from vector<1x1x1xf32>
        %cst_24 = arith.constant -5.000000e-01 : f32
        %34 = arith.mulf %cst_24, %33 : f32
        %35 = tpu.iota {dimensions = array<i32: 2>} : vector<1x1x128xi32>
        %c0_i32_25 = arith.constant 0 : i32
        %36 = vector.broadcast %c0_i32_25 : i32 to vector<1x1x128xi32>
        %37 = arith.cmpi eq, %35, %36 : vector<1x1x128xi32>
        %c0_26 = arith.constant 0 : index
        %c0_27 = arith.constant 0 : index
        %c0_28 = arith.constant 0 : index
        %38 = vector.load %arg6[%c0_26, %c0_27, %c0_28] : memref<1x1x128xf32, #tpu.memory_space<vmem>>, vector<1x1x128xf32>
        %cst_29 = arith.constant 0.000000e+00 : f32
        %39 = vector.broadcast %34 : f32 to vector<1x1x128xf32>
        %40 = vector.broadcast %cst_29 : f32 to vector<1x1x128xf32>
        %41 = arith.select %37, %39, %40 : vector<1x1x128xi1>, vector<1x1x128xf32>
        %42 = arith.addf %38, %41 : vector<1x1x128xf32>
        %c0_30 = arith.constant 0 : index
        %c0_31 = arith.constant 0 : index
        %c0_32 = arith.constant 0 : index
        %43 = vector.load %arg6[%c0_30, %c0_31, %c0_32] : memref<1x1x128xf32, #tpu.memory_space<vmem>>, vector<1x1x128xf32>
        tpu.vector_store %arg6[%c0_30, %c0_31, %c0_32], %42 {strides = array<i32>} : memref<1x1x128xf32, #tpu.memory_space<vmem>>, vector<1x1x128xf32>,
      } else {
      }
    } else {
    }
    return
  }
  func.func @transform_0(%arg0: i32, %arg1: i32) -> (i32, i32) {
    %c1_i32 = arith.constant 1 : i32
    %0 = arith.muli %arg0, %c1_i32 : i32
    %1 = arith.addi %0, %arg1 : i32
    %c0_i32 = arith.constant 0 : i32
    %c0_i32_0 = arith.constant 0 : i32
    return %1, %c0_i32 : i32, i32
  }
  func.func @transform_1(%arg0: i32, %arg1: i32) -> (i32, i32) {
    %c1_i32 = arith.constant 1 : i32
    %0 = arith.muli %arg0, %c1_i32 : i32
    %1 = arith.addi %0, %arg1 : i32
    %c0_i32 = arith.constant 0 : i32
    %c0_i32_0 = arith.constant 0 : i32
    return %1, %c0_i32 : i32, i32
  }
  func.func @transform_2(%arg0: i32, %arg1: i32) -> (i32, i32) {
    %c0_i32 = arith.constant 0 : i32
    %c0_i32_0 = arith.constant 0 : i32
    %c0_i32_1 = arith.constant 0 : i32
    return %c0_i32, %c0_i32_0 : i32, i32
  }
  func.func @transform_3(%arg0: i32, %arg1: i32) -> (i32, i32) {
    %c0_i32 = arith.constant 0 : i32
    %c0_i32_0 = arith.constant 0 : i32
    %c0_i32_1 = arith.constant 0 : i32
    return %c0_i32, %c0_i32_0 : i32, i32
  }
  func.func @transform_4(%arg0: i32, %arg1: i32) -> (i32, i32, i32) {
    %c0_i32 = arith.constant 0 : i32
    %c0_i32_0 = arith.constant 0 : i32
    %c0_i32_1 = arith.constant 0 : i32
    return %arg0, %c0_i32, %c0_i32_0 : i32, i32, i32
  }
}

</mosaic_0001>

<bundles_post_ra>
// kernel: tpu_custom_call.1
= control target key start
LH: loop header
LB: loop body
LE: loop exit
PB: predicated region body
PF: predicated region fallthrough
CT: control target
= control target key end

     0   :  { %9 = vsyncpa [#allocation4], 0  ;;  %s2951_s0 = inlined_call_operand.hbm [shape: f32[4096,128], index: 0, kind: input, shape index: {}]   ;;  %s2952_s1 = inlined_call_operand.hbm [shape: f32[4096,128], index: 1, kind: input, shape index: {}]   ;;  %s2953_s2 = inlined_call_operand.hbm [shape: f32[1,256], index: 2, kind: input, shape index: {}]   ;;  %s2954_s3 = inlined_call_operand.hbm [shape: f32[1,256], index: 3, kind: input, shape index: {}]   ;;  %s2955_s4 = inlined_call_operand.hbm [shape: f32[1,1,128], index: 4, kind: output, shape index: {}]  }
   0x1   :  { %10 = vsyncpa [#allocation7], 0 }
   0x2   :  { %11 = vsyncpa [#allocation10], 0 }
   0x3   :  { %12 = vsyncpa [#allocation5], 0  ;;  %s2850_s15 = smov [#allocation6]   ;;  %s2851_s17 = smov [#allocation3]  }
   0x4   :  { %s38_s16 = sshll.u32 %s2850_s15, 4  ;;  %s22_s18 = sshll.u32 %s2851_s17, 4  ;;  %s39_s16 = int_to_ptr.vmem [resolvable:$true] %s38_s16  ;;  %s2882_s18 = int_to_ptr.vmem [resolvable:$true] %s22_s18 }
   0x5   :  { %s2732_s21 = scalar_lea.hbm %s2952_s1, 65536 }
   0x6   :  { %p2733_p0 = scmp.ne.s32.totalorder %s2952_s1, %s2732_s21  ;;  %p2736_p1 = scmp.lt.u32.totalorder %s2732_s21, %s2952_s1 }
   0x8   :  { %p2738_p2 = pnand %p2736_p1, %p2733_p0 }
   0xa   :  { %2741 = shalt.err (!%p2738_p2)
}
   0xb   :  { %s2742_s26 = scalar_lea.vmem %s39_s16, 65536  ;;  %p2747_p4 = scmp.lt.s32.totalorder %s39_s16, %s39_s16 }
   0xc   :  { %p2743_p3 = scmp.ne.s32.totalorder %s39_s16, %s2742_s26  ;;  %p2748_p5 = scmp.lt.s32.totalorder %s2742_s26, %s2742_s26 }
   0xe   :  { %p2749_p6 = por %p2748_p5, %p2747_p4 }
  0x10   :  { %p2750_p7 = pnand %p2749_p6, %p2743_p3 }
  0x12   :  { %2753 = shalt.err (!%p2750_p7)
}
  0x13   :  { %s2852_s27 = smov 128   ;;  %s2853_s28 = smov 8  }
  0x14   :  { %44 = dma.hbm_to_vmem [thread:$0]  %s2952_s1, 65536, %s39_s16, [#allocation7], %s2852_s27, %s2852_s27, %s2853_s28  }
  0x15   :  { %s2754_s7 = scalar_lea.hbm %s2951_s0, 65536 }
  0x16   :  { %p2755_p8 = scmp.ne.s32.totalorder %s2951_s0, %s2754_s7  ;;  %p2758_p9 = scmp.lt.u32.totalorder %s2754_s7, %s2951_s0 }
  0x18   :  { %p2760_p10 = pnand %p2758_p9, %p2755_p8 }
  0x1a   :  { %2763 = shalt.err (!%p2760_p10)
}
  0x1b   :  { %s2764_s12 = scalar_lea.vmem %s2882_s18, 65536  ;;  %p2769_p12 = scmp.lt.s32.totalorder %s2882_s18, %s2882_s18 }
  0x1c   :  { %p2765_p11 = scmp.ne.s32.totalorder %s2882_s18, %s2764_s12  ;;  %p2770_p13 = scmp.lt.s32.totalorder %s2764_s12, %s2764_s12 }
  0x1e   :  { %p2771_p0 = por %p2770_p13, %p2769_p12 }
  0x20   :  { %p2772_p1 = pnand %p2771_p0, %p2765_p11 }
  0x22   :  { %2775 = shalt.err (!%p2772_p1)
}
  0x23   :  { %28 = dma.hbm_to_vmem [thread:$0]  %s2951_s0, 65536, %s2882_s18, [#allocation4], %s2852_s27, %s2852_s27, %s2853_s28  }
  0x24   :  { %s2854_s14 = smov [#allocation8]   ;;  %s2855_s16 = smov [#allocation9]  }
  0x25   :  { %s51_s15 = sshll.u32 %s2854_s14, 4  ;;  %s61_s17 = sshll.u32 %s2855_s16, 4  ;;  %s52_s15 = int_to_ptr.vmem [resolvable:$true] %s51_s15  ;;  %s62_s17 = int_to_ptr.vmem [resolvable:$true] %s61_s17 }
  0x26   :  { %s2776_s21 = scalar_lea.hbm %s2953_s2, 32 }
  0x27   :  { %p2777_p2 = scmp.ne.s32.totalorder %s2953_s2, %s2776_s21  ;;  %p2780_p3 = scmp.lt.u32.totalorder %s2776_s21, %s2953_s2 }
  0x29   :  { %p2782_p4 = pnand %p2780_p3, %p2777_p2 }
  0x2b   :  { %2785 = shalt.err (!%p2782_p4)
}
  0x2c   :  { %s2786_s0 = scalar_lea.vmem %s52_s15, 32  ;;  %p2791_p6 = scmp.lt.s32.totalorder %s52_s15, %s52_s15 }
  0x2d   :  { %p2787_p5 = scmp.ne.s32.totalorder %s52_s15, %s2786_s0  ;;  %p2792_p7 = scmp.lt.s32.totalorder %s2786_s0, %s2786_s0 }
  0x2f   :  { %p2793_p8 = por %p2792_p7, %p2791_p6 }
  0x31   :  { %p2794_p9 = pnand %p2793_p8, %p2787_p5 }
  0x33   :  { %2797 = shalt.err (!%p2794_p9)
}
  0x34   :  { %54 = dma.hbm_to_vmem [thread:$0]  %s2953_s2, 32, %s52_s15, [#allocation7]  }
  0x35   :  { %s2798_s29 = scalar_lea.hbm %s2954_s3, 32 }
  0x36   :  { %p2799_p10 = scmp.ne.s32.totalorder %s2954_s3, %s2798_s29  ;;  %p2802_p11 = scmp.lt.u32.totalorder %s2798_s29, %s2954_s3 }
  0x38   :  { %p2804_p12 = pnand %p2802_p11, %p2799_p10 }
  0x3a   :  { %2807 = shalt.err (!%p2804_p12)
}
  0x3b   :  { %s2808_s8 = scalar_lea.vmem %s62_s17, 32  ;;  %p2813_p0 = scmp.lt.s32.totalorder %s62_s17, %s62_s17 }
  0x3c   :  { %p2809_p13 = scmp.ne.s32.totalorder %s62_s17, %s2808_s8  ;;  %p2814_p1 = scmp.lt.s32.totalorder %s2808_s8, %s2808_s8 }
  0x3e   :  { %p2815_p2 = por %p2814_p1, %p2813_p0 }
  0x40   :  { %p2816_p3 = pnand %p2815_p2, %p2809_p13 }
  0x42   :  { %2819 = shalt.err (!%p2816_p3)
}
  0x43   :  { %64 = dma.hbm_to_vmem [thread:$0]  %s2954_s3, 32, %s62_s17, [#allocation10]  }
  0x44   :  { %2842 = dma.done.wait [#allocation4], 65536  }
  0x45   :  { %2843 = vsyncadd [#allocation4], 4294901760 }
  0x46   :  { %2844 = dma.done.wait [#allocation7], 65568  }
  0x47   :  { %2845 = vsyncadd [#allocation7], 4294901728 }
  0x48   :  { %2846 = dma.done.wait [#allocation10], 32  }
  0x49   :  { %2847 = vsyncadd [#allocation10], 4294967264  ;;  %v86_v0 = vld [vmem:[#allocation3] sm:$0xff]  ;;  %v87_v1 = vld [vmem:[#allocation3 + $0x8] sm:$0xff]  ;;  %vm2682_vm0 = vcmask 1040384   ;;  %s2856_s11 = smov [#allocation11]  }
  0x4a   :  { %v598_v2 = vld [vmem:[#allocation6] sm:$0xff]  ;;  %v599_v3 = vld [vmem:[#allocation6 + $0x8] sm:$0xff]  ;;  %v88_v4 = vld [vmem:[#allocation3 + $0x10] sm:$0xff]  ;;  %s2710_s12 = sshll.u32 %s2856_s11, 4  ;;  %s2711_s12 = int_to_ptr.vmem [resolvable:$true] %s2710_s12 }
  0x4b   :  { %v600_v5 = vld [vmem:[#allocation6 + $0x10] sm:$0xff]  ;;  %v1110_v6 = vsub.f32 %v86_v0, %v598_v2  ;;  %v1111_v7 = vsub.f32 %v87_v1, %v599_v3  ;;  %v89_v8 = vld [vmem:[#allocation3 + $0x18] sm:$0xff]  ;;  %v90_v11 = vld [vmem:[#allocation3 + $0x20] sm:$0xff]  ;;  %s2820_s1 = scalar_lea.vmem %s2711_s12, 16  ;;  %s2824_s13 = scalar_lea.vmem %s2711_s12, 32 }
  0x4c   :  { %v601_v9 = vld [vmem:[#allocation6 + $0x18] sm:$0xff]  ;;  %v1112_v10 = vsub.f32 %v88_v4, %v600_v5  ;;  %v602_v12 = vld [vmem:[#allocation6 + $0x20] sm:$0xff]  ;;  %v91_v16 = vld [vmem:[#allocation3 + $0x28] sm:$0xff]  ;;  %p2821_p4 = scmp.ne.s32.totalorder %s2711_s12, %s2820_s1  ;;  %p2825_p5 = scmp.lt.s32.totalorder %s2711_s12, %s2711_s12 }
  0x4d   :  { %v1113_v13 = vsub.f32 %v89_v8, %v601_v9  ;;  %v1622_v14 = vmul.f32 %v1110_v6, %v1110_v6  ;;  %v1623_v15 = vmul.f32 %v1111_v7, %v1111_v7  ;;  %v603_v17 = vld [vmem:[#allocation6 + $0x28] sm:$0xff]  ;;  %v1114_v18 = vsub.f32 %v90_v11, %v602_v12  ;;  %v92_v20 = vld [vmem:[#allocation3 + $0x30] sm:$0xff]  ;;  %v93_v25 = vld [vmem:[#allocation3 + $0x38] sm:$0xff]  ;;  %p2826_p6 = scmp.lt.s32.totalorder %s2824_s13, %s2820_s1 }
  0x4e   :  { %v1624_v19 = vmul.f32 %v1112_v10, %v1112_v10  ;;  %v604_v21 = vld [vmem:[#allocation6 + $0x30] sm:$0xff]  ;;  %v1115_v22 = vsub.f32 %v91_v16, %v603_v17  ;;  %v605_v26 = vld [vmem:[#allocation6 + $0x38] sm:$0xff]  ;;  %v94_v30 = vld [vmem:[#allocation3 + $0x40] sm:$0xff] }
  0x4f   :  { %v1625_v23 = vmul.f32 %v1113_v13, %v1113_v13  ;;  %v2135_v24 = vadd.f32 %v1623_v15, %v1622_v14  ;;  %v1116_v27 = vsub.f32 %v92_v20, %v604_v21  ;;  %v1626_v28 = vmul.f32 %v1114_v18, %v1114_v18  ;;  %v606_v31 = vld [vmem:[#allocation6 + $0x40] sm:$0xff]  ;;  %v95_v35 = vld [vmem:[#allocation3 + $0x48] sm:$0xff]  ;;  %v96_v40 = vld [vmem:[#allocation3 + $0x50] sm:$0xff]  ;;  %p2827_p7 = por %p2826_p6, %p2825_p5 }
  0x50   :  { %v1117_v32 = vsub.f32 %v93_v25, %v605_v26  ;;  %v1627_v33 = vmul.f32 %v1115_v22, %v1115_v22  ;;  %v607_v36 = vld [vmem:[#allocation6 + $0x48] sm:$0xff]  ;;  %v1118_v37 = vsub.f32 %v94_v30, %v606_v31  ;;  %v608_v41 = vld [vmem:[#allocation6 + $0x50] sm:$0xff]  ;;  %v97_v45 = vld [vmem:[#allocation3 + $0x58] sm:$0xff] }
  0x51   :  { %v2136_v29 = vadd.f32 %v2135_v24, %v1624_v19  ;;  %v1628_v38 = vmul.f32 %v1116_v27, %v1116_v27  ;;  %v1119_v42 = vsub.f32 %v95_v35, %v607_v36  ;;  %v609_v46 = vld [vmem:[#allocation6 + $0x58] sm:$0xff]  ;;  %v1120_v47 = vsub.f32 %v96_v40, %v608_v41  ;;  %v98_v50 = vld [vmem:[#allocation3 + $0x60] sm:$0xff]  ;;  %v99_v55 = vld [vmem:[#allocation3 + $0x68] sm:$0xff]  ;;  %p2828_p8 = pnand %p2827_p7, %p2821_p4 }
  0x52   :  { %v1629_v43 = vmul.f32 %v1117_v32, %v1117_v32  ;;  %v1630_v48 = vmul.f32 %v1118_v37, %v1118_v37  ;;  %v610_v51 = vld [vmem:[#allocation6 + $0x60] sm:$0xff]  ;;  %v1121_v52 = vsub.f32 %v97_v45, %v609_v46  ;;  %v611_v56 = vld [vmem:[#allocation6 + $0x68] sm:$0xff]  ;;  %v100_v60 = vld [vmem:[#allocation3 + $0x70] sm:$0xff] }
  0x53   :  { %v2137_v34 = vadd.f32 %v2136_v29, %v1625_v23  ;;  %v1631_v53 = vmul.f32 %v1119_v42, %v1119_v42  ;;  %v1122_v57 = vsub.f32 %v98_v50, %v610_v51  ;;  %v1632_v58 = vmul.f32 %v1120_v47, %v1120_v47  ;;  %v612_v61 = vld [vmem:[#allocation6 + $0x70] sm:$0xff]  ;;  %v101_v1 = vld [vmem:[#allocation3 + $0x78] sm:$0xff]  ;;  %v102_v6 = vld [vmem:[#allocation3 + $0x80] sm:$0xff] }
  0x54   :  { %v1123_v62 = vsub.f32 %v99_v55, %v611_v56  ;;  %v1633_v63 = vmul.f32 %v1121_v52, %v1121_v52  ;;  %v613_v2 = vld [vmem:[#allocation6 + $0x78] sm:$0xff]  ;;  %v1124_v3 = vsub.f32 %v100_v60, %v612_v61  ;;  %v614_v7 = vld [vmem:[#allocation6 + $0x80] sm:$0xff]  ;;  %v103_v11 = vld [vmem:[#allocation3 + $0x88] sm:$0xff] }
  0x55   :  { %v2138_v39 = vadd.f32 %v2137_v34, %v1626_v28  ;;  %v1634_v4 = vmul.f32 %v1122_v57, %v1122_v57  ;;  %v1125_v8 = vsub.f32 %v101_v1, %v613_v2  ;;  %v615_v12 = vld [vmem:[#allocation6 + $0x88] sm:$0xff]  ;;  %v1126_v13 = vsub.f32 %v102_v6, %v614_v7  ;;  %v104_v16 = vld [vmem:[#allocation3 + $0x90] sm:$0xff]  ;;  %v105_v21 = vld [vmem:[#allocation3 + $0x98] sm:$0xff] }
  0x56   :  { %v1635_v9 = vmul.f32 %v1123_v62, %v1123_v62  ;;  %v1636_v14 = vmul.f32 %v1124_v3, %v1124_v3  ;;  %v616_v17 = vld [vmem:[#allocation6 + $0x90] sm:$0xff]  ;;  %v1127_v18 = vsub.f32 %v103_v11, %v615_v12  ;;  %v617_v22 = vld [vmem:[#allocation6 + $0x98] sm:$0xff]  ;;  %v106_v26 = vld [vmem:[#allocation3 + $0xa0] sm:$0xff] }
  0x57   :  { %v2139_v44 = vadd.f32 %v2138_v39, %v1627_v33  ;;  %v1637_v19 = vmul.f32 %v1125_v8, %v1125_v8  ;;  %v1128_v23 = vsub.f32 %v104_v16, %v616_v17  ;;  %v1638_v24 = vmul.f32 %v1126_v13, %v1126_v13  ;;  %v618_v27 = vld [vmem:[#allocation6 + $0xa0] sm:$0xff]  ;;  %v107_v31 = vld [vmem:[#allocation3 + $0xa8] sm:$0xff]  ;;  %v108_v36 = vld [vmem:[#allocation3 + $0xb0] sm:$0xff] }
  0x58   :  { %v1129_v28 = vsub.f32 %v105_v21, %v617_v22  ;;  %v1639_v29 = vmul.f32 %v1127_v18, %v1127_v18  ;;  %v619_v32 = vld [vmem:[#allocation6 + $0xa8] sm:$0xff]  ;;  %v1130_v33 = vsub.f32 %v106_v26, %v618_v27  ;;  %v620_v37 = vld [vmem:[#allocation6 + $0xb0] sm:$0xff]  ;;  %v109_v41 = vld [vmem:[#allocation3 + $0xb8] sm:$0xff] }
  0x59   :  { %v2140_v49 = vadd.f32 %v2139_v44, %v1628_v38  ;;  %v1640_v34 = vmul.f32 %v1128_v23, %v1128_v23  ;;  %v1131_v38 = vsub.f32 %v107_v31, %v619_v32  ;;  %v621_v42 = vld [vmem:[#allocation6 + $0xb8] sm:$0xff]  ;;  %v110_v46 = vld [vmem:[#allocation3 + $0xc0] sm:$0xff]  ;;  %v111_v51 = vld [vmem:[#allocation3 + $0xc8] sm:$0xff] }
  0x5a   :  { %v1641_v39 = vmul.f32 %v1129_v28, %v1129_v28  ;;  %v1642_v44 = vmul.f32 %v1130_v33, %v1130_v33  ;;  %v622_v47 = vld [vmem:[#allocation6 + $0xc0] sm:$0xff]  ;;  %v623_v52 = vld [vmem:[#allocation6 + $0xc8] sm:$0xff]  ;;  %v112_v56 = vld [vmem:[#allocation3 + $0xd0] sm:$0xff] }
  0x5b   :  { %v2141_v54 = vadd.f32 %v2140_v49, %v1629_v43  ;;  %v1132_v43 = vsub.f32 %v108_v36, %v620_v37  ;;  %v1643_v49 = vmul.f32 %v1131_v38, %v1131_v38  ;;  %v624_v57 = vld [vmem:[#allocation6 + $0xd0] sm:$0xff]  ;;  %v113_v61 = vld [vmem:[#allocation3 + $0xd8] sm:$0xff]  ;;  %v114_v2 = vld [vmem:[#allocation3 + $0xe0] sm:$0xff] }
  0x5c   :  { %v625_v62 = vld [vmem:[#allocation6 + $0xd8] sm:$0xff]  ;;  %v626_v3 = vld [vmem:[#allocation6 + $0xe0] sm:$0xff]  ;;  %v115_v7 = vld [vmem:[#allocation3 + $0xe8] sm:$0xff] }
  0x5d   :  { %v2142_v59 = vadd.f32 %v2141_v54, %v1630_v48  ;;  %v1133_v48 = vsub.f32 %v109_v41, %v621_v42  ;;  %v1644_v54 = vmul.f32 %v1132_v43, %v1132_v43  ;;  %v627_v8 = vld [vmem:[#allocation6 + $0xe8] sm:$0xff]  ;;  %v116_v12 = vld [vmem:[#allocation3 + $0xf0] sm:$0xff]  ;;  %v117_v17 = vld [vmem:[#allocation3 + $0xf8] sm:$0xff] }
  0x5e   :  { %v628_v13 = vld [vmem:[#allocation6 + $0xf0] sm:$0xff]  ;;  %v629_v18 = vld [vmem:[#allocation6 + $0xf8] sm:$0xff]  ;;  %v118_v22 = vld [vmem:[#allocation3 + $0x100] sm:$0xff] }
  0x5f   :  { %v2143_v0 = vadd.f32 %v2142_v59, %v1631_v53  ;;  %v1134_v53 = vsub.f32 %v110_v46, %v622_v47  ;;  %v1645_v59 = vmul.f32 %v1133_v48, %v1133_v48  ;;  %v630_v23 = vld [vmem:[#allocation6 + $0x100] sm:$0xff]  ;;  %v119_v27 = vld [vmem:[#allocation3 + $0x108] sm:$0xff]  ;;  %v120_v32 = vld [vmem:[#allocation3 + $0x110] sm:$0xff] }
  0x60   :  { %v631_v28 = vld [vmem:[#allocation6 + $0x108] sm:$0xff]  ;;  %v632_v33 = vld [vmem:[#allocation6 + $0x110] sm:$0xff]  ;;  %v121_v37 = vld [vmem:[#allocation3 + $0x118] sm:$0xff] }
  0x61   :  { %v2144_v5 = vadd.f32 %v2143_v0, %v1632_v58  ;;  %v1135_v58 = vsub.f32 %v111_v51, %v623_v52  ;;  %v1646_v0 = vmul.f32 %v1134_v53, %v1134_v53  ;;  %v633_v38 = vld [vmem:[#allocation6 + $0x118] sm:$0xff]  ;;  %v122_v42 = vld [vmem:[#allocation3 + $0x120] sm:$0xff]  ;;  %v123_v47 = vld [vmem:[#allocation3 + $0x128] sm:$0xff] }
  0x62   :  { %v634_v43 = vld [vmem:[#allocation6 + $0x120] sm:$0xff]  ;;  %v635_v48 = vld [vmem:[#allocation6 + $0x128] sm:$0xff]  ;;  %v124_v52 = vld [vmem:[#allocation3 + $0x130] sm:$0xff] }
  0x63   :  { %v2145_v10 = vadd.f32 %v2144_v5, %v1633_v63  ;;  %v1136_v63 = vsub.f32 %v112_v56, %v624_v57  ;;  %v1647_v5 = vmul.f32 %v1135_v58, %v1135_v58  ;;  %v636_v53 = vld [vmem:[#allocation6 + $0x130] sm:$0xff]  ;;  %v125_v57 = vld [vmem:[#allocation3 + $0x138] sm:$0xff] }
  0x64   :  { %v637_v58 = vld [vmem:[#allocation6 + $0x138] sm:$0xff] }
  0x65   :  { %v2146_v15 = vadd.f32 %v2145_v10, %v1634_v4  ;;  %v1137_v4 = vsub.f32 %v113_v61, %v625_v62  ;;  %v1648_v10 = vmul.f32 %v1136_v63, %v1136_v63  ;;  %v126_v62 = vld [vmem:[#allocation3 + $0x140] sm:$0xff] }
  0x66   :  { %v638_v63 = vld [vmem:[#allocation6 + $0x140] sm:$0xff] }
  0x67   :  { %v2147_v20 = vadd.f32 %v2146_v15, %v1635_v9  ;;  %v1138_v9 = vsub.f32 %v114_v2, %v626_v3  ;;  %v1649_v15 = vmul.f32 %v1137_v4, %v1137_v4  ;;  %v127_v3 = vld [vmem:[#allocation3 + $0x148] sm:$0xff] }
  0x68   :  { %v639_v4 = vld [vmem:[#allocation6 + $0x148] sm:$0xff] }
  0x69   :  { %v2148_v25 = vadd.f32 %v2147_v20, %v1636_v14  ;;  %v1139_v14 = vsub.f32 %v115_v7, %v627_v8  ;;  %v1650_v20 = vmul.f32 %v1138_v9, %v1138_v9  ;;  %v128_v8 = vld [vmem:[#allocation3 + $0x150] sm:$0xff] }
  0x6a   :  { %v640_v9 = vld [vmem:[#allocation6 + $0x150] sm:$0xff] }
  0x6b   :  { %v2149_v30 = vadd.f32 %v2148_v25, %v1637_v19  ;;  %v1140_v19 = vsub.f32 %v116_v12, %v628_v13  ;;  %v1651_v25 = vmul.f32 %v1139_v14, %v1139_v14  ;;  %v129_v13 = vld [vmem:[#allocation3 + $0x158] sm:$0xff] }
  0x6c   :  { %v641_v14 = vld [vmem:[#allocation6 + $0x158] sm:$0xff] }
  0x6d   :  { %v2150_v35 = vadd.f32 %v2149_v30, %v1638_v24  ;;  %v1141_v24 = vsub.f32 %v117_v17, %v629_v18  ;;  %v1652_v30 = vmul.f32 %v1140_v19, %v1140_v19  ;;  %v130_v18 = vld [vmem:[#allocation3 + $0x160] sm:$0xff] }
  0x6e   :  { %v642_v19 = vld [vmem:[#allocation6 + $0x160] sm:$0xff] }
  0x6f   :  { %v2151_v40 = vadd.f32 %v2150_v35, %v1639_v29  ;;  %v1142_v29 = vsub.f32 %v118_v22, %v630_v23  ;;  %v1653_v35 = vmul.f32 %v1141_v24, %v1141_v24  ;;  %v131_v23 = vld [vmem:[#allocation3 + $0x168] sm:$0xff] }
  0x70   :  { %v643_v24 = vld [vmem:[#allocation6 + $0x168] sm:$0xff] }
  0x71   :  { %v2152_v45 = vadd.f32 %v2151_v40, %v1640_v34  ;;  %v1143_v34 = vsub.f32 %v119_v27, %v631_v28  ;;  %v1654_v40 = vmul.f32 %v1142_v29, %v1142_v29  ;;  %v132_v28 = vld [vmem:[#allocation3 + $0x170] sm:$0xff] }
  0x72   :  { %v644_v29 = vld [vmem:[#allocation6 + $0x170] sm:$0xff] }
  0x73   :  { %v2153_v50 = vadd.f32 %v2152_v45, %v1641_v39  ;;  %v1144_v39 = vsub.f32 %v120_v32, %v632_v33  ;;  %v1655_v45 = vmul.f32 %v1143_v34, %v1143_v34  ;;  %v133_v33 = vld [vmem:[#allocation3 + $0x178] sm:$0xff] }
  0x74   :  { %v645_v34 = vld [vmem:[#allocation6 + $0x178] sm:$0xff] }
  0x75   :  { %v2154_v55 = vadd.f32 %v2153_v50, %v1642_v44  ;;  %v1145_v44 = vsub.f32 %v121_v37, %v633_v38  ;;  %v1656_v50 = vmul.f32 %v1144_v39, %v1144_v39  ;;  %v134_v38 = vld [vmem:[#allocation3 + $0x180] sm:$0xff] }
  0x76   :  { %v646_v39 = vld [vmem:[#allocation6 + $0x180] sm:$0xff] }
  0x77   :  { %v2155_v60 = vadd.f32 %v2154_v55, %v1643_v49  ;;  %v1146_v49 = vsub.f32 %v122_v42, %v634_v43  ;;  %v1657_v55 = vmul.f32 %v1145_v44, %v1145_v44  ;;  %v135_v43 = vld [vmem:[#allocation3 + $0x188] sm:$0xff] }
  0x78   :  { %v647_v44 = vld [vmem:[#allocation6 + $0x188] sm:$0xff] }
  0x79   :  { %v2156_v1 = vadd.f32 %v2155_v60, %v1644_v54  ;;  %v1147_v54 = vsub.f32 %v123_v47, %v635_v48  ;;  %v1658_v60 = vmul.f32 %v1146_v49, %v1146_v49  ;;  %v136_v48 = vld [vmem:[#allocation3 + $0x190] sm:$0xff] }
  0x7a   :  { %v648_v49 = vld [vmem:[#allocation6 + $0x190] sm:$0xff] }
  0x7b   :  { %v2157_v6 = vadd.f32 %v2156_v1, %v1645_v59  ;;  %v1148_v59 = vsub.f32 %v124_v52, %v636_v53  ;;  %v1659_v1 = vmul.f32 %v1147_v54, %v1147_v54  ;;  %v137_v53 = vld [vmem:[#allocation3 + $0x198] sm:$0xff] }
  0x7c   :  { %v649_v54 = vld [vmem:[#allocation6 + $0x198] sm:$0xff] }
  0x7d   :  { %v2158_v11 = vadd.f32 %v2157_v6, %v1646_v0  ;;  %v1149_v0 = vsub.f32 %v125_v57, %v637_v58  ;;  %v1660_v6 = vmul.f32 %v1148_v59, %v1148_v59  ;;  %v138_v58 = vld [vmem:[#allocation3 + $0x1a0] sm:$0xff] }
  0x7e   :  { %v650_v59 = vld [vmem:[#allocation6 + $0x1a0] sm:$0xff] }
  0x7f   :  { %v2159_v16 = vadd.f32 %v2158_v11, %v1647_v5  ;;  %v1150_v5 = vsub.f32 %v126_v62, %v638_v63  ;;  %v1661_v11 = vmul.f32 %v1149_v0, %v1149_v0  ;;  %v139_v63 = vld [vmem:[#allocation3 + $0x1a8] sm:$0xff] }
  0x80   :  { %v651_v0 = vld [vmem:[#allocation6 + $0x1a8] sm:$0xff] }
  0x81   :  { %v2160_v21 = vadd.f32 %v2159_v16, %v1648_v10  ;;  %v1151_v10 = vsub.f32 %v127_v3, %v639_v4  ;;  %v1662_v16 = vmul.f32 %v1150_v5, %v1150_v5  ;;  %v140_v4 = vld [vmem:[#allocation3 + $0x1b0] sm:$0xff] }
  0x82   :  { %v652_v5 = vld [vmem:[#allocation6 + $0x1b0] sm:$0xff] }
  0x83   :  { %v2161_v26 = vadd.f32 %v2160_v21, %v1649_v15  ;;  %v1152_v15 = vsub.f32 %v128_v8, %v640_v9  ;;  %v1663_v21 = vmul.f32 %v1151_v10, %v1151_v10  ;;  %v141_v9 = vld [vmem:[#allocation3 + $0x1b8] sm:$0xff] }
  0x84   :  { %v653_v10 = vld [vmem:[#allocation6 + $0x1b8] sm:$0xff] }
  0x85   :  { %v2162_v31 = vadd.f32 %v2161_v26, %v1650_v20  ;;  %v1153_v20 = vsub.f32 %v129_v13, %v641_v14  ;;  %v1664_v26 = vmul.f32 %v1152_v15, %v1152_v15  ;;  %v142_v14 = vld [vmem:[#allocation3 + $0x1c0] sm:$0xff] }
  0x86   :  { %v654_v15 = vld [vmem:[#allocation6 + $0x1c0] sm:$0xff] }
  0x87   :  { %v2163_v36 = vadd.f32 %v2162_v31, %v1651_v25  ;;  %v1154_v25 = vsub.f32 %v130_v18, %v642_v19  ;;  %v1665_v31 = vmul.f32 %v1153_v20, %v1153_v20  ;;  %v143_v19 = vld [vmem:[#allocation3 + $0x1c8] sm:$0xff] }
  0x88   :  { %v655_v20 = vld [vmem:[#allocation6 + $0x1c8] sm:$0xff] }
  0x89   :  { %v2164_v41 = vadd.f32 %v2163_v36, %v1652_v30  ;;  %v1155_v30 = vsub.f32 %v131_v23, %v643_v24  ;;  %v1666_v36 = vmul.f32 %v1154_v25, %v1154_v25  ;;  %v144_v24 = vld [vmem:[#allocation3 + $0x1d0] sm:$0xff] }
  0x8a   :  { %v656_v25 = vld [vmem:[#allocation6 + $0x1d0] sm:$0xff] }
  0x8b   :  { %v2165_v46 = vadd.f32 %v2164_v41, %v1653_v35  ;;  %v1156_v35 = vsub.f32 %v132_v28, %v644_v29  ;;  %v1667_v41 = vmul.f32 %v1155_v30, %v1155_v30  ;;  %v145_v29 = vld [vmem:[#allocation3 + $0x1d8] sm:$0xff] }
  0x8c   :  { %v657_v30 = vld [vmem:[#allocation6 + $0x1d8] sm:$0xff] }
  0x8d   :  { %v2166_v51 = vadd.f32 %v2165_v46, %v1654_v40  ;;  %v1157_v40 = vsub.f32 %v133_v33, %v645_v34  ;;  %v1668_v46 = vmul.f32 %v1156_v35, %v1156_v35  ;;  %v146_v34 = vld [vmem:[#allocation3 + $0x1e0] sm:$0xff] }
  0x8e   :  { %v658_v35 = vld [vmem:[#allocation6 + $0x1e0] sm:$0xff] }
  0x8f   :  { %v2167_v56 = vadd.f32 %v2166_v51, %v1655_v45  ;;  %v1158_v45 = vsub.f32 %v134_v38, %v646_v39  ;;  %v1669_v51 = vmul.f32 %v1157_v40, %v1157_v40  ;;  %v147_v39 = vld [vmem:[#allocation3 + $0x1e8] sm:$0xff] }
  0x90   :  { %v659_v40 = vld [vmem:[#allocation6 + $0x1e8] sm:$0xff] }
  0x91   :  { %v2168_v61 = vadd.f32 %v2167_v56, %v1656_v50  ;;  %v1159_v50 = vsub.f32 %v135_v43, %v647_v44  ;;  %v1670_v56 = vmul.f32 %v1158_v45, %v1158_v45  ;;  %v148_v44 = vld [vmem:[#allocation3 + $0x1f0] sm:$0xff] }
  0x92   :  { %v660_v45 = vld [vmem:[#allocation6 + $0x1f0] sm:$0xff] }
  0x93   :  { %v2169_v2 = vadd.f32 %v2168_v61, %v1657_v55  ;;  %v1160_v55 = vsub.f32 %v136_v48, %v648_v49  ;;  %v1671_v61 = vmul.f32 %v1159_v50, %v1159_v50  ;;  %v149_v49 = vld [vmem:[#allocation3 + $0x1f8] sm:$0xff] }
  0x94   :  { %v661_v50 = vld [vmem:[#allocation6 + $0x1f8] sm:$0xff] }
  0x95   :  { %v2170_v7 = vadd.f32 %v2169_v2, %v1658_v60  ;;  %v1161_v60 = vsub.f32 %v137_v53, %v649_v54  ;;  %v1672_v2 = vmul.f32 %v1160_v55, %v1160_v55  ;;  %v150_v54 = vld [vmem:[#allocation3 + $0x200] sm:$0xff] }
  0x96   :  { %v662_v55 = vld [vmem:[#allocation6 + $0x200] sm:$0xff] }
  0x97   :  { %v2171_v12 = vadd.f32 %v2170_v7, %v1659_v1  ;;  %v1162_v1 = vsub.f32 %v138_v58, %v650_v59  ;;  %v1673_v7 = vmul.f32 %v1161_v60, %v1161_v60  ;;  %v151_v59 = vld [vmem:[#allocation3 + $0x208] sm:$0xff] }
  0x98   :  { %v663_v60 = vld [vmem:[#allocation6 + $0x208] sm:$0xff] }
  0x99   :  { %v2172_v17 = vadd.f32 %v2171_v12, %v1660_v6  ;;  %v1163_v6 = vsub.f32 %v139_v63, %v651_v0  ;;  %v1674_v12 = vmul.f32 %v1162_v1, %v1162_v1  ;;  %v152_v0 = vld [vmem:[#allocation3 + $0x210] sm:$0xff] }
  0x9a   :  { %v664_v1 = vld [vmem:[#allocation6 + $0x210] sm:$0xff] }
  0x9b   :  { %v2173_v22 = vadd.f32 %v2172_v17, %v1661_v11  ;;  %v1164_v11 = vsub.f32 %v140_v4, %v652_v5  ;;  %v1675_v17 = vmul.f32 %v1163_v6, %v1163_v6  ;;  %v153_v5 = vld [vmem:[#allocation3 + $0x218] sm:$0xff] }
  0x9c   :  { %v665_v6 = vld [vmem:[#allocation6 + $0x218] sm:$0xff] }
  0x9d   :  { %v2174_v27 = vadd.f32 %v2173_v22, %v1662_v16  ;;  %v1165_v16 = vsub.f32 %v141_v9, %v653_v10  ;;  %v1676_v22 = vmul.f32 %v1164_v11, %v1164_v11  ;;  %v154_v10 = vld [vmem:[#allocation3 + $0x220] sm:$0xff] }
  0x9e   :  { %v666_v11 = vld [vmem:[#allocation6 + $0x220] sm:$0xff] }
  0x9f   :  { %v2175_v32 = vadd.f32 %v2174_v27, %v1663_v21  ;;  %v1166_v21 = vsub.f32 %v142_v14, %v654_v15  ;;  %v1677_v27 = vmul.f32 %v1165_v16, %v1165_v16  ;;  %v155_v15 = vld [vmem:[#allocation3 + $0x228] sm:$0xff] }
  0xa0   :  { %v667_v16 = vld [vmem:[#allocation6 + $0x228] sm:$0xff] }
  0xa1   :  { %v2176_v37 = vadd.f32 %v2175_v32, %v1664_v26  ;;  %v1167_v26 = vsub.f32 %v143_v19, %v655_v20  ;;  %v1678_v32 = vmul.f32 %v1166_v21, %v1166_v21  ;;  %v156_v20 = vld [vmem:[#allocation3 + $0x230] sm:$0xff] }
  0xa2   :  { %v668_v21 = vld [vmem:[#allocation6 + $0x230] sm:$0xff] }
  0xa3   :  { %v2177_v42 = vadd.f32 %v2176_v37, %v1665_v31  ;;  %v1168_v31 = vsub.f32 %v144_v24, %v656_v25  ;;  %v1679_v37 = vmul.f32 %v1167_v26, %v1167_v26  ;;  %v157_v25 = vld [vmem:[#allocation3 + $0x238] sm:$0xff] }
  0xa4   :  { %v669_v26 = vld [vmem:[#allocation6 + $0x238] sm:$0xff] }
  0xa5   :  { %v2178_v47 = vadd.f32 %v2177_v42, %v1666_v36  ;;  %v1169_v36 = vsub.f32 %v145_v29, %v657_v30  ;;  %v1680_v42 = vmul.f32 %v1168_v31, %v1168_v31  ;;  %v158_v30 = vld [vmem:[#allocation3 + $0x240] sm:$0xff] }
  0xa6   :  { %v670_v31 = vld [vmem:[#allocation6 + $0x240] sm:$0xff] }
  0xa7   :  { %v2179_v52 = vadd.f32 %v2178_v47, %v1667_v41  ;;  %v1170_v41 = vsub.f32 %v146_v34, %v658_v35  ;;  %v1681_v47 = vmul.f32 %v1169_v36, %v1169_v36  ;;  %v159_v35 = vld [vmem:[#allocation3 + $0x248] sm:$0xff] }
  0xa8   :  { %v671_v36 = vld [vmem:[#allocation6 + $0x248] sm:$0xff] }
  0xa9   :  { %v2180_v57 = vadd.f32 %v2179_v52, %v1668_v46  ;;  %v1171_v46 = vsub.f32 %v147_v39, %v659_v40  ;;  %v1682_v52 = vmul.f32 %v1170_v41, %v1170_v41  ;;  %v160_v40 = vld [vmem:[#allocation3 + $0x250] sm:$0xff] }
  0xaa   :  { %v672_v41 = vld [vmem:[#allocation6 + $0x250] sm:$0xff] }
  0xab   :  { %v2181_v62 = vadd.f32 %v2180_v57, %v1669_v51  ;;  %v1172_v51 = vsub.f32 %v148_v44, %v660_v45  ;;  %v1683_v57 = vmul.f32 %v1171_v46, %v1171_v46  ;;  %v161_v45 = vld [vmem:[#allocation3 + $0x258] sm:$0xff] }
  0xac   :  { %v673_v46 = vld [vmem:[#allocation6 + $0x258] sm:$0xff] }
  0xad   :  { %v2182_v3 = vadd.f32 %v2181_v62, %v1670_v56  ;;  %v1173_v56 = vsub.f32 %v149_v49, %v661_v50  ;;  %v1684_v62 = vmul.f32 %v1172_v51, %v1172_v51  ;;  %v162_v50 = vld [vmem:[#allocation3 + $0x260] sm:$0xff] }
  0xae   :  { %v674_v51 = vld [vmem:[#allocation6 + $0x260] sm:$0xff] }
  0xaf   :  { %v2183_v8 = vadd.f32 %v2182_v3, %v1671_v61  ;;  %v1174_v61 = vsub.f32 %v150_v54, %v662_v55  ;;  %v1685_v3 = vmul.f32 %v1173_v56, %v1173_v56  ;;  %v163_v55 = vld [vmem:[#allocation3 + $0x268] sm:$0xff] }
  0xb0   :  { %v675_v56 = vld [vmem:[#allocation6 + $0x268] sm:$0xff] }
  0xb1   :  { %v2184_v13 = vadd.f32 %v2183_v8, %v1672_v2  ;;  %v1175_v2 = vsub.f32 %v151_v59, %v663_v60  ;;  %v1686_v8 = vmul.f32 %v1174_v61, %v1174_v61  ;;  %v164_v60 = vld [vmem:[#allocation3 + $0x270] sm:$0xff] }
  0xb2   :  { %v676_v61 = vld [vmem:[#allocation6 + $0x270] sm:$0xff] }
  0xb3   :  { %v2185_v18 = vadd.f32 %v2184_v13, %v1673_v7  ;;  %v1176_v7 = vsub.f32 %v152_v0, %v664_v1  ;;  %v1687_v13 = vmul.f32 %v1175_v2, %v1175_v2  ;;  %v165_v1 = vld [vmem:[#allocation3 + $0x278] sm:$0xff] }
  0xb4   :  { %v677_v2 = vld [vmem:[#allocation6 + $0x278] sm:$0xff] }
  0xb5   :  { %v2186_v23 = vadd.f32 %v2185_v18, %v1674_v12  ;;  %v1177_v12 = vsub.f32 %v153_v5, %v665_v6  ;;  %v1688_v18 = vmul.f32 %v1176_v7, %v1176_v7  ;;  %v166_v6 = vld [vmem:[#allocation3 + $0x280] sm:$0xff] }
  0xb6   :  { %v678_v7 = vld [vmem:[#allocation6 + $0x280] sm:$0xff] }
  0xb7   :  { %v2187_v28 = vadd.f32 %v2186_v23, %v1675_v17  ;;  %v1178_v17 = vsub.f32 %v154_v10, %v666_v11  ;;  %v1689_v23 = vmul.f32 %v1177_v12, %v1177_v12  ;;  %v167_v11 = vld [vmem:[#allocation3 + $0x288] sm:$0xff] }
  0xb8   :  { %v679_v12 = vld [vmem:[#allocation6 + $0x288] sm:$0xff] }
  0xb9   :  { %v2188_v33 = vadd.f32 %v2187_v28, %v1676_v22  ;;  %v1179_v22 = vsub.f32 %v155_v15, %v667_v16  ;;  %v1690_v28 = vmul.f32 %v1178_v17, %v1178_v17  ;;  %v168_v16 = vld [vmem:[#allocation3 + $0x290] sm:$0xff] }
  0xba   :  { %v680_v17 = vld [vmem:[#allocation6 + $0x290] sm:$0xff] }
  0xbb   :  { %v2189_v38 = vadd.f32 %v2188_v33, %v1677_v27  ;;  %v1180_v27 = vsub.f32 %v156_v20, %v668_v21  ;;  %v1691_v33 = vmul.f32 %v1179_v22, %v1179_v22  ;;  %v169_v21 = vld [vmem:[#allocation3 + $0x298] sm:$0xff] }
  0xbc   :  { %v681_v22 = vld [vmem:[#allocation6 + $0x298] sm:$0xff] }
  0xbd   :  { %v2190_v43 = vadd.f32 %v2189_v38, %v1678_v32  ;;  %v1181_v32 = vsub.f32 %v157_v25, %v669_v26  ;;  %v1692_v38 = vmul.f32 %v1180_v27, %v1180_v27  ;;  %v170_v26 = vld [vmem:[#allocation3 + $0x2a0] sm:$0xff] }
  0xbe   :  { %v682_v27 = vld [vmem:[#allocation6 + $0x2a0] sm:$0xff] }
  0xbf   :  { %v2191_v48 = vadd.f32 %v2190_v43, %v1679_v37  ;;  %v1182_v37 = vsub.f32 %v158_v30, %v670_v31  ;;  %v1693_v43 = vmul.f32 %v1181_v32, %v1181_v32  ;;  %v171_v31 = vld [vmem:[#allocation3 + $0x2a8] sm:$0xff] }
  0xc0   :  { %v683_v32 = vld [vmem:[#allocation6 + $0x2a8] sm:$0xff] }
  0xc1   :  { %v2192_v53 = vadd.f32 %v2191_v48, %v1680_v42  ;;  %v1183_v42 = vsub.f32 %v159_v35, %v671_v36  ;;  %v1694_v48 = vmul.f32 %v1182_v37, %v1182_v37  ;;  %v172_v36 = vld [vmem:[#allocation3 + $0x2b0] sm:$0xff] }
  0xc2   :  { %v684_v37 = vld [vmem:[#allocation6 + $0x2b0] sm:$0xff] }
  0xc3   :  { %v2193_v58 = vadd.f32 %v2192_v53, %v1681_v47  ;;  %v1184_v47 = vsub.f32 %v160_v40, %v672_v41  ;;  %v1695_v53 = vmul.f32 %v1183_v42, %v1183_v42  ;;  %v173_v41 = vld [vmem:[#allocation3 + $0x2b8] sm:$0xff] }
  0xc4   :  { %v685_v42 = vld [vmem:[#allocation6 + $0x2b8] sm:$0xff] }
  0xc5   :  { %v2194_v63 = vadd.f32 %v2193_v58, %v1682_v52  ;;  %v1185_v52 = vsub.f32 %v161_v45, %v673_v46  ;;  %v1696_v58 = vmul.f32 %v1184_v47, %v1184_v47  ;;  %v174_v46 = vld [vmem:[#allocation3 + $0x2c0] sm:$0xff] }
  0xc6   :  { %v686_v47 = vld [vmem:[#allocation6 + $0x2c0] sm:$0xff] }
  0xc7   :  { %v2195_v4 = vadd.f32 %v2194_v63, %v1683_v57  ;;  %v1186_v57 = vsub.f32 %v162_v50, %v674_v51  ;;  %v1697_v63 = vmul.f32 %v1185_v52, %v1185_v52  ;;  %v175_v51 = vld [vmem:[#allocation3 + $0x2c8] sm:$0xff] }
  0xc8   :  { %v687_v52 = vld [vmem:[#allocation6 + $0x2c8] sm:$0xff] }
  0xc9   :  { %v2196_v9 = vadd.f32 %v2195_v4, %v1684_v62  ;;  %v1187_v62 = vsub.f32 %v163_v55, %v675_v56  ;;  %v1698_v4 = vmul.f32 %v1186_v57, %v1186_v57  ;;  %v176_v56 = vld [vmem:[#allocation3 + $0x2d0] sm:$0xff] }
  0xca   :  { %v688_v57 = vld [vmem:[#allocation6 + $0x2d0] sm:$0xff] }
  0xcb   :  { %v2197_v14 = vadd.f32 %v2196_v9, %v1685_v3  ;;  %v1188_v3 = vsub.f32 %v164_v60, %v676_v61  ;;  %v1699_v9 = vmul.f32 %v1187_v62, %v1187_v62  ;;  %v177_v61 = vld [vmem:[#allocation3 + $0x2d8] sm:$0xff] }
  0xcc   :  { %v689_v62 = vld [vmem:[#allocation6 + $0x2d8] sm:$0xff] }
  0xcd   :  { %v2198_v19 = vadd.f32 %v2197_v14, %v1686_v8  ;;  %v1189_v8 = vsub.f32 %v165_v1, %v677_v2  ;;  %v1700_v14 = vmul.f32 %v1188_v3, %v1188_v3  ;;  %v178_v2 = vld [vmem:[#allocation3 + $0x2e0] sm:$0xff] }
  0xce   :  { %v690_v3 = vld [vmem:[#allocation6 + $0x2e0] sm:$0xff] }
  0xcf   :  { %v2199_v24 = vadd.f32 %v2198_v19, %v1687_v13  ;;  %v1190_v13 = vsub.f32 %v166_v6, %v678_v7  ;;  %v1701_v19 = vmul.f32 %v1189_v8, %v1189_v8  ;;  %v179_v7 = vld [vmem:[#allocation3 + $0x2e8] sm:$0xff] }
  0xd0   :  { %v691_v8 = vld [vmem:[#allocation6 + $0x2e8] sm:$0xff] }
  0xd1   :  { %v2200_v29 = vadd.f32 %v2199_v24, %v1688_v18  ;;  %v1191_v18 = vsub.f32 %v167_v11, %v679_v12  ;;  %v1702_v24 = vmul.f32 %v1190_v13, %v1190_v13  ;;  %v180_v12 = vld [vmem:[#allocation3 + $0x2f0] sm:$0xff] }
  0xd2   :  { %v692_v13 = vld [vmem:[#allocation6 + $0x2f0] sm:$0xff] }
  0xd3   :  { %v2201_v34 = vadd.f32 %v2200_v29, %v1689_v23  ;;  %v1192_v23 = vsub.f32 %v168_v16, %v680_v17  ;;  %v1703_v29 = vmul.f32 %v1191_v18, %v1191_v18  ;;  %v181_v17 = vld [vmem:[#allocation3 + $0x2f8] sm:$0xff] }
  0xd4   :  { %v693_v18 = vld [vmem:[#allocation6 + $0x2f8] sm:$0xff] }
  0xd5   :  { %v2202_v39 = vadd.f32 %v2201_v34, %v1690_v28  ;;  %v1193_v28 = vsub.f32 %v169_v21, %v681_v22  ;;  %v1704_v34 = vmul.f32 %v1192_v23, %v1192_v23  ;;  %v182_v22 = vld [vmem:[#allocation3 + $0x300] sm:$0xff] }
  0xd6   :  { %v694_v23 = vld [vmem:[#allocation6 + $0x300] sm:$0xff] }
  0xd7   :  { %v2203_v44 = vadd.f32 %v2202_v39, %v1691_v33  ;;  %v1194_v33 = vsub.f32 %v170_v26, %v682_v27  ;;  %v1705_v39 = vmul.f32 %v1193_v28, %v1193_v28  ;;  %v183_v27 = vld [vmem:[#allocation3 + $0x308] sm:$0xff] }
  0xd8   :  { %v695_v28 = vld [vmem:[#allocation6 + $0x308] sm:$0xff] }
  0xd9   :  { %v2204_v49 = vadd.f32 %v2203_v44, %v1692_v38  ;;  %v1195_v38 = vsub.f32 %v171_v31, %v683_v32  ;;  %v1706_v44 = vmul.f32 %v1194_v33, %v1194_v33  ;;  %v184_v32 = vld [vmem:[#allocation3 + $0x310] sm:$0xff] }
  0xda   :  { %v696_v33 = vld [vmem:[#allocation6 + $0x310] sm:$0xff] }
  0xdb   :  { %v2205_v54 = vadd.f32 %v2204_v49, %v1693_v43  ;;  %v1196_v43 = vsub.f32 %v172_v36, %v684_v37  ;;  %v1707_v49 = vmul.f32 %v1195_v38, %v1195_v38  ;;  %v185_v37 = vld [vmem:[#allocation3 + $0x318] sm:$0xff] }
  0xdc   :  { %v697_v38 = vld [vmem:[#allocation6 + $0x318] sm:$0xff] }
  0xdd   :  { %v2206_v59 = vadd.f32 %v2205_v54, %v1694_v48  ;;  %v1197_v48 = vsub.f32 %v173_v41, %v685_v42  ;;  %v1708_v54 = vmul.f32 %v1196_v43, %v1196_v43  ;;  %v186_v42 = vld [vmem:[#allocation3 + $0x320] sm:$0xff] }
  0xde   :  { %v698_v43 = vld [vmem:[#allocation6 + $0x320] sm:$0xff] }
  0xdf   :  { %v2207_v0 = vadd.f32 %v2206_v59, %v1695_v53  ;;  %v1198_v53 = vsub.f32 %v174_v46, %v686_v47  ;;  %v1709_v59 = vmul.f32 %v1197_v48, %v1197_v48  ;;  %v187_v47 = vld [vmem:[#allocation3 + $0x328] sm:$0xff] }
  0xe0   :  { %v699_v48 = vld [vmem:[#allocation6 + $0x328] sm:$0xff] }
  0xe1   :  { %v2208_v5 = vadd.f32 %v2207_v0, %v1696_v58  ;;  %v1199_v58 = vsub.f32 %v175_v51, %v687_v52  ;;  %v1710_v0 = vmul.f32 %v1198_v53, %v1198_v53  ;;  %v188_v52 = vld [vmem:[#allocation3 + $0x330] sm:$0xff] }
  0xe2   :  { %v700_v53 = vld [vmem:[#allocation6 + $0x330] sm:$0xff] }
  0xe3   :  { %v2209_v10 = vadd.f32 %v2208_v5, %v1697_v63  ;;  %v1200_v63 = vsub.f32 %v176_v56, %v688_v57  ;;  %v1711_v5 = vmul.f32 %v1199_v58, %v1199_v58  ;;  %v189_v57 = vld [vmem:[#allocation3 + $0x338] sm:$0xff] }
  0xe4   :  { %v701_v58 = vld [vmem:[#allocation6 + $0x338] sm:$0xff] }
  0xe5   :  { %v2210_v15 = vadd.f32 %v2209_v10, %v1698_v4  ;;  %v1201_v4 = vsub.f32 %v177_v61, %v689_v62  ;;  %v1712_v10 = vmul.f32 %v1200_v63, %v1200_v63  ;;  %v190_v62 = vld [vmem:[#allocation3 + $0x340] sm:$0xff] }
  0xe6   :  { %v702_v63 = vld [vmem:[#allocation6 + $0x340] sm:$0xff] }
  0xe7   :  { %v2211_v20 = vadd.f32 %v2210_v15, %v1699_v9  ;;  %v1202_v9 = vsub.f32 %v178_v2, %v690_v3  ;;  %v1713_v15 = vmul.f32 %v1201_v4, %v1201_v4  ;;  %v191_v3 = vld [vmem:[#allocation3 + $0x348] sm:$0xff] }
  0xe8   :  { %v703_v4 = vld [vmem:[#allocation6 + $0x348] sm:$0xff] }
  0xe9   :  { %v2212_v25 = vadd.f32 %v2211_v20, %v1700_v14  ;;  %v1203_v14 = vsub.f32 %v179_v7, %v691_v8  ;;  %v1714_v20 = vmul.f32 %v1202_v9, %v1202_v9  ;;  %v192_v8 = vld [vmem:[#allocation3 + $0x350] sm:$0xff] }
  0xea   :  { %v704_v9 = vld [vmem:[#allocation6 + $0x350] sm:$0xff] }
  0xeb   :  { %v2213_v30 = vadd.f32 %v2212_v25, %v1701_v19  ;;  %v1204_v19 = vsub.f32 %v180_v12, %v692_v13  ;;  %v1715_v25 = vmul.f32 %v1203_v14, %v1203_v14  ;;  %v193_v13 = vld [vmem:[#allocation3 + $0x358] sm:$0xff] }
  0xec   :  { %v705_v14 = vld [vmem:[#allocation6 + $0x358] sm:$0xff] }
  0xed   :  { %v2214_v35 = vadd.f32 %v2213_v30, %v1702_v24  ;;  %v1205_v24 = vsub.f32 %v181_v17, %v693_v18  ;;  %v1716_v30 = vmul.f32 %v1204_v19, %v1204_v19  ;;  %v194_v18 = vld [vmem:[#allocation3 + $0x360] sm:$0xff] }
  0xee   :  { %v706_v19 = vld [vmem:[#allocation6 + $0x360] sm:$0xff] }
  0xef   :  { %v2215_v40 = vadd.f32 %v2214_v35, %v1703_v29  ;;  %v1206_v29 = vsub.f32 %v182_v22, %v694_v23  ;;  %v1717_v35 = vmul.f32 %v1205_v24, %v1205_v24  ;;  %v195_v23 = vld [vmem:[#allocation3 + $0x368] sm:$0xff] }
  0xf0   :  { %v707_v24 = vld [vmem:[#allocation6 + $0x368] sm:$0xff] }
  0xf1   :  { %v2216_v45 = vadd.f32 %v2215_v40, %v1704_v34  ;;  %v1207_v34 = vsub.f32 %v183_v27, %v695_v28  ;;  %v1718_v40 = vmul.f32 %v1206_v29, %v1206_v29  ;;  %v196_v28 = vld [vmem:[#allocation3 + $0x370] sm:$0xff] }
  0xf2   :  { %v708_v29 = vld [vmem:[#allocation6 + $0x370] sm:$0xff] }
  0xf3   :  { %v2217_v50 = vadd.f32 %v2216_v45, %v1705_v39  ;;  %v1208_v39 = vsub.f32 %v184_v32, %v696_v33  ;;  %v1719_v45 = vmul.f32 %v1207_v34, %v1207_v34  ;;  %v197_v33 = vld [vmem:[#allocation3 + $0x378] sm:$0xff] }
  0xf4   :  { %v709_v34 = vld [vmem:[#allocation6 + $0x378] sm:$0xff] }
  0xf5   :  { %v2218_v55 = vadd.f32 %v2217_v50, %v1706_v44  ;;  %v1209_v44 = vsub.f32 %v185_v37, %v697_v38  ;;  %v1720_v50 = vmul.f32 %v1208_v39, %v1208_v39  ;;  %v198_v38 = vld [vmem:[#allocation3 + $0x380] sm:$0xff] }
  0xf6   :  { %v710_v39 = vld [vmem:[#allocation6 + $0x380] sm:$0xff] }
  0xf7   :  { %v2219_v60 = vadd.f32 %v2218_v55, %v1707_v49  ;;  %v1210_v49 = vsub.f32 %v186_v42, %v698_v43  ;;  %v1721_v55 = vmul.f32 %v1209_v44, %v1209_v44  ;;  %v199_v43 = vld [vmem:[#allocation3 + $0x388] sm:$0xff] }
  0xf8   :  { %v711_v44 = vld [vmem:[#allocation6 + $0x388] sm:$0xff] }
  0xf9   :  { %v2220_v1 = vadd.f32 %v2219_v60, %v1708_v54  ;;  %v1211_v54 = vsub.f32 %v187_v47, %v699_v48  ;;  %v1722_v60 = vmul.f32 %v1210_v49, %v1210_v49  ;;  %v200_v48 = vld [vmem:[#allocation3 + $0x390] sm:$0xff] }
  0xfa   :  { %v712_v49 = vld [vmem:[#allocation6 + $0x390] sm:$0xff] }
  0xfb   :  { %v2221_v6 = vadd.f32 %v2220_v1, %v1709_v59  ;;  %v1212_v59 = vsub.f32 %v188_v52, %v700_v53  ;;  %v1723_v1 = vmul.f32 %v1211_v54, %v1211_v54  ;;  %v201_v53 = vld [vmem:[#allocation3 + $0x398] sm:$0xff] }
  0xfc   :  { %v713_v54 = vld [vmem:[#allocation6 + $0x398] sm:$0xff] }
  0xfd   :  { %v2222_v11 = vadd.f32 %v2221_v6, %v1710_v0  ;;  %v1213_v0 = vsub.f32 %v189_v57, %v701_v58  ;;  %v1724_v6 = vmul.f32 %v1212_v59, %v1212_v59  ;;  %v202_v58 = vld [vmem:[#allocation3 + $0x3a0] sm:$0xff] }
  0xfe   :  { %v714_v59 = vld [vmem:[#allocation6 + $0x3a0] sm:$0xff] }
  0xff   :  { %v2223_v16 = vadd.f32 %v2222_v11, %v1711_v5  ;;  %v1214_v5 = vsub.f32 %v190_v62, %v702_v63  ;;  %v1725_v11 = vmul.f32 %v1213_v0, %v1213_v0  ;;  %v203_v63 = vld [vmem:[#allocation3 + $0x3a8] sm:$0xff] }
 0x100   :  { %v715_v0 = vld [vmem:[#allocation6 + $0x3a8] sm:$0xff] }
 0x101   :  { %v2224_v21 = vadd.f32 %v2223_v16, %v1712_v10  ;;  %v1215_v10 = vsub.f32 %v191_v3, %v703_v4  ;;  %v1726_v16 = vmul.f32 %v1214_v5, %v1214_v5  ;;  %v204_v4 = vld [vmem:[#allocation3 + $0x3b0] sm:$0xff] }
 0x102   :  { %v716_v5 = vld [vmem:[#allocation6 + $0x3b0] sm:$0xff] }
 0x103   :  { %v2225_v26 = vadd.f32 %v2224_v21, %v1713_v15  ;;  %v1216_v15 = vsub.f32 %v192_v8, %v704_v9  ;;  %v1727_v21 = vmul.f32 %v1215_v10, %v1215_v10  ;;  %v205_v9 = vld [vmem:[#allocation3 + $0x3b8] sm:$0xff] }
 0x104   :  { %v717_v10 = vld [vmem:[#allocation6 + $0x3b8] sm:$0xff] }
 0x105   :  { %v2226_v31 = vadd.f32 %v2225_v26, %v1714_v20  ;;  %v1217_v20 = vsub.f32 %v193_v13, %v705_v14  ;;  %v1728_v26 = vmul.f32 %v1216_v15, %v1216_v15  ;;  %v206_v14 = vld [vmem:[#allocation3 + $0x3c0] sm:$0xff] }
 0x106   :  { %v718_v15 = vld [vmem:[#allocation6 + $0x3c0] sm:$0xff] }
 0x107   :  { %v2227_v36 = vadd.f32 %v2226_v31, %v1715_v25  ;;  %v1218_v25 = vsub.f32 %v194_v18, %v706_v19  ;;  %v1729_v31 = vmul.f32 %v1217_v20, %v1217_v20  ;;  %v207_v19 = vld [vmem:[#allocation3 + $0x3c8] sm:$0xff] }
 0x108   :  { %v719_v20 = vld [vmem:[#allocation6 + $0x3c8] sm:$0xff] }
 0x109   :  { %v2228_v41 = vadd.f32 %v2227_v36, %v1716_v30  ;;  %v1219_v30 = vsub.f32 %v195_v23, %v707_v24  ;;  %v1730_v36 = vmul.f32 %v1218_v25, %v1218_v25  ;;  %v208_v24 = vld [vmem:[#allocation3 + $0x3d0] sm:$0xff] }
 0x10a   :  { %v720_v25 = vld [vmem:[#allocation6 + $0x3d0] sm:$0xff] }
 0x10b   :  { %v2229_v46 = vadd.f32 %v2228_v41, %v1717_v35  ;;  %v1220_v35 = vsub.f32 %v196_v28, %v708_v29  ;;  %v1731_v41 = vmul.f32 %v1219_v30, %v1219_v30  ;;  %v209_v29 = vld [vmem:[#allocation3 + $0x3d8] sm:$0xff] }
 0x10c   :  { %v721_v30 = vld [vmem:[#allocation6 + $0x3d8] sm:$0xff] }
 0x10d   :  { %v2230_v51 = vadd.f32 %v2229_v46, %v1718_v40  ;;  %v1221_v40 = vsub.f32 %v197_v33, %v709_v34  ;;  %v1732_v46 = vmul.f32 %v1220_v35, %v1220_v35  ;;  %v210_v34 = vld [vmem:[#allocation3 + $0x3e0] sm:$0xff] }
 0x10e   :  { %v722_v35 = vld [vmem:[#allocation6 + $0x3e0] sm:$0xff] }
 0x10f   :  { %v2231_v56 = vadd.f32 %v2230_v51, %v1719_v45  ;;  %v1222_v45 = vsub.f32 %v198_v38, %v710_v39  ;;  %v1733_v51 = vmul.f32 %v1221_v40, %v1221_v40  ;;  %v211_v39 = vld [vmem:[#allocation3 + $0x3e8] sm:$0xff] }
 0x110   :  { %v723_v40 = vld [vmem:[#allocation6 + $0x3e8] sm:$0xff] }
 0x111   :  { %v2232_v61 = vadd.f32 %v2231_v56, %v1720_v50  ;;  %v1223_v50 = vsub.f32 %v199_v43, %v711_v44  ;;  %v1734_v56 = vmul.f32 %v1222_v45, %v1222_v45  ;;  %v212_v44 = vld [vmem:[#allocation3 + $0x3f0] sm:$0xff] }
 0x112   :  { %v724_v45 = vld [vmem:[#allocation6 + $0x3f0] sm:$0xff] }
 0x113   :  { %v2233_v2 = vadd.f32 %v2232_v61, %v1721_v55  ;;  %v1224_v55 = vsub.f32 %v200_v48, %v712_v49  ;;  %v1735_v61 = vmul.f32 %v1223_v50, %v1223_v50  ;;  %v213_v49 = vld [vmem:[#allocation3 + $0x3f8] sm:$0xff] }
 0x114   :  { %v725_v50 = vld [vmem:[#allocation6 + $0x3f8] sm:$0xff] }
 0x115   :  { %v2234_v7 = vadd.f32 %v2233_v2, %v1722_v60  ;;  %v1225_v60 = vsub.f32 %v201_v53, %v713_v54  ;;  %v1736_v2 = vmul.f32 %v1224_v55, %v1224_v55  ;;  %v214_v54 = vld [vmem:[#allocation3 + $0x400] sm:$0xff] }
 0x116   :  { %v726_v55 = vld [vmem:[#allocation6 + $0x400] sm:$0xff] }
 0x117   :  { %v2235_v12 = vadd.f32 %v2234_v7, %v1723_v1  ;;  %v1226_v1 = vsub.f32 %v202_v58, %v714_v59  ;;  %v1737_v7 = vmul.f32 %v1225_v60, %v1225_v60  ;;  %v215_v59 = vld [vmem:[#allocation3 + $0x408] sm:$0xff] }
 0x118   :  { %v727_v60 = vld [vmem:[#allocation6 + $0x408] sm:$0xff] }
 0x119   :  { %v2236_v17 = vadd.f32 %v2235_v12, %v1724_v6  ;;  %v1227_v6 = vsub.f32 %v203_v63, %v715_v0  ;;  %v1738_v12 = vmul.f32 %v1226_v1, %v1226_v1  ;;  %v216_v0 = vld [vmem:[#allocation3 + $0x410] sm:$0xff] }
 0x11a   :  { %v728_v1 = vld [vmem:[#allocation6 + $0x410] sm:$0xff] }
 0x11b   :  { %v2237_v22 = vadd.f32 %v2236_v17, %v1725_v11  ;;  %v1228_v11 = vsub.f32 %v204_v4, %v716_v5  ;;  %v1739_v17 = vmul.f32 %v1227_v6, %v1227_v6  ;;  %v217_v5 = vld [vmem:[#allocation3 + $0x418] sm:$0xff] }
 0x11c   :  { %v729_v6 = vld [vmem:[#allocation6 + $0x418] sm:$0xff] }
 0x11d   :  { %v2238_v27 = vadd.f32 %v2237_v22, %v1726_v16  ;;  %v1229_v16 = vsub.f32 %v205_v9, %v717_v10  ;;  %v1740_v22 = vmul.f32 %v1228_v11, %v1228_v11  ;;  %v218_v10 = vld [vmem:[#allocation3 + $0x420] sm:$0xff] }
 0x11e   :  { %v730_v11 = vld [vmem:[#allocation6 + $0x420] sm:$0xff] }
 0x11f   :  { %v2239_v32 = vadd.f32 %v2238_v27, %v1727_v21  ;;  %v1230_v21 = vsub.f32 %v206_v14, %v718_v15  ;;  %v1741_v27 = vmul.f32 %v1229_v16, %v1229_v16  ;;  %v219_v15 = vld [vmem:[#allocation3 + $0x428] sm:$0xff] }
 0x120   :  { %v731_v16 = vld [vmem:[#allocation6 + $0x428] sm:$0xff] }
 0x121   :  { %v2240_v37 = vadd.f32 %v2239_v32, %v1728_v26  ;;  %v1231_v26 = vsub.f32 %v207_v19, %v719_v20  ;;  %v1742_v32 = vmul.f32 %v1230_v21, %v1230_v21  ;;  %v220_v20 = vld [vmem:[#allocation3 + $0x430] sm:$0xff] }
 0x122   :  { %v732_v21 = vld [vmem:[#allocation6 + $0x430] sm:$0xff] }
 0x123   :  { %v2241_v42 = vadd.f32 %v2240_v37, %v1729_v31  ;;  %v1232_v31 = vsub.f32 %v208_v24, %v720_v25  ;;  %v1743_v37 = vmul.f32 %v1231_v26, %v1231_v26  ;;  %v221_v25 = vld [vmem:[#allocation3 + $0x438] sm:$0xff] }
 0x124   :  { %v733_v26 = vld [vmem:[#allocation6 + $0x438] sm:$0xff] }
 0x125   :  { %v2242_v47 = vadd.f32 %v2241_v42, %v1730_v36  ;;  %v1233_v36 = vsub.f32 %v209_v29, %v721_v30  ;;  %v1744_v42 = vmul.f32 %v1232_v31, %v1232_v31  ;;  %v222_v30 = vld [vmem:[#allocation3 + $0x440] sm:$0xff] }
 0x126   :  { %v734_v31 = vld [vmem:[#allocation6 + $0x440] sm:$0xff] }
 0x127   :  { %v2243_v52 = vadd.f32 %v2242_v47, %v1731_v41  ;;  %v1234_v41 = vsub.f32 %v210_v34, %v722_v35  ;;  %v1745_v47 = vmul.f32 %v1233_v36, %v1233_v36  ;;  %v223_v35 = vld [vmem:[#allocation3 + $0x448] sm:$0xff] }
 0x128   :  { %v735_v36 = vld [vmem:[#allocation6 + $0x448] sm:$0xff] }
 0x129   :  { %v2244_v57 = vadd.f32 %v2243_v52, %v1732_v46  ;;  %v1235_v46 = vsub.f32 %v211_v39, %v723_v40  ;;  %v1746_v52 = vmul.f32 %v1234_v41, %v1234_v41  ;;  %v224_v40 = vld [vmem:[#allocation3 + $0x450] sm:$0xff] }
 0x12a   :  { %v736_v41 = vld [vmem:[#allocation6 + $0x450] sm:$0xff] }
 0x12b   :  { %v2245_v62 = vadd.f32 %v2244_v57, %v1733_v51  ;;  %v1236_v51 = vsub.f32 %v212_v44, %v724_v45  ;;  %v1747_v57 = vmul.f32 %v1235_v46, %v1235_v46  ;;  %v225_v45 = vld [vmem:[#allocation3 + $0x458] sm:$0xff] }
 0x12c   :  { %v737_v46 = vld [vmem:[#allocation6 + $0x458] sm:$0xff] }
 0x12d   :  { %v2246_v3 = vadd.f32 %v2245_v62, %v1734_v56  ;;  %v1237_v56 = vsub.f32 %v213_v49, %v725_v50  ;;  %v1748_v62 = vmul.f32 %v1236_v51, %v1236_v51  ;;  %v226_v50 = vld [vmem:[#allocation3 + $0x460] sm:$0xff] }
 0x12e   :  { %v738_v51 = vld [vmem:[#allocation6 + $0x460] sm:$0xff] }
 0x12f   :  { %v2247_v8 = vadd.f32 %v2246_v3, %v1735_v61  ;;  %v1238_v61 = vsub.f32 %v214_v54, %v726_v55  ;;  %v1749_v3 = vmul.f32 %v1237_v56, %v1237_v56  ;;  %v227_v55 = vld [vmem:[#allocation3 + $0x468] sm:$0xff] }
 0x130   :  { %v739_v56 = vld [vmem:[#allocation6 + $0x468] sm:$0xff] }
 0x131   :  { %v2248_v13 = vadd.f32 %v2247_v8, %v1736_v2  ;;  %v1239_v2 = vsub.f32 %v215_v59, %v727_v60  ;;  %v1750_v8 = vmul.f32 %v1238_v61, %v1238_v61  ;;  %v228_v60 = vld [vmem:[#allocation3 + $0x470] sm:$0xff] }
 0x132   :  { %v740_v61 = vld [vmem:[#allocation6 + $0x470] sm:$0xff] }
 0x133   :  { %v2249_v18 = vadd.f32 %v2248_v13, %v1737_v7  ;;  %v1240_v7 = vsub.f32 %v216_v0, %v728_v1  ;;  %v1751_v13 = vmul.f32 %v1239_v2, %v1239_v2  ;;  %v229_v1 = vld [vmem:[#allocation3 + $0x478] sm:$0xff] }
 0x134   :  { %v741_v2 = vld [vmem:[#allocation6 + $0x478] sm:$0xff] }
 0x135   :  { %v2250_v23 = vadd.f32 %v2249_v18, %v1738_v12  ;;  %v1241_v12 = vsub.f32 %v217_v5, %v729_v6  ;;  %v1752_v18 = vmul.f32 %v1240_v7, %v1240_v7  ;;  %v230_v6 = vld [vmem:[#allocation3 + $0x480] sm:$0xff] }
 0x136   :  { %v742_v7 = vld [vmem:[#allocation6 + $0x480] sm:$0xff] }
 0x137   :  { %v2251_v28 = vadd.f32 %v2250_v23, %v1739_v17  ;;  %v1242_v17 = vsub.f32 %v218_v10, %v730_v11  ;;  %v1753_v23 = vmul.f32 %v1241_v12, %v1241_v12  ;;  %v231_v11 = vld [vmem:[#allocation3 + $0x488] sm:$0xff] }
 0x138   :  { %v743_v12 = vld [vmem:[#allocation6 + $0x488] sm:$0xff] }
 0x139   :  { %v2252_v33 = vadd.f32 %v2251_v28, %v1740_v22  ;;  %v1243_v22 = vsub.f32 %v219_v15, %v731_v16  ;;  %v1754_v28 = vmul.f32 %v1242_v17, %v1242_v17  ;;  %v232_v16 = vld [vmem:[#allocation3 + $0x490] sm:$0xff] }
 0x13a   :  { %v744_v17 = vld [vmem:[#allocation6 + $0x490] sm:$0xff] }
 0x13b   :  { %v2253_v38 = vadd.f32 %v2252_v33, %v1741_v27  ;;  %v1244_v27 = vsub.f32 %v220_v20, %v732_v21  ;;  %v1755_v33 = vmul.f32 %v1243_v22, %v1243_v22  ;;  %v233_v21 = vld [vmem:[#allocation3 + $0x498] sm:$0xff] }
 0x13c   :  { %v745_v22 = vld [vmem:[#allocation6 + $0x498] sm:$0xff] }
 0x13d   :  { %v2254_v43 = vadd.f32 %v2253_v38, %v1742_v32  ;;  %v1245_v32 = vsub.f32 %v221_v25, %v733_v26  ;;  %v1756_v38 = vmul.f32 %v1244_v27, %v1244_v27  ;;  %v234_v26 = vld [vmem:[#allocation3 + $0x4a0] sm:$0xff] }
 0x13e   :  { %v746_v27 = vld [vmem:[#allocation6 + $0x4a0] sm:$0xff] }
 0x13f   :  { %v2255_v48 = vadd.f32 %v2254_v43, %v1743_v37  ;;  %v1246_v37 = vsub.f32 %v222_v30, %v734_v31  ;;  %v1757_v43 = vmul.f32 %v1245_v32, %v1245_v32  ;;  %v235_v31 = vld [vmem:[#allocation3 + $0x4a8] sm:$0xff] }
 0x140   :  { %v747_v32 = vld [vmem:[#allocation6 + $0x4a8] sm:$0xff] }
 0x141   :  { %v2256_v53 = vadd.f32 %v2255_v48, %v1744_v42  ;;  %v1247_v42 = vsub.f32 %v223_v35, %v735_v36  ;;  %v1758_v48 = vmul.f32 %v1246_v37, %v1246_v37  ;;  %v236_v36 = vld [vmem:[#allocation3 + $0x4b0] sm:$0xff] }
 0x142   :  { %v748_v37 = vld [vmem:[#allocation6 + $0x4b0] sm:$0xff] }
 0x143   :  { %v2257_v58 = vadd.f32 %v2256_v53, %v1745_v47  ;;  %v1248_v47 = vsub.f32 %v224_v40, %v736_v41  ;;  %v1759_v53 = vmul.f32 %v1247_v42, %v1247_v42  ;;  %v237_v41 = vld [vmem:[#allocation3 + $0x4b8] sm:$0xff] }
 0x144   :  { %v749_v42 = vld [vmem:[#allocation6 + $0x4b8] sm:$0xff] }
 0x145   :  { %v2258_v63 = vadd.f32 %v2257_v58, %v1746_v52  ;;  %v1249_v52 = vsub.f32 %v225_v45, %v737_v46  ;;  %v1760_v58 = vmul.f32 %v1248_v47, %v1248_v47  ;;  %v238_v46 = vld [vmem:[#allocation3 + $0x4c0] sm:$0xff] }
 0x146   :  { %v750_v47 = vld [vmem:[#allocation6 + $0x4c0] sm:$0xff] }
 0x147   :  { %v2259_v4 = vadd.f32 %v2258_v63, %v1747_v57  ;;  %v1250_v57 = vsub.f32 %v226_v50, %v738_v51  ;;  %v1761_v63 = vmul.f32 %v1249_v52, %v1249_v52  ;;  %v239_v51 = vld [vmem:[#allocation3 + $0x4c8] sm:$0xff] }
 0x148   :  { %v751_v52 = vld [vmem:[#allocation6 + $0x4c8] sm:$0xff] }
 0x149   :  { %v2260_v9 = vadd.f32 %v2259_v4, %v1748_v62  ;;  %v1251_v62 = vsub.f32 %v227_v55, %v739_v56  ;;  %v1762_v4 = vmul.f32 %v1250_v57, %v1250_v57  ;;  %v240_v56 = vld [vmem:[#allocation3 + $0x4d0] sm:$0xff] }
 0x14a   :  { %v752_v57 = vld [vmem:[#allocation6 + $0x4d0] sm:$0xff] }
 0x14b   :  { %v2261_v14 = vadd.f32 %v2260_v9, %v1749_v3  ;;  %v1252_v3 = vsub.f32 %v228_v60, %v740_v61  ;;  %v1763_v9 = vmul.f32 %v1251_v62, %v1251_v62  ;;  %v241_v61 = vld [vmem:[#allocation3 + $0x4d8] sm:$0xff] }
 0x14c   :  { %v753_v62 = vld [vmem:[#allocation6 + $0x4d8] sm:$0xff] }
 0x14d   :  { %v2262_v19 = vadd.f32 %v2261_v14, %v1750_v8  ;;  %v1253_v8 = vsub.f32 %v229_v1, %v741_v2  ;;  %v1764_v14 = vmul.f32 %v1252_v3, %v1252_v3  ;;  %v242_v2 = vld [vmem:[#allocation3 + $0x4e0] sm:$0xff] }
 0x14e   :  { %v754_v3 = vld [vmem:[#allocation6 + $0x4e0] sm:$0xff] }
 0x14f   :  { %v2263_v24 = vadd.f32 %v2262_v19, %v1751_v13  ;;  %v1254_v13 = vsub.f32 %v230_v6, %v742_v7  ;;  %v1765_v19 = vmul.f32 %v1253_v8, %v1253_v8  ;;  %v243_v7 = vld [vmem:[#allocation3 + $0x4e8] sm:$0xff] }
 0x150   :  { %v755_v8 = vld [vmem:[#allocation6 + $0x4e8] sm:$0xff] }
 0x151   :  { %v2264_v29 = vadd.f32 %v2263_v24, %v1752_v18  ;;  %v1255_v18 = vsub.f32 %v231_v11, %v743_v12  ;;  %v1766_v24 = vmul.f32 %v1254_v13, %v1254_v13  ;;  %v244_v12 = vld [vmem:[#allocation3 + $0x4f0] sm:$0xff] }
 0x152   :  { %v756_v13 = vld [vmem:[#allocation6 + $0x4f0] sm:$0xff] }
 0x153   :  { %v2265_v34 = vadd.f32 %v2264_v29, %v1753_v23  ;;  %v1256_v23 = vsub.f32 %v232_v16, %v744_v17  ;;  %v1767_v29 = vmul.f32 %v1255_v18, %v1255_v18  ;;  %v245_v17 = vld [vmem:[#allocation3 + $0x4f8] sm:$0xff] }
 0x154   :  { %v757_v18 = vld [vmem:[#allocation6 + $0x4f8] sm:$0xff] }
 0x155   :  { %v2266_v39 = vadd.f32 %v2265_v34, %v1754_v28  ;;  %v1257_v28 = vsub.f32 %v233_v21, %v745_v22  ;;  %v1768_v34 = vmul.f32 %v1256_v23, %v1256_v23  ;;  %v246_v22 = vld [vmem:[#allocation3 + $0x500] sm:$0xff] }
 0x156   :  { %v758_v23 = vld [vmem:[#allocation6 + $0x500] sm:$0xff] }
 0x157   :  { %v2267_v44 = vadd.f32 %v2266_v39, %v1755_v33  ;;  %v1258_v33 = vsub.f32 %v234_v26, %v746_v27  ;;  %v1769_v39 = vmul.f32 %v1257_v28, %v1257_v28  ;;  %v247_v27 = vld [vmem:[#allocation3 + $0x508] sm:$0xff] }
 0x158   :  { %v759_v28 = vld [vmem:[#allocation6 + $0x508] sm:$0xff] }
 0x159   :  { %v2268_v49 = vadd.f32 %v2267_v44, %v1756_v38  ;;  %v1259_v38 = vsub.f32 %v235_v31, %v747_v32  ;;  %v1770_v44 = vmul.f32 %v1258_v33, %v1258_v33  ;;  %v248_v32 = vld [vmem:[#allocation3 + $0x510] sm:$0xff] }
 0x15a   :  { %v760_v33 = vld [vmem:[#allocation6 + $0x510] sm:$0xff] }
 0x15b   :  { %v2269_v54 = vadd.f32 %v2268_v49, %v1757_v43  ;;  %v1260_v43 = vsub.f32 %v236_v36, %v748_v37  ;;  %v1771_v49 = vmul.f32 %v1259_v38, %v1259_v38  ;;  %v249_v37 = vld [vmem:[#allocation3 + $0x518] sm:$0xff] }
 0x15c   :  { %v761_v38 = vld [vmem:[#allocation6 + $0x518] sm:$0xff] }
 0x15d   :  { %v2270_v59 = vadd.f32 %v2269_v54, %v1758_v48  ;;  %v1261_v48 = vsub.f32 %v237_v41, %v749_v42  ;;  %v1772_v54 = vmul.f32 %v1260_v43, %v1260_v43  ;;  %v250_v42 = vld [vmem:[#allocation3 + $0x520] sm:$0xff] }
 0x15e   :  { %v762_v43 = vld [vmem:[#allocation6 + $0x520] sm:$0xff] }
 0x15f   :  { %v2271_v0 = vadd.f32 %v2270_v59, %v1759_v53  ;;  %v1262_v53 = vsub.f32 %v238_v46, %v750_v47  ;;  %v1773_v59 = vmul.f32 %v1261_v48, %v1261_v48  ;;  %v251_v47 = vld [vmem:[#allocation3 + $0x528] sm:$0xff] }
 0x160   :  { %v763_v48 = vld [vmem:[#allocation6 + $0x528] sm:$0xff] }
 0x161   :  { %v2272_v5 = vadd.f32 %v2271_v0, %v1760_v58  ;;  %v1263_v58 = vsub.f32 %v239_v51, %v751_v52  ;;  %v1774_v0 = vmul.f32 %v1262_v53, %v1262_v53  ;;  %v252_v52 = vld [vmem:[#allocation3 + $0x530] sm:$0xff] }
 0x162   :  { %v764_v53 = vld [vmem:[#allocation6 + $0x530] sm:$0xff] }
 0x163   :  { %v2273_v10 = vadd.f32 %v2272_v5, %v1761_v63  ;;  %v1264_v63 = vsub.f32 %v240_v56, %v752_v57  ;;  %v1775_v5 = vmul.f32 %v1263_v58, %v1263_v58  ;;  %v253_v57 = vld [vmem:[#allocation3 + $0x538] sm:$0xff] }
 0x164   :  { %v765_v58 = vld [vmem:[#allocation6 + $0x538] sm:$0xff] }
 0x165   :  { %v2274_v15 = vadd.f32 %v2273_v10, %v1762_v4  ;;  %v1265_v4 = vsub.f32 %v241_v61, %v753_v62  ;;  %v1776_v10 = vmul.f32 %v1264_v63, %v1264_v63  ;;  %v254_v62 = vld [vmem:[#allocation3 + $0x540] sm:$0xff] }
 0x166   :  { %v766_v63 = vld [vmem:[#allocation6 + $0x540] sm:$0xff] }
 0x167   :  { %v2275_v20 = vadd.f32 %v2274_v15, %v1763_v9  ;;  %v1266_v9 = vsub.f32 %v242_v2, %v754_v3  ;;  %v1777_v15 = vmul.f32 %v1265_v4, %v1265_v4  ;;  %v255_v3 = vld [vmem:[#allocation3 + $0x548] sm:$0xff] }
 0x168   :  { %v767_v4 = vld [vmem:[#allocation6 + $0x548] sm:$0xff] }
 0x169   :  { %v2276_v25 = vadd.f32 %v2275_v20, %v1764_v14  ;;  %v1267_v14 = vsub.f32 %v243_v7, %v755_v8  ;;  %v1778_v20 = vmul.f32 %v1266_v9, %v1266_v9  ;;  %v256_v8 = vld [vmem:[#allocation3 + $0x550] sm:$0xff] }
 0x16a   :  { %v768_v9 = vld [vmem:[#allocation6 + $0x550] sm:$0xff] }
 0x16b   :  { %v2277_v30 = vadd.f32 %v2276_v25, %v1765_v19  ;;  %v1268_v19 = vsub.f32 %v244_v12, %v756_v13  ;;  %v1779_v25 = vmul.f32 %v1267_v14, %v1267_v14  ;;  %v257_v13 = vld [vmem:[#allocation3 + $0x558] sm:$0xff] }
 0x16c   :  { %v769_v14 = vld [vmem:[#allocation6 + $0x558] sm:$0xff] }
 0x16d   :  { %v2278_v35 = vadd.f32 %v2277_v30, %v1766_v24  ;;  %v1269_v24 = vsub.f32 %v245_v17, %v757_v18  ;;  %v1780_v30 = vmul.f32 %v1268_v19, %v1268_v19  ;;  %v258_v18 = vld [vmem:[#allocation3 + $0x560] sm:$0xff] }
 0x16e   :  { %v770_v19 = vld [vmem:[#allocation6 + $0x560] sm:$0xff] }
 0x16f   :  { %v2279_v40 = vadd.f32 %v2278_v35, %v1767_v29  ;;  %v1270_v29 = vsub.f32 %v246_v22, %v758_v23  ;;  %v1781_v35 = vmul.f32 %v1269_v24, %v1269_v24  ;;  %v259_v23 = vld [vmem:[#allocation3 + $0x568] sm:$0xff] }
 0x170   :  { %v771_v24 = vld [vmem:[#allocation6 + $0x568] sm:$0xff] }
 0x171   :  { %v2280_v45 = vadd.f32 %v2279_v40, %v1768_v34  ;;  %v1271_v34 = vsub.f32 %v247_v27, %v759_v28  ;;  %v1782_v40 = vmul.f32 %v1270_v29, %v1270_v29  ;;  %v260_v28 = vld [vmem:[#allocation3 + $0x570] sm:$0xff] }
 0x172   :  { %v772_v29 = vld [vmem:[#allocation6 + $0x570] sm:$0xff] }
 0x173   :  { %v2281_v50 = vadd.f32 %v2280_v45, %v1769_v39  ;;  %v1272_v39 = vsub.f32 %v248_v32, %v760_v33  ;;  %v1783_v45 = vmul.f32 %v1271_v34, %v1271_v34  ;;  %v261_v33 = vld [vmem:[#allocation3 + $0x578] sm:$0xff] }
 0x174   :  { %v773_v34 = vld [vmem:[#allocation6 + $0x578] sm:$0xff] }
 0x175   :  { %v2282_v55 = vadd.f32 %v2281_v50, %v1770_v44  ;;  %v1273_v44 = vsub.f32 %v249_v37, %v761_v38  ;;  %v1784_v50 = vmul.f32 %v1272_v39, %v1272_v39  ;;  %v262_v38 = vld [vmem:[#allocation3 + $0x580] sm:$0xff] }
 0x176   :  { %v774_v39 = vld [vmem:[#allocation6 + $0x580] sm:$0xff] }
 0x177   :  { %v2283_v60 = vadd.f32 %v2282_v55, %v1771_v49  ;;  %v1274_v49 = vsub.f32 %v250_v42, %v762_v43  ;;  %v1785_v55 = vmul.f32 %v1273_v44, %v1273_v44  ;;  %v263_v43 = vld [vmem:[#allocation3 + $0x588] sm:$0xff] }
 0x178   :  { %v775_v44 = vld [vmem:[#allocation6 + $0x588] sm:$0xff] }
 0x179   :  { %v2284_v1 = vadd.f32 %v2283_v60, %v1772_v54  ;;  %v1275_v54 = vsub.f32 %v251_v47, %v763_v48  ;;  %v1786_v60 = vmul.f32 %v1274_v49, %v1274_v49  ;;  %v264_v48 = vld [vmem:[#allocation3 + $0x590] sm:$0xff] }
 0x17a   :  { %v776_v49 = vld [vmem:[#allocation6 + $0x590] sm:$0xff] }
 0x17b   :  { %v2285_v6 = vadd.f32 %v2284_v1, %v1773_v59  ;;  %v1276_v59 = vsub.f32 %v252_v52, %v764_v53  ;;  %v1787_v1 = vmul.f32 %v1275_v54, %v1275_v54  ;;  %v265_v53 = vld [vmem:[#allocation3 + $0x598] sm:$0xff] }
 0x17c   :  { %v777_v54 = vld [vmem:[#allocation6 + $0x598] sm:$0xff] }
 0x17d   :  { %v2286_v11 = vadd.f32 %v2285_v6, %v1774_v0  ;;  %v1277_v0 = vsub.f32 %v253_v57, %v765_v58  ;;  %v1788_v6 = vmul.f32 %v1276_v59, %v1276_v59  ;;  %v266_v58 = vld [vmem:[#allocation3 + $0x5a0] sm:$0xff] }
 0x17e   :  { %v778_v59 = vld [vmem:[#allocation6 + $0x5a0] sm:$0xff] }
 0x17f   :  { %v2287_v16 = vadd.f32 %v2286_v11, %v1775_v5  ;;  %v1278_v5 = vsub.f32 %v254_v62, %v766_v63  ;;  %v1789_v11 = vmul.f32 %v1277_v0, %v1277_v0  ;;  %v267_v63 = vld [vmem:[#allocation3 + $0x5a8] sm:$0xff] }
 0x180   :  { %v779_v0 = vld [vmem:[#allocation6 + $0x5a8] sm:$0xff] }
 0x181   :  { %v2288_v21 = vadd.f32 %v2287_v16, %v1776_v10  ;;  %v1279_v10 = vsub.f32 %v255_v3, %v767_v4  ;;  %v1790_v16 = vmul.f32 %v1278_v5, %v1278_v5  ;;  %v268_v4 = vld [vmem:[#allocation3 + $0x5b0] sm:$0xff] }
 0x182   :  { %v780_v5 = vld [vmem:[#allocation6 + $0x5b0] sm:$0xff] }
 0x183   :  { %v2289_v26 = vadd.f32 %v2288_v21, %v1777_v15  ;;  %v1280_v15 = vsub.f32 %v256_v8, %v768_v9  ;;  %v1791_v21 = vmul.f32 %v1279_v10, %v1279_v10  ;;  %v269_v9 = vld [vmem:[#allocation3 + $0x5b8] sm:$0xff] }
 0x184   :  { %v781_v10 = vld [vmem:[#allocation6 + $0x5b8] sm:$0xff] }
 0x185   :  { %v2290_v31 = vadd.f32 %v2289_v26, %v1778_v20  ;;  %v1281_v20 = vsub.f32 %v257_v13, %v769_v14  ;;  %v1792_v26 = vmul.f32 %v1280_v15, %v1280_v15  ;;  %v270_v14 = vld [vmem:[#allocation3 + $0x5c0] sm:$0xff] }
 0x186   :  { %v782_v15 = vld [vmem:[#allocation6 + $0x5c0] sm:$0xff] }
 0x187   :  { %v2291_v36 = vadd.f32 %v2290_v31, %v1779_v25  ;;  %v1282_v25 = vsub.f32 %v258_v18, %v770_v19  ;;  %v1793_v31 = vmul.f32 %v1281_v20, %v1281_v20  ;;  %v271_v19 = vld [vmem:[#allocation3 + $0x5c8] sm:$0xff] }
 0x188   :  { %v783_v20 = vld [vmem:[#allocation6 + $0x5c8] sm:$0xff] }
 0x189   :  { %v2292_v41 = vadd.f32 %v2291_v36, %v1780_v30  ;;  %v1283_v30 = vsub.f32 %v259_v23, %v771_v24  ;;  %v1794_v36 = vmul.f32 %v1282_v25, %v1282_v25  ;;  %v272_v24 = vld [vmem:[#allocation3 + $0x5d0] sm:$0xff] }
 0x18a   :  { %v784_v25 = vld [vmem:[#allocation6 + $0x5d0] sm:$0xff] }
 0x18b   :  { %v2293_v46 = vadd.f32 %v2292_v41, %v1781_v35  ;;  %v1284_v35 = vsub.f32 %v260_v28, %v772_v29  ;;  %v1795_v41 = vmul.f32 %v1283_v30, %v1283_v30  ;;  %v273_v29 = vld [vmem:[#allocation3 + $0x5d8] sm:$0xff] }
 0x18c   :  { %v785_v30 = vld [vmem:[#allocation6 + $0x5d8] sm:$0xff] }
 0x18d   :  { %v2294_v51 = vadd.f32 %v2293_v46, %v1782_v40  ;;  %v1285_v40 = vsub.f32 %v261_v33, %v773_v34  ;;  %v1796_v46 = vmul.f32 %v1284_v35, %v1284_v35  ;;  %v274_v34 = vld [vmem:[#allocation3 + $0x5e0] sm:$0xff] }
 0x18e   :  { %v786_v35 = vld [vmem:[#allocation6 + $0x5e0] sm:$0xff] }
 0x18f   :  { %v2295_v56 = vadd.f32 %v2294_v51, %v1783_v45  ;;  %v1286_v45 = vsub.f32 %v262_v38, %v774_v39  ;;  %v1797_v51 = vmul.f32 %v1285_v40, %v1285_v40  ;;  %v275_v39 = vld [vmem:[#allocation3 + $0x5e8] sm:$0xff] }
 0x190   :  { %v787_v40 = vld [vmem:[#allocation6 + $0x5e8] sm:$0xff] }
 0x191   :  { %v2296_v61 = vadd.f32 %v2295_v56, %v1784_v50  ;;  %v1287_v50 = vsub.f32 %v263_v43, %v775_v44  ;;  %v1798_v56 = vmul.f32 %v1286_v45, %v1286_v45  ;;  %v276_v44 = vld [vmem:[#allocation3 + $0x5f0] sm:$0xff] }
 0x192   :  { %v788_v45 = vld [vmem:[#allocation6 + $0x5f0] sm:$0xff] }
 0x193   :  { %v2297_v2 = vadd.f32 %v2296_v61, %v1785_v55  ;;  %v1288_v55 = vsub.f32 %v264_v48, %v776_v49  ;;  %v1799_v61 = vmul.f32 %v1287_v50, %v1287_v50  ;;  %v277_v49 = vld [vmem:[#allocation3 + $0x5f8] sm:$0xff] }
 0x194   :  { %v789_v50 = vld [vmem:[#allocation6 + $0x5f8] sm:$0xff] }
 0x195   :  { %v2298_v7 = vadd.f32 %v2297_v2, %v1786_v60  ;;  %v1289_v60 = vsub.f32 %v265_v53, %v777_v54  ;;  %v1800_v2 = vmul.f32 %v1288_v55, %v1288_v55  ;;  %v278_v54 = vld [vmem:[#allocation3 + $0x600] sm:$0xff] }
 0x196   :  { %v790_v55 = vld [vmem:[#allocation6 + $0x600] sm:$0xff] }
 0x197   :  { %v2299_v12 = vadd.f32 %v2298_v7, %v1787_v1  ;;  %v1290_v1 = vsub.f32 %v266_v58, %v778_v59  ;;  %v1801_v7 = vmul.f32 %v1289_v60, %v1289_v60  ;;  %v279_v59 = vld [vmem:[#allocation3 + $0x608] sm:$0xff] }
 0x198   :  { %v791_v60 = vld [vmem:[#allocation6 + $0x608] sm:$0xff] }
 0x199   :  { %v2300_v17 = vadd.f32 %v2299_v12, %v1788_v6  ;;  %v1291_v6 = vsub.f32 %v267_v63, %v779_v0  ;;  %v1802_v12 = vmul.f32 %v1290_v1, %v1290_v1  ;;  %v280_v0 = vld [vmem:[#allocation3 + $0x610] sm:$0xff] }
 0x19a   :  { %v792_v1 = vld [vmem:[#allocation6 + $0x610] sm:$0xff] }
 0x19b   :  { %v2301_v22 = vadd.f32 %v2300_v17, %v1789_v11  ;;  %v1292_v11 = vsub.f32 %v268_v4, %v780_v5  ;;  %v1803_v17 = vmul.f32 %v1291_v6, %v1291_v6  ;;  %v281_v5 = vld [vmem:[#allocation3 + $0x618] sm:$0xff] }
 0x19c   :  { %v793_v6 = vld [vmem:[#allocation6 + $0x618] sm:$0xff] }
 0x19d   :  { %v2302_v27 = vadd.f32 %v2301_v22, %v1790_v16  ;;  %v1293_v16 = vsub.f32 %v269_v9, %v781_v10  ;;  %v1804_v22 = vmul.f32 %v1292_v11, %v1292_v11  ;;  %v282_v10 = vld [vmem:[#allocation3 + $0x620] sm:$0xff] }
 0x19e   :  { %v794_v11 = vld [vmem:[#allocation6 + $0x620] sm:$0xff] }
 0x19f   :  { %v2303_v32 = vadd.f32 %v2302_v27, %v1791_v21  ;;  %v1294_v21 = vsub.f32 %v270_v14, %v782_v15  ;;  %v1805_v27 = vmul.f32 %v1293_v16, %v1293_v16  ;;  %v283_v15 = vld [vmem:[#allocation3 + $0x628] sm:$0xff] }
 0x1a0   :  { %v795_v16 = vld [vmem:[#allocation6 + $0x628] sm:$0xff] }
 0x1a1   :  { %v2304_v37 = vadd.f32 %v2303_v32, %v1792_v26  ;;  %v1295_v26 = vsub.f32 %v271_v19, %v783_v20  ;;  %v1806_v32 = vmul.f32 %v1294_v21, %v1294_v21  ;;  %v284_v20 = vld [vmem:[#allocation3 + $0x630] sm:$0xff] }
 0x1a2   :  { %v796_v21 = vld [vmem:[#allocation6 + $0x630] sm:$0xff] }
 0x1a3   :  { %v2305_v42 = vadd.f32 %v2304_v37, %v1793_v31  ;;  %v1296_v31 = vsub.f32 %v272_v24, %v784_v25  ;;  %v1807_v37 = vmul.f32 %v1295_v26, %v1295_v26  ;;  %v285_v25 = vld [vmem:[#allocation3 + $0x638] sm:$0xff] }
 0x1a4   :  { %v797_v26 = vld [vmem:[#allocation6 + $0x638] sm:$0xff] }
 0x1a5   :  { %v2306_v47 = vadd.f32 %v2305_v42, %v1794_v36  ;;  %v1297_v36 = vsub.f32 %v273_v29, %v785_v30  ;;  %v1808_v42 = vmul.f32 %v1296_v31, %v1296_v31  ;;  %v286_v30 = vld [vmem:[#allocation3 + $0x640] sm:$0xff] }
 0x1a6   :  { %v798_v31 = vld [vmem:[#allocation6 + $0x640] sm:$0xff] }
 0x1a7   :  { %v2307_v52 = vadd.f32 %v2306_v47, %v1795_v41  ;;  %v1298_v41 = vsub.f32 %v274_v34, %v786_v35  ;;  %v1809_v47 = vmul.f32 %v1297_v36, %v1297_v36  ;;  %v287_v35 = vld [vmem:[#allocation3 + $0x648] sm:$0xff] }
 0x1a8   :  { %v799_v36 = vld [vmem:[#allocation6 + $0x648] sm:$0xff] }
 0x1a9   :  { %v2308_v57 = vadd.f32 %v2307_v52, %v1796_v46  ;;  %v1299_v46 = vsub.f32 %v275_v39, %v787_v40  ;;  %v1810_v52 = vmul.f32 %v1298_v41, %v1298_v41  ;;  %v288_v40 = vld [vmem:[#allocation3 + $0x650] sm:$0xff] }
 0x1aa   :  { %v800_v41 = vld [vmem:[#allocation6 + $0x650] sm:$0xff] }
 0x1ab   :  { %v2309_v62 = vadd.f32 %v2308_v57, %v1797_v51  ;;  %v1300_v51 = vsub.f32 %v276_v44, %v788_v45  ;;  %v1811_v57 = vmul.f32 %v1299_v46, %v1299_v46  ;;  %v289_v45 = vld [vmem:[#allocation3 + $0x658] sm:$0xff] }
 0x1ac   :  { %v801_v46 = vld [vmem:[#allocation6 + $0x658] sm:$0xff] }
 0x1ad   :  { %v2310_v3 = vadd.f32 %v2309_v62, %v1798_v56  ;;  %v1301_v56 = vsub.f32 %v277_v49, %v789_v50  ;;  %v1812_v62 = vmul.f32 %v1300_v51, %v1300_v51  ;;  %v290_v50 = vld [vmem:[#allocation3 + $0x660] sm:$0xff] }
 0x1ae   :  { %v802_v51 = vld [vmem:[#allocation6 + $0x660] sm:$0xff] }
 0x1af   :  { %v2311_v8 = vadd.f32 %v2310_v3, %v1799_v61  ;;  %v1302_v61 = vsub.f32 %v278_v54, %v790_v55  ;;  %v1813_v3 = vmul.f32 %v1301_v56, %v1301_v56  ;;  %v291_v55 = vld [vmem:[#allocation3 + $0x668] sm:$0xff] }
 0x1b0   :  { %v803_v56 = vld [vmem:[#allocation6 + $0x668] sm:$0xff] }
 0x1b1   :  { %v2312_v13 = vadd.f32 %v2311_v8, %v1800_v2  ;;  %v1303_v2 = vsub.f32 %v279_v59, %v791_v60  ;;  %v1814_v8 = vmul.f32 %v1302_v61, %v1302_v61  ;;  %v292_v60 = vld [vmem:[#allocation3 + $0x670] sm:$0xff] }
 0x1b2   :  { %v804_v61 = vld [vmem:[#allocation6 + $0x670] sm:$0xff] }
 0x1b3   :  { %v2313_v18 = vadd.f32 %v2312_v13, %v1801_v7  ;;  %v1304_v7 = vsub.f32 %v280_v0, %v792_v1  ;;  %v1815_v13 = vmul.f32 %v1303_v2, %v1303_v2  ;;  %v293_v1 = vld [vmem:[#allocation3 + $0x678] sm:$0xff] }
 0x1b4   :  { %v805_v2 = vld [vmem:[#allocation6 + $0x678] sm:$0xff] }
 0x1b5   :  { %v2314_v23 = vadd.f32 %v2313_v18, %v1802_v12  ;;  %v1305_v12 = vsub.f32 %v281_v5, %v793_v6  ;;  %v1816_v18 = vmul.f32 %v1304_v7, %v1304_v7  ;;  %v294_v6 = vld [vmem:[#allocation3 + $0x680] sm:$0xff] }
 0x1b6   :  { %v806_v7 = vld [vmem:[#allocation6 + $0x680] sm:$0xff] }
 0x1b7   :  { %v2315_v28 = vadd.f32 %v2314_v23, %v1803_v17  ;;  %v1306_v17 = vsub.f32 %v282_v10, %v794_v11  ;;  %v1817_v23 = vmul.f32 %v1305_v12, %v1305_v12  ;;  %v295_v11 = vld [vmem:[#allocation3 + $0x688] sm:$0xff] }
 0x1b8   :  { %v807_v12 = vld [vmem:[#allocation6 + $0x688] sm:$0xff] }
 0x1b9   :  { %v2316_v33 = vadd.f32 %v2315_v28, %v1804_v22  ;;  %v1307_v22 = vsub.f32 %v283_v15, %v795_v16  ;;  %v1818_v28 = vmul.f32 %v1306_v17, %v1306_v17  ;;  %v296_v16 = vld [vmem:[#allocation3 + $0x690] sm:$0xff] }
 0x1ba   :  { %v808_v17 = vld [vmem:[#allocation6 + $0x690] sm:$0xff] }
 0x1bb   :  { %v2317_v38 = vadd.f32 %v2316_v33, %v1805_v27  ;;  %v1308_v27 = vsub.f32 %v284_v20, %v796_v21  ;;  %v1819_v33 = vmul.f32 %v1307_v22, %v1307_v22  ;;  %v297_v21 = vld [vmem:[#allocation3 + $0x698] sm:$0xff] }
 0x1bc   :  { %v809_v22 = vld [vmem:[#allocation6 + $0x698] sm:$0xff] }
 0x1bd   :  { %v2318_v43 = vadd.f32 %v2317_v38, %v1806_v32  ;;  %v1309_v32 = vsub.f32 %v285_v25, %v797_v26  ;;  %v1820_v38 = vmul.f32 %v1308_v27, %v1308_v27  ;;  %v298_v26 = vld [vmem:[#allocation3 + $0x6a0] sm:$0xff] }
 0x1be   :  { %v810_v27 = vld [vmem:[#allocation6 + $0x6a0] sm:$0xff] }
 0x1bf   :  { %v2319_v48 = vadd.f32 %v2318_v43, %v1807_v37  ;;  %v1310_v37 = vsub.f32 %v286_v30, %v798_v31  ;;  %v1821_v43 = vmul.f32 %v1309_v32, %v1309_v32  ;;  %v299_v31 = vld [vmem:[#allocation3 + $0x6a8] sm:$0xff] }
 0x1c0   :  { %v811_v32 = vld [vmem:[#allocation6 + $0x6a8] sm:$0xff] }
 0x1c1   :  { %v2320_v53 = vadd.f32 %v2319_v48, %v1808_v42  ;;  %v1311_v42 = vsub.f32 %v287_v35, %v799_v36  ;;  %v1822_v48 = vmul.f32 %v1310_v37, %v1310_v37  ;;  %v300_v36 = vld [vmem:[#allocation3 + $0x6b0] sm:$0xff] }
 0x1c2   :  { %v812_v37 = vld [vmem:[#allocation6 + $0x6b0] sm:$0xff] }
 0x1c3   :  { %v2321_v58 = vadd.f32 %v2320_v53, %v1809_v47  ;;  %v1312_v47 = vsub.f32 %v288_v40, %v800_v41  ;;  %v1823_v53 = vmul.f32 %v1311_v42, %v1311_v42  ;;  %v301_v41 = vld [vmem:[#allocation3 + $0x6b8] sm:$0xff] }
 0x1c4   :  { %v813_v42 = vld [vmem:[#allocation6 + $0x6b8] sm:$0xff] }
 0x1c5   :  { %v2322_v63 = vadd.f32 %v2321_v58, %v1810_v52  ;;  %v1313_v52 = vsub.f32 %v289_v45, %v801_v46  ;;  %v1824_v58 = vmul.f32 %v1312_v47, %v1312_v47  ;;  %v302_v46 = vld [vmem:[#allocation3 + $0x6c0] sm:$0xff] }
 0x1c6   :  { %v814_v47 = vld [vmem:[#allocation6 + $0x6c0] sm:$0xff] }
 0x1c7   :  { %v2323_v4 = vadd.f32 %v2322_v63, %v1811_v57  ;;  %v1314_v57 = vsub.f32 %v290_v50, %v802_v51  ;;  %v1825_v63 = vmul.f32 %v1313_v52, %v1313_v52  ;;  %v303_v51 = vld [vmem:[#allocation3 + $0x6c8] sm:$0xff] }
 0x1c8   :  { %v815_v52 = vld [vmem:[#allocation6 + $0x6c8] sm:$0xff] }
 0x1c9   :  { %v2324_v9 = vadd.f32 %v2323_v4, %v1812_v62  ;;  %v1315_v62 = vsub.f32 %v291_v55, %v803_v56  ;;  %v1826_v4 = vmul.f32 %v1314_v57, %v1314_v57  ;;  %v304_v56 = vld [vmem:[#allocation3 + $0x6d0] sm:$0xff] }
 0x1ca   :  { %v816_v57 = vld [vmem:[#allocation6 + $0x6d0] sm:$0xff] }
 0x1cb   :  { %v2325_v14 = vadd.f32 %v2324_v9, %v1813_v3  ;;  %v1316_v3 = vsub.f32 %v292_v60, %v804_v61  ;;  %v1827_v9 = vmul.f32 %v1315_v62, %v1315_v62  ;;  %v305_v61 = vld [vmem:[#allocation3 + $0x6d8] sm:$0xff] }
 0x1cc   :  { %v817_v62 = vld [vmem:[#allocation6 + $0x6d8] sm:$0xff] }
 0x1cd   :  { %v2326_v19 = vadd.f32 %v2325_v14, %v1814_v8  ;;  %v1317_v8 = vsub.f32 %v293_v1, %v805_v2  ;;  %v1828_v14 = vmul.f32 %v1316_v3, %v1316_v3  ;;  %v306_v2 = vld [vmem:[#allocation3 + $0x6e0] sm:$0xff] }
 0x1ce   :  { %v818_v3 = vld [vmem:[#allocation6 + $0x6e0] sm:$0xff] }
 0x1cf   :  { %v2327_v24 = vadd.f32 %v2326_v19, %v1815_v13  ;;  %v1318_v13 = vsub.f32 %v294_v6, %v806_v7  ;;  %v1829_v19 = vmul.f32 %v1317_v8, %v1317_v8  ;;  %v307_v7 = vld [vmem:[#allocation3 + $0x6e8] sm:$0xff] }
 0x1d0   :  { %v819_v8 = vld [vmem:[#allocation6 + $0x6e8] sm:$0xff] }
 0x1d1   :  { %v2328_v29 = vadd.f32 %v2327_v24, %v1816_v18  ;;  %v1319_v18 = vsub.f32 %v295_v11, %v807_v12  ;;  %v1830_v24 = vmul.f32 %v1318_v13, %v1318_v13  ;;  %v308_v12 = vld [vmem:[#allocation3 + $0x6f0] sm:$0xff] }
 0x1d2   :  { %v820_v13 = vld [vmem:[#allocation6 + $0x6f0] sm:$0xff] }
 0x1d3   :  { %v2329_v34 = vadd.f32 %v2328_v29, %v1817_v23  ;;  %v1320_v23 = vsub.f32 %v296_v16, %v808_v17  ;;  %v1831_v29 = vmul.f32 %v1319_v18, %v1319_v18  ;;  %v309_v17 = vld [vmem:[#allocation3 + $0x6f8] sm:$0xff] }
 0x1d4   :  { %v821_v18 = vld [vmem:[#allocation6 + $0x6f8] sm:$0xff] }
 0x1d5   :  { %v2330_v39 = vadd.f32 %v2329_v34, %v1818_v28  ;;  %v1321_v28 = vsub.f32 %v297_v21, %v809_v22  ;;  %v1832_v34 = vmul.f32 %v1320_v23, %v1320_v23  ;;  %v310_v22 = vld [vmem:[#allocation3 + $0x700] sm:$0xff] }
 0x1d6   :  { %v822_v23 = vld [vmem:[#allocation6 + $0x700] sm:$0xff] }
 0x1d7   :  { %v2331_v44 = vadd.f32 %v2330_v39, %v1819_v33  ;;  %v1322_v33 = vsub.f32 %v298_v26, %v810_v27  ;;  %v1833_v39 = vmul.f32 %v1321_v28, %v1321_v28  ;;  %v311_v27 = vld [vmem:[#allocation3 + $0x708] sm:$0xff] }
 0x1d8   :  { %v823_v28 = vld [vmem:[#allocation6 + $0x708] sm:$0xff] }
 0x1d9   :  { %v2332_v49 = vadd.f32 %v2331_v44, %v1820_v38  ;;  %v1323_v38 = vsub.f32 %v299_v31, %v811_v32  ;;  %v1834_v44 = vmul.f32 %v1322_v33, %v1322_v33  ;;  %v312_v32 = vld [vmem:[#allocation3 + $0x710] sm:$0xff] }
 0x1da   :  { %v824_v33 = vld [vmem:[#allocation6 + $0x710] sm:$0xff] }
 0x1db   :  { %v2333_v54 = vadd.f32 %v2332_v49, %v1821_v43  ;;  %v1324_v43 = vsub.f32 %v300_v36, %v812_v37  ;;  %v1835_v49 = vmul.f32 %v1323_v38, %v1323_v38  ;;  %v313_v37 = vld [vmem:[#allocation3 + $0x718] sm:$0xff] }
 0x1dc   :  { %v825_v38 = vld [vmem:[#allocation6 + $0x718] sm:$0xff] }
 0x1dd   :  { %v2334_v59 = vadd.f32 %v2333_v54, %v1822_v48  ;;  %v1325_v48 = vsub.f32 %v301_v41, %v813_v42  ;;  %v1836_v54 = vmul.f32 %v1324_v43, %v1324_v43  ;;  %v314_v42 = vld [vmem:[#allocation3 + $0x720] sm:$0xff] }
 0x1de   :  { %v826_v43 = vld [vmem:[#allocation6 + $0x720] sm:$0xff] }
 0x1df   :  { %v2335_v0 = vadd.f32 %v2334_v59, %v1823_v53  ;;  %v1326_v53 = vsub.f32 %v302_v46, %v814_v47  ;;  %v1837_v59 = vmul.f32 %v1325_v48, %v1325_v48  ;;  %v315_v47 = vld [vmem:[#allocation3 + $0x728] sm:$0xff] }
 0x1e0   :  { %v827_v48 = vld [vmem:[#allocation6 + $0x728] sm:$0xff] }
 0x1e1   :  { %v2336_v5 = vadd.f32 %v2335_v0, %v1824_v58  ;;  %v1327_v58 = vsub.f32 %v303_v51, %v815_v52  ;;  %v1838_v0 = vmul.f32 %v1326_v53, %v1326_v53  ;;  %v316_v52 = vld [vmem:[#allocation3 + $0x730] sm:$0xff] }
 0x1e2   :  { %v828_v53 = vld [vmem:[#allocation6 + $0x730] sm:$0xff] }
 0x1e3   :  { %v2337_v10 = vadd.f32 %v2336_v5, %v1825_v63  ;;  %v1328_v63 = vsub.f32 %v304_v56, %v816_v57  ;;  %v1839_v5 = vmul.f32 %v1327_v58, %v1327_v58  ;;  %v317_v57 = vld [vmem:[#allocation3 + $0x738] sm:$0xff] }
 0x1e4   :  { %v829_v58 = vld [vmem:[#allocation6 + $0x738] sm:$0xff] }
 0x1e5   :  { %v2338_v15 = vadd.f32 %v2337_v10, %v1826_v4  ;;  %v1329_v4 = vsub.f32 %v305_v61, %v817_v62  ;;  %v1840_v10 = vmul.f32 %v1328_v63, %v1328_v63  ;;  %v318_v62 = vld [vmem:[#allocation3 + $0x740] sm:$0xff] }
 0x1e6   :  { %v830_v63 = vld [vmem:[#allocation6 + $0x740] sm:$0xff] }
 0x1e7   :  { %v2339_v20 = vadd.f32 %v2338_v15, %v1827_v9  ;;  %v1330_v9 = vsub.f32 %v306_v2, %v818_v3  ;;  %v1841_v15 = vmul.f32 %v1329_v4, %v1329_v4  ;;  %v319_v3 = vld [vmem:[#allocation3 + $0x748] sm:$0xff] }
 0x1e8   :  { %v831_v4 = vld [vmem:[#allocation6 + $0x748] sm:$0xff] }
 0x1e9   :  { %v2340_v25 = vadd.f32 %v2339_v20, %v1828_v14  ;;  %v1331_v14 = vsub.f32 %v307_v7, %v819_v8  ;;  %v1842_v20 = vmul.f32 %v1330_v9, %v1330_v9  ;;  %v320_v8 = vld [vmem:[#allocation3 + $0x750] sm:$0xff] }
 0x1ea   :  { %v832_v9 = vld [vmem:[#allocation6 + $0x750] sm:$0xff] }
 0x1eb   :  { %v2341_v30 = vadd.f32 %v2340_v25, %v1829_v19  ;;  %v1332_v19 = vsub.f32 %v308_v12, %v820_v13  ;;  %v1843_v25 = vmul.f32 %v1331_v14, %v1331_v14  ;;  %v321_v13 = vld [vmem:[#allocation3 + $0x758] sm:$0xff] }
 0x1ec   :  { %v833_v14 = vld [vmem:[#allocation6 + $0x758] sm:$0xff] }
 0x1ed   :  { %v2342_v35 = vadd.f32 %v2341_v30, %v1830_v24  ;;  %v1333_v24 = vsub.f32 %v309_v17, %v821_v18  ;;  %v1844_v30 = vmul.f32 %v1332_v19, %v1332_v19  ;;  %v322_v18 = vld [vmem:[#allocation3 + $0x760] sm:$0xff] }
 0x1ee   :  { %v834_v19 = vld [vmem:[#allocation6 + $0x760] sm:$0xff] }
 0x1ef   :  { %v2343_v40 = vadd.f32 %v2342_v35, %v1831_v29  ;;  %v1334_v29 = vsub.f32 %v310_v22, %v822_v23  ;;  %v1845_v35 = vmul.f32 %v1333_v24, %v1333_v24  ;;  %v323_v23 = vld [vmem:[#allocation3 + $0x768] sm:$0xff] }
 0x1f0   :  { %v835_v24 = vld [vmem:[#allocation6 + $0x768] sm:$0xff] }
 0x1f1   :  { %v2344_v45 = vadd.f32 %v2343_v40, %v1832_v34  ;;  %v1335_v34 = vsub.f32 %v311_v27, %v823_v28  ;;  %v1846_v40 = vmul.f32 %v1334_v29, %v1334_v29  ;;  %v324_v28 = vld [vmem:[#allocation3 + $0x770] sm:$0xff] }
 0x1f2   :  { %v836_v29 = vld [vmem:[#allocation6 + $0x770] sm:$0xff] }
 0x1f3   :  { %v2345_v50 = vadd.f32 %v2344_v45, %v1833_v39  ;;  %v1336_v39 = vsub.f32 %v312_v32, %v824_v33  ;;  %v1847_v45 = vmul.f32 %v1335_v34, %v1335_v34  ;;  %v325_v33 = vld [vmem:[#allocation3 + $0x778] sm:$0xff] }
 0x1f4   :  { %v837_v34 = vld [vmem:[#allocation6 + $0x778] sm:$0xff] }
 0x1f5   :  { %v2346_v55 = vadd.f32 %v2345_v50, %v1834_v44  ;;  %v1337_v44 = vsub.f32 %v313_v37, %v825_v38  ;;  %v1848_v50 = vmul.f32 %v1336_v39, %v1336_v39  ;;  %v326_v38 = vld [vmem:[#allocation3 + $0x780] sm:$0xff] }
 0x1f6   :  { %v838_v39 = vld [vmem:[#allocation6 + $0x780] sm:$0xff] }
 0x1f7   :  { %v2347_v60 = vadd.f32 %v2346_v55, %v1835_v49  ;;  %v1338_v49 = vsub.f32 %v314_v42, %v826_v43  ;;  %v1849_v55 = vmul.f32 %v1337_v44, %v1337_v44  ;;  %v327_v43 = vld [vmem:[#allocation3 + $0x788] sm:$0xff] }
 0x1f8   :  { %v839_v44 = vld [vmem:[#allocation6 + $0x788] sm:$0xff] }
 0x1f9   :  { %v2348_v1 = vadd.f32 %v2347_v60, %v1836_v54  ;;  %v1339_v54 = vsub.f32 %v315_v47, %v827_v48  ;;  %v1850_v60 = vmul.f32 %v1338_v49, %v1338_v49  ;;  %v328_v48 = vld [vmem:[#allocation3 + $0x790] sm:$0xff] }
 0x1fa   :  { %v840_v49 = vld [vmem:[#allocation6 + $0x790] sm:$0xff] }
 0x1fb   :  { %v2349_v6 = vadd.f32 %v2348_v1, %v1837_v59  ;;  %v1340_v59 = vsub.f32 %v316_v52, %v828_v53  ;;  %v1851_v1 = vmul.f32 %v1339_v54, %v1339_v54  ;;  %v329_v53 = vld [vmem:[#allocation3 + $0x798] sm:$0xff] }
 0x1fc   :  { %v841_v54 = vld [vmem:[#allocation6 + $0x798] sm:$0xff] }
 0x1fd   :  { %v2350_v11 = vadd.f32 %v2349_v6, %v1838_v0  ;;  %v1341_v0 = vsub.f32 %v317_v57, %v829_v58  ;;  %v1852_v6 = vmul.f32 %v1340_v59, %v1340_v59  ;;  %v330_v58 = vld [vmem:[#allocation3 + $0x7a0] sm:$0xff] }
 0x1fe   :  { %v842_v59 = vld [vmem:[#allocation6 + $0x7a0] sm:$0xff] }
 0x1ff   :  { %v2351_v16 = vadd.f32 %v2350_v11, %v1839_v5  ;;  %v1342_v5 = vsub.f32 %v318_v62, %v830_v63  ;;  %v1853_v11 = vmul.f32 %v1341_v0, %v1341_v0  ;;  %v331_v63 = vld [vmem:[#allocation3 + $0x7a8] sm:$0xff] }
 0x200   :  { %v843_v0 = vld [vmem:[#allocation6 + $0x7a8] sm:$0xff] }
 0x201   :  { %v2352_v21 = vadd.f32 %v2351_v16, %v1840_v10  ;;  %v1343_v10 = vsub.f32 %v319_v3, %v831_v4  ;;  %v1854_v16 = vmul.f32 %v1342_v5, %v1342_v5  ;;  %v332_v4 = vld [vmem:[#allocation3 + $0x7b0] sm:$0xff] }
 0x202   :  { %v844_v5 = vld [vmem:[#allocation6 + $0x7b0] sm:$0xff] }
 0x203   :  { %v2353_v26 = vadd.f32 %v2352_v21, %v1841_v15  ;;  %v1344_v15 = vsub.f32 %v320_v8, %v832_v9  ;;  %v1855_v21 = vmul.f32 %v1343_v10, %v1343_v10  ;;  %v333_v9 = vld [vmem:[#allocation3 + $0x7b8] sm:$0xff] }
 0x204   :  { %v845_v10 = vld [vmem:[#allocation6 + $0x7b8] sm:$0xff] }
 0x205   :  { %v2354_v31 = vadd.f32 %v2353_v26, %v1842_v20  ;;  %v1345_v20 = vsub.f32 %v321_v13, %v833_v14  ;;  %v1856_v26 = vmul.f32 %v1344_v15, %v1344_v15  ;;  %v334_v14 = vld [vmem:[#allocation3 + $0x7c0] sm:$0xff] }
 0x206   :  { %v846_v15 = vld [vmem:[#allocation6 + $0x7c0] sm:$0xff] }
 0x207   :  { %v2355_v36 = vadd.f32 %v2354_v31, %v1843_v25  ;;  %v1346_v25 = vsub.f32 %v322_v18, %v834_v19  ;;  %v1857_v31 = vmul.f32 %v1345_v20, %v1345_v20  ;;  %v335_v19 = vld [vmem:[#allocation3 + $0x7c8] sm:$0xff] }
 0x208   :  { %v847_v20 = vld [vmem:[#allocation6 + $0x7c8] sm:$0xff] }
 0x209   :  { %v2356_v41 = vadd.f32 %v2355_v36, %v1844_v30  ;;  %v1347_v30 = vsub.f32 %v323_v23, %v835_v24  ;;  %v1858_v36 = vmul.f32 %v1346_v25, %v1346_v25  ;;  %v336_v24 = vld [vmem:[#allocation3 + $0x7d0] sm:$0xff] }
 0x20a   :  { %v848_v25 = vld [vmem:[#allocation6 + $0x7d0] sm:$0xff] }
 0x20b   :  { %v2357_v46 = vadd.f32 %v2356_v41, %v1845_v35  ;;  %v1348_v35 = vsub.f32 %v324_v28, %v836_v29  ;;  %v1859_v41 = vmul.f32 %v1347_v30, %v1347_v30  ;;  %v337_v29 = vld [vmem:[#allocation3 + $0x7d8] sm:$0xff] }
 0x20c   :  { %v849_v30 = vld [vmem:[#allocation6 + $0x7d8] sm:$0xff] }
 0x20d   :  { %v2358_v51 = vadd.f32 %v2357_v46, %v1846_v40  ;;  %v1349_v40 = vsub.f32 %v325_v33, %v837_v34  ;;  %v1860_v46 = vmul.f32 %v1348_v35, %v1348_v35  ;;  %v338_v34 = vld [vmem:[#allocation3 + $0x7e0] sm:$0xff] }
 0x20e   :  { %v850_v35 = vld [vmem:[#allocation6 + $0x7e0] sm:$0xff] }
 0x20f   :  { %v2359_v56 = vadd.f32 %v2358_v51, %v1847_v45  ;;  %v1350_v45 = vsub.f32 %v326_v38, %v838_v39  ;;  %v1861_v51 = vmul.f32 %v1349_v40, %v1349_v40  ;;  %v339_v39 = vld [vmem:[#allocation3 + $0x7e8] sm:$0xff] }
 0x210   :  { %v851_v40 = vld [vmem:[#allocation6 + $0x7e8] sm:$0xff] }
 0x211   :  { %v2360_v61 = vadd.f32 %v2359_v56, %v1848_v50  ;;  %v1351_v50 = vsub.f32 %v327_v43, %v839_v44  ;;  %v1862_v56 = vmul.f32 %v1350_v45, %v1350_v45  ;;  %v340_v44 = vld [vmem:[#allocation3 + $0x7f0] sm:$0xff] }
 0x212   :  { %v852_v45 = vld [vmem:[#allocation6 + $0x7f0] sm:$0xff] }
 0x213   :  { %v2361_v2 = vadd.f32 %v2360_v61, %v1849_v55  ;;  %v1352_v55 = vsub.f32 %v328_v48, %v840_v49  ;;  %v1863_v61 = vmul.f32 %v1351_v50, %v1351_v50  ;;  %v341_v49 = vld [vmem:[#allocation3 + $0x7f8] sm:$0xff] }
 0x214   :  { %v853_v50 = vld [vmem:[#allocation6 + $0x7f8] sm:$0xff] }
 0x215   :  { %v2362_v7 = vadd.f32 %v2361_v2, %v1850_v60  ;;  %v1353_v60 = vsub.f32 %v329_v53, %v841_v54  ;;  %v1864_v2 = vmul.f32 %v1352_v55, %v1352_v55  ;;  %v342_v54 = vld [vmem:[#allocation3 + $0x800] sm:$0xff] }
 0x216   :  { %v854_v55 = vld [vmem:[#allocation6 + $0x800] sm:$0xff] }
 0x217   :  { %v2363_v12 = vadd.f32 %v2362_v7, %v1851_v1  ;;  %v1354_v1 = vsub.f32 %v330_v58, %v842_v59  ;;  %v1865_v7 = vmul.f32 %v1353_v60, %v1353_v60  ;;  %v343_v59 = vld [vmem:[#allocation3 + $0x808] sm:$0xff] }
 0x218   :  { %v855_v60 = vld [vmem:[#allocation6 + $0x808] sm:$0xff] }
 0x219   :  { %v2364_v17 = vadd.f32 %v2363_v12, %v1852_v6  ;;  %v1355_v6 = vsub.f32 %v331_v63, %v843_v0  ;;  %v1866_v12 = vmul.f32 %v1354_v1, %v1354_v1  ;;  %v344_v0 = vld [vmem:[#allocation3 + $0x810] sm:$0xff] }
 0x21a   :  { %v856_v1 = vld [vmem:[#allocation6 + $0x810] sm:$0xff] }
 0x21b   :  { %v2365_v22 = vadd.f32 %v2364_v17, %v1853_v11  ;;  %v1356_v11 = vsub.f32 %v332_v4, %v844_v5  ;;  %v1867_v17 = vmul.f32 %v1355_v6, %v1355_v6  ;;  %v345_v5 = vld [vmem:[#allocation3 + $0x818] sm:$0xff] }
 0x21c   :  { %v857_v6 = vld [vmem:[#allocation6 + $0x818] sm:$0xff] }
 0x21d   :  { %v2366_v27 = vadd.f32 %v2365_v22, %v1854_v16  ;;  %v1357_v16 = vsub.f32 %v333_v9, %v845_v10  ;;  %v1868_v22 = vmul.f32 %v1356_v11, %v1356_v11  ;;  %v346_v10 = vld [vmem:[#allocation3 + $0x820] sm:$0xff] }
 0x21e   :  { %v858_v11 = vld [vmem:[#allocation6 + $0x820] sm:$0xff] }
 0x21f   :  { %v2367_v32 = vadd.f32 %v2366_v27, %v1855_v21  ;;  %v1358_v21 = vsub.f32 %v334_v14, %v846_v15  ;;  %v1869_v27 = vmul.f32 %v1357_v16, %v1357_v16  ;;  %v347_v15 = vld [vmem:[#allocation3 + $0x828] sm:$0xff] }
 0x220   :  { %v859_v16 = vld [vmem:[#allocation6 + $0x828] sm:$0xff] }
 0x221   :  { %v2368_v37 = vadd.f32 %v2367_v32, %v1856_v26  ;;  %v1359_v26 = vsub.f32 %v335_v19, %v847_v20  ;;  %v1870_v32 = vmul.f32 %v1358_v21, %v1358_v21  ;;  %v348_v20 = vld [vmem:[#allocation3 + $0x830] sm:$0xff] }
 0x222   :  { %v860_v21 = vld [vmem:[#allocation6 + $0x830] sm:$0xff] }
 0x223   :  { %v2369_v42 = vadd.f32 %v2368_v37, %v1857_v31  ;;  %v1360_v31 = vsub.f32 %v336_v24, %v848_v25  ;;  %v1871_v37 = vmul.f32 %v1359_v26, %v1359_v26  ;;  %v349_v25 = vld [vmem:[#allocation3 + $0x838] sm:$0xff] }
 0x224   :  { %v861_v26 = vld [vmem:[#allocation6 + $0x838] sm:$0xff] }
 0x225   :  { %v2370_v47 = vadd.f32 %v2369_v42, %v1858_v36  ;;  %v1361_v36 = vsub.f32 %v337_v29, %v849_v30  ;;  %v1872_v42 = vmul.f32 %v1360_v31, %v1360_v31  ;;  %v350_v30 = vld [vmem:[#allocation3 + $0x840] sm:$0xff] }
 0x226   :  { %v862_v31 = vld [vmem:[#allocation6 + $0x840] sm:$0xff] }
 0x227   :  { %v2371_v52 = vadd.f32 %v2370_v47, %v1859_v41  ;;  %v1362_v41 = vsub.f32 %v338_v34, %v850_v35  ;;  %v1873_v47 = vmul.f32 %v1361_v36, %v1361_v36  ;;  %v351_v35 = vld [vmem:[#allocation3 + $0x848] sm:$0xff] }
 0x228   :  { %v863_v36 = vld [vmem:[#allocation6 + $0x848] sm:$0xff] }
 0x229   :  { %v2372_v57 = vadd.f32 %v2371_v52, %v1860_v46  ;;  %v1363_v46 = vsub.f32 %v339_v39, %v851_v40  ;;  %v1874_v52 = vmul.f32 %v1362_v41, %v1362_v41  ;;  %v352_v40 = vld [vmem:[#allocation3 + $0x850] sm:$0xff] }
 0x22a   :  { %v864_v41 = vld [vmem:[#allocation6 + $0x850] sm:$0xff] }
 0x22b   :  { %v2373_v62 = vadd.f32 %v2372_v57, %v1861_v51  ;;  %v1364_v51 = vsub.f32 %v340_v44, %v852_v45  ;;  %v1875_v57 = vmul.f32 %v1363_v46, %v1363_v46  ;;  %v353_v45 = vld [vmem:[#allocation3 + $0x858] sm:$0xff] }
 0x22c   :  { %v865_v46 = vld [vmem:[#allocation6 + $0x858] sm:$0xff] }
 0x22d   :  { %v2374_v3 = vadd.f32 %v2373_v62, %v1862_v56  ;;  %v1365_v56 = vsub.f32 %v341_v49, %v853_v50  ;;  %v1876_v62 = vmul.f32 %v1364_v51, %v1364_v51  ;;  %v354_v50 = vld [vmem:[#allocation3 + $0x860] sm:$0xff] }
 0x22e   :  { %v866_v51 = vld [vmem:[#allocation6 + $0x860] sm:$0xff] }
 0x22f   :  { %v2375_v8 = vadd.f32 %v2374_v3, %v1863_v61  ;;  %v1366_v61 = vsub.f32 %v342_v54, %v854_v55  ;;  %v1877_v3 = vmul.f32 %v1365_v56, %v1365_v56  ;;  %v355_v55 = vld [vmem:[#allocation3 + $0x868] sm:$0xff] }
 0x230   :  { %v867_v56 = vld [vmem:[#allocation6 + $0x868] sm:$0xff] }
 0x231   :  { %v2376_v13 = vadd.f32 %v2375_v8, %v1864_v2  ;;  %v1367_v2 = vsub.f32 %v343_v59, %v855_v60  ;;  %v1878_v8 = vmul.f32 %v1366_v61, %v1366_v61  ;;  %v356_v60 = vld [vmem:[#allocation3 + $0x870] sm:$0xff] }
 0x232   :  { %v868_v61 = vld [vmem:[#allocation6 + $0x870] sm:$0xff] }
 0x233   :  { %v2377_v18 = vadd.f32 %v2376_v13, %v1865_v7  ;;  %v1368_v7 = vsub.f32 %v344_v0, %v856_v1  ;;  %v1879_v13 = vmul.f32 %v1367_v2, %v1367_v2  ;;  %v357_v1 = vld [vmem:[#allocation3 + $0x878] sm:$0xff] }
 0x234   :  { %v869_v2 = vld [vmem:[#allocation6 + $0x878] sm:$0xff] }
 0x235   :  { %v2378_v23 = vadd.f32 %v2377_v18, %v1866_v12  ;;  %v1369_v12 = vsub.f32 %v345_v5, %v857_v6  ;;  %v1880_v18 = vmul.f32 %v1368_v7, %v1368_v7  ;;  %v358_v6 = vld [vmem:[#allocation3 + $0x880] sm:$0xff] }
 0x236   :  { %v870_v7 = vld [vmem:[#allocation6 + $0x880] sm:$0xff] }
 0x237   :  { %v2379_v28 = vadd.f32 %v2378_v23, %v1867_v17  ;;  %v1370_v17 = vsub.f32 %v346_v10, %v858_v11  ;;  %v1881_v23 = vmul.f32 %v1369_v12, %v1369_v12  ;;  %v359_v11 = vld [vmem:[#allocation3 + $0x888] sm:$0xff] }
 0x238   :  { %v871_v12 = vld [vmem:[#allocation6 + $0x888] sm:$0xff] }
 0x239   :  { %v2380_v33 = vadd.f32 %v2379_v28, %v1868_v22  ;;  %v1371_v22 = vsub.f32 %v347_v15, %v859_v16  ;;  %v1882_v28 = vmul.f32 %v1370_v17, %v1370_v17  ;;  %v360_v16 = vld [vmem:[#allocation3 + $0x890] sm:$0xff] }
 0x23a   :  { %v872_v17 = vld [vmem:[#allocation6 + $0x890] sm:$0xff] }
 0x23b   :  { %v2381_v38 = vadd.f32 %v2380_v33, %v1869_v27  ;;  %v1372_v27 = vsub.f32 %v348_v20, %v860_v21  ;;  %v1883_v33 = vmul.f32 %v1371_v22, %v1371_v22  ;;  %v361_v21 = vld [vmem:[#allocation3 + $0x898] sm:$0xff] }
 0x23c   :  { %v873_v22 = vld [vmem:[#allocation6 + $0x898] sm:$0xff] }
 0x23d   :  { %v2382_v43 = vadd.f32 %v2381_v38, %v1870_v32  ;;  %v1373_v32 = vsub.f32 %v349_v25, %v861_v26  ;;  %v1884_v38 = vmul.f32 %v1372_v27, %v1372_v27  ;;  %v362_v26 = vld [vmem:[#allocation3 + $0x8a0] sm:$0xff] }
 0x23e   :  { %v874_v27 = vld [vmem:[#allocation6 + $0x8a0] sm:$0xff] }
 0x23f   :  { %v2383_v48 = vadd.f32 %v2382_v43, %v1871_v37  ;;  %v1374_v37 = vsub.f32 %v350_v30, %v862_v31  ;;  %v1885_v43 = vmul.f32 %v1373_v32, %v1373_v32  ;;  %v363_v31 = vld [vmem:[#allocation3 + $0x8a8] sm:$0xff] }
 0x240   :  { %v875_v32 = vld [vmem:[#allocation6 + $0x8a8] sm:$0xff] }
 0x241   :  { %v2384_v53 = vadd.f32 %v2383_v48, %v1872_v42  ;;  %v1375_v42 = vsub.f32 %v351_v35, %v863_v36  ;;  %v1886_v48 = vmul.f32 %v1374_v37, %v1374_v37  ;;  %v364_v36 = vld [vmem:[#allocation3 + $0x8b0] sm:$0xff] }
 0x242   :  { %v876_v37 = vld [vmem:[#allocation6 + $0x8b0] sm:$0xff] }
 0x243   :  { %v2385_v58 = vadd.f32 %v2384_v53, %v1873_v47  ;;  %v1376_v47 = vsub.f32 %v352_v40, %v864_v41  ;;  %v1887_v53 = vmul.f32 %v1375_v42, %v1375_v42  ;;  %v365_v41 = vld [vmem:[#allocation3 + $0x8b8] sm:$0xff] }
 0x244   :  { %v877_v42 = vld [vmem:[#allocation6 + $0x8b8] sm:$0xff] }
 0x245   :  { %v2386_v63 = vadd.f32 %v2385_v58, %v1874_v52  ;;  %v1377_v52 = vsub.f32 %v353_v45, %v865_v46  ;;  %v1888_v58 = vmul.f32 %v1376_v47, %v1376_v47  ;;  %v366_v46 = vld [vmem:[#allocation3 + $0x8c0] sm:$0xff] }
 0x246   :  { %v878_v47 = vld [vmem:[#allocation6 + $0x8c0] sm:$0xff] }
 0x247   :  { %v2387_v4 = vadd.f32 %v2386_v63, %v1875_v57  ;;  %v1378_v57 = vsub.f32 %v354_v50, %v866_v51  ;;  %v1889_v63 = vmul.f32 %v1377_v52, %v1377_v52  ;;  %v367_v51 = vld [vmem:[#allocation3 + $0x8c8] sm:$0xff] }
 0x248   :  { %v879_v52 = vld [vmem:[#allocation6 + $0x8c8] sm:$0xff] }
 0x249   :  { %v2388_v9 = vadd.f32 %v2387_v4, %v1876_v62  ;;  %v1379_v62 = vsub.f32 %v355_v55, %v867_v56  ;;  %v1890_v4 = vmul.f32 %v1378_v57, %v1378_v57  ;;  %v368_v56 = vld [vmem:[#allocation3 + $0x8d0] sm:$0xff] }
 0x24a   :  { %v880_v57 = vld [vmem:[#allocation6 + $0x8d0] sm:$0xff] }
 0x24b   :  { %v2389_v14 = vadd.f32 %v2388_v9, %v1877_v3  ;;  %v1380_v3 = vsub.f32 %v356_v60, %v868_v61  ;;  %v1891_v9 = vmul.f32 %v1379_v62, %v1379_v62  ;;  %v369_v61 = vld [vmem:[#allocation3 + $0x8d8] sm:$0xff] }
 0x24c   :  { %v881_v62 = vld [vmem:[#allocation6 + $0x8d8] sm:$0xff] }
 0x24d   :  { %v2390_v19 = vadd.f32 %v2389_v14, %v1878_v8  ;;  %v1381_v8 = vsub.f32 %v357_v1, %v869_v2  ;;  %v1892_v14 = vmul.f32 %v1380_v3, %v1380_v3  ;;  %v370_v2 = vld [vmem:[#allocation3 + $0x8e0] sm:$0xff] }
 0x24e   :  { %v882_v3 = vld [vmem:[#allocation6 + $0x8e0] sm:$0xff] }
 0x24f   :  { %v2391_v24 = vadd.f32 %v2390_v19, %v1879_v13  ;;  %v1382_v13 = vsub.f32 %v358_v6, %v870_v7  ;;  %v1893_v19 = vmul.f32 %v1381_v8, %v1381_v8  ;;  %v371_v7 = vld [vmem:[#allocation3 + $0x8e8] sm:$0xff] }
 0x250   :  { %v883_v8 = vld [vmem:[#allocation6 + $0x8e8] sm:$0xff] }
 0x251   :  { %v2392_v29 = vadd.f32 %v2391_v24, %v1880_v18  ;;  %v1383_v18 = vsub.f32 %v359_v11, %v871_v12  ;;  %v1894_v24 = vmul.f32 %v1382_v13, %v1382_v13  ;;  %v372_v12 = vld [vmem:[#allocation3 + $0x8f0] sm:$0xff] }
 0x252   :  { %v884_v13 = vld [vmem:[#allocation6 + $0x8f0] sm:$0xff] }
 0x253   :  { %v2393_v34 = vadd.f32 %v2392_v29, %v1881_v23  ;;  %v1384_v23 = vsub.f32 %v360_v16, %v872_v17  ;;  %v1895_v29 = vmul.f32 %v1383_v18, %v1383_v18  ;;  %v373_v17 = vld [vmem:[#allocation3 + $0x8f8] sm:$0xff] }
 0x254   :  { %v885_v18 = vld [vmem:[#allocation6 + $0x8f8] sm:$0xff] }
 0x255   :  { %v2394_v39 = vadd.f32 %v2393_v34, %v1882_v28  ;;  %v1385_v28 = vsub.f32 %v361_v21, %v873_v22  ;;  %v1896_v34 = vmul.f32 %v1384_v23, %v1384_v23  ;;  %v374_v22 = vld [vmem:[#allocation3 + $0x900] sm:$0xff] }
 0x256   :  { %v886_v23 = vld [vmem:[#allocation6 + $0x900] sm:$0xff] }
 0x257   :  { %v2395_v44 = vadd.f32 %v2394_v39, %v1883_v33  ;;  %v1386_v33 = vsub.f32 %v362_v26, %v874_v27  ;;  %v1897_v39 = vmul.f32 %v1385_v28, %v1385_v28  ;;  %v375_v27 = vld [vmem:[#allocation3 + $0x908] sm:$0xff] }
 0x258   :  { %v887_v28 = vld [vmem:[#allocation6 + $0x908] sm:$0xff] }
 0x259   :  { %v2396_v49 = vadd.f32 %v2395_v44, %v1884_v38  ;;  %v1387_v38 = vsub.f32 %v363_v31, %v875_v32  ;;  %v1898_v44 = vmul.f32 %v1386_v33, %v1386_v33  ;;  %v376_v32 = vld [vmem:[#allocation3 + $0x910] sm:$0xff] }
 0x25a   :  { %v888_v33 = vld [vmem:[#allocation6 + $0x910] sm:$0xff] }
 0x25b   :  { %v2397_v54 = vadd.f32 %v2396_v49, %v1885_v43  ;;  %v1388_v43 = vsub.f32 %v364_v36, %v876_v37  ;;  %v1899_v49 = vmul.f32 %v1387_v38, %v1387_v38  ;;  %v377_v37 = vld [vmem:[#allocation3 + $0x918] sm:$0xff] }
 0x25c   :  { %v889_v38 = vld [vmem:[#allocation6 + $0x918] sm:$0xff] }
 0x25d   :  { %v2398_v59 = vadd.f32 %v2397_v54, %v1886_v48  ;;  %v1389_v48 = vsub.f32 %v365_v41, %v877_v42  ;;  %v1900_v54 = vmul.f32 %v1388_v43, %v1388_v43  ;;  %v378_v42 = vld [vmem:[#allocation3 + $0x920] sm:$0xff] }
 0x25e   :  { %v890_v43 = vld [vmem:[#allocation6 + $0x920] sm:$0xff] }
 0x25f   :  { %v2399_v0 = vadd.f32 %v2398_v59, %v1887_v53  ;;  %v1390_v53 = vsub.f32 %v366_v46, %v878_v47  ;;  %v1901_v59 = vmul.f32 %v1389_v48, %v1389_v48  ;;  %v379_v47 = vld [vmem:[#allocation3 + $0x928] sm:$0xff] }
 0x260   :  { %v891_v48 = vld [vmem:[#allocation6 + $0x928] sm:$0xff] }
 0x261   :  { %v2400_v5 = vadd.f32 %v2399_v0, %v1888_v58  ;;  %v1391_v58 = vsub.f32 %v367_v51, %v879_v52  ;;  %v1902_v0 = vmul.f32 %v1390_v53, %v1390_v53  ;;  %v380_v52 = vld [vmem:[#allocation3 + $0x930] sm:$0xff] }
 0x262   :  { %v892_v53 = vld [vmem:[#allocation6 + $0x930] sm:$0xff] }
 0x263   :  { %v2401_v10 = vadd.f32 %v2400_v5, %v1889_v63  ;;  %v1392_v63 = vsub.f32 %v368_v56, %v880_v57  ;;  %v1903_v5 = vmul.f32 %v1391_v58, %v1391_v58  ;;  %v381_v57 = vld [vmem:[#allocation3 + $0x938] sm:$0xff] }
 0x264   :  { %v893_v58 = vld [vmem:[#allocation6 + $0x938] sm:$0xff] }
 0x265   :  { %v2402_v15 = vadd.f32 %v2401_v10, %v1890_v4  ;;  %v1393_v4 = vsub.f32 %v369_v61, %v881_v62  ;;  %v1904_v10 = vmul.f32 %v1392_v63, %v1392_v63  ;;  %v382_v62 = vld [vmem:[#allocation3 + $0x940] sm:$0xff] }
 0x266   :  { %v894_v63 = vld [vmem:[#allocation6 + $0x940] sm:$0xff] }
 0x267   :  { %v2403_v20 = vadd.f32 %v2402_v15, %v1891_v9  ;;  %v1394_v9 = vsub.f32 %v370_v2, %v882_v3  ;;  %v1905_v15 = vmul.f32 %v1393_v4, %v1393_v4  ;;  %v383_v3 = vld [vmem:[#allocation3 + $0x948] sm:$0xff] }
 0x268   :  { %v895_v4 = vld [vmem:[#allocation6 + $0x948] sm:$0xff] }
 0x269   :  { %v2404_v25 = vadd.f32 %v2403_v20, %v1892_v14  ;;  %v1395_v14 = vsub.f32 %v371_v7, %v883_v8  ;;  %v1906_v20 = vmul.f32 %v1394_v9, %v1394_v9  ;;  %v384_v8 = vld [vmem:[#allocation3 + $0x950] sm:$0xff] }
 0x26a   :  { %v896_v9 = vld [vmem:[#allocation6 + $0x950] sm:$0xff] }
 0x26b   :  { %v2405_v30 = vadd.f32 %v2404_v25, %v1893_v19  ;;  %v1396_v19 = vsub.f32 %v372_v12, %v884_v13  ;;  %v1907_v25 = vmul.f32 %v1395_v14, %v1395_v14  ;;  %v385_v13 = vld [vmem:[#allocation3 + $0x958] sm:$0xff] }
 0x26c   :  { %v897_v14 = vld [vmem:[#allocation6 + $0x958] sm:$0xff] }
 0x26d   :  { %v2406_v35 = vadd.f32 %v2405_v30, %v1894_v24  ;;  %v1397_v24 = vsub.f32 %v373_v17, %v885_v18  ;;  %v1908_v30 = vmul.f32 %v1396_v19, %v1396_v19  ;;  %v386_v18 = vld [vmem:[#allocation3 + $0x960] sm:$0xff] }
 0x26e   :  { %v898_v19 = vld [vmem:[#allocation6 + $0x960] sm:$0xff] }
 0x26f   :  { %v2407_v40 = vadd.f32 %v2406_v35, %v1895_v29  ;;  %v1398_v29 = vsub.f32 %v374_v22, %v886_v23  ;;  %v1909_v35 = vmul.f32 %v1397_v24, %v1397_v24  ;;  %v387_v23 = vld [vmem:[#allocation3 + $0x968] sm:$0xff] }
 0x270   :  { %v899_v24 = vld [vmem:[#allocation6 + $0x968] sm:$0xff] }
 0x271   :  { %v2408_v45 = vadd.f32 %v2407_v40, %v1896_v34  ;;  %v1399_v34 = vsub.f32 %v375_v27, %v887_v28  ;;  %v1910_v40 = vmul.f32 %v1398_v29, %v1398_v29  ;;  %v388_v28 = vld [vmem:[#allocation3 + $0x970] sm:$0xff] }
 0x272   :  { %v900_v29 = vld [vmem:[#allocation6 + $0x970] sm:$0xff] }
 0x273   :  { %v2409_v50 = vadd.f32 %v2408_v45, %v1897_v39  ;;  %v1400_v39 = vsub.f32 %v376_v32, %v888_v33  ;;  %v1911_v45 = vmul.f32 %v1399_v34, %v1399_v34  ;;  %v389_v33 = vld [vmem:[#allocation3 + $0x978] sm:$0xff] }
 0x274   :  { %v901_v34 = vld [vmem:[#allocation6 + $0x978] sm:$0xff] }
 0x275   :  { %v2410_v55 = vadd.f32 %v2409_v50, %v1898_v44  ;;  %v1401_v44 = vsub.f32 %v377_v37, %v889_v38  ;;  %v1912_v50 = vmul.f32 %v1400_v39, %v1400_v39  ;;  %v390_v38 = vld [vmem:[#allocation3 + $0x980] sm:$0xff] }
 0x276   :  { %v902_v39 = vld [vmem:[#allocation6 + $0x980] sm:$0xff] }
 0x277   :  { %v2411_v60 = vadd.f32 %v2410_v55, %v1899_v49  ;;  %v1402_v49 = vsub.f32 %v378_v42, %v890_v43  ;;  %v1913_v55 = vmul.f32 %v1401_v44, %v1401_v44  ;;  %v391_v43 = vld [vmem:[#allocation3 + $0x988] sm:$0xff] }
 0x278   :  { %v903_v44 = vld [vmem:[#allocation6 + $0x988] sm:$0xff] }
 0x279   :  { %v2412_v1 = vadd.f32 %v2411_v60, %v1900_v54  ;;  %v1403_v54 = vsub.f32 %v379_v47, %v891_v48  ;;  %v1914_v60 = vmul.f32 %v1402_v49, %v1402_v49  ;;  %v392_v48 = vld [vmem:[#allocation3 + $0x990] sm:$0xff] }
 0x27a   :  { %v904_v49 = vld [vmem:[#allocation6 + $0x990] sm:$0xff] }
 0x27b   :  { %v2413_v6 = vadd.f32 %v2412_v1, %v1901_v59  ;;  %v1404_v59 = vsub.f32 %v380_v52, %v892_v53  ;;  %v1915_v1 = vmul.f32 %v1403_v54, %v1403_v54  ;;  %v393_v53 = vld [vmem:[#allocation3 + $0x998] sm:$0xff] }
 0x27c   :  { %v905_v54 = vld [vmem:[#allocation6 + $0x998] sm:$0xff] }
 0x27d   :  { %v2414_v11 = vadd.f32 %v2413_v6, %v1902_v0  ;;  %v1405_v0 = vsub.f32 %v381_v57, %v893_v58  ;;  %v1916_v6 = vmul.f32 %v1404_v59, %v1404_v59  ;;  %v394_v58 = vld [vmem:[#allocation3 + $0x9a0] sm:$0xff] }
 0x27e   :  { %v906_v59 = vld [vmem:[#allocation6 + $0x9a0] sm:$0xff] }
 0x27f   :  { %v2415_v16 = vadd.f32 %v2414_v11, %v1903_v5  ;;  %v1406_v5 = vsub.f32 %v382_v62, %v894_v63  ;;  %v1917_v11 = vmul.f32 %v1405_v0, %v1405_v0  ;;  %v395_v63 = vld [vmem:[#allocation3 + $0x9a8] sm:$0xff] }
 0x280   :  { %v907_v0 = vld [vmem:[#allocation6 + $0x9a8] sm:$0xff] }
 0x281   :  { %v2416_v21 = vadd.f32 %v2415_v16, %v1904_v10  ;;  %v1407_v10 = vsub.f32 %v383_v3, %v895_v4  ;;  %v1918_v16 = vmul.f32 %v1406_v5, %v1406_v5  ;;  %v396_v4 = vld [vmem:[#allocation3 + $0x9b0] sm:$0xff] }
 0x282   :  { %v908_v5 = vld [vmem:[#allocation6 + $0x9b0] sm:$0xff] }
 0x283   :  { %v2417_v26 = vadd.f32 %v2416_v21, %v1905_v15  ;;  %v1408_v15 = vsub.f32 %v384_v8, %v896_v9  ;;  %v1919_v21 = vmul.f32 %v1407_v10, %v1407_v10  ;;  %v397_v9 = vld [vmem:[#allocation3 + $0x9b8] sm:$0xff] }
 0x284   :  { %v909_v10 = vld [vmem:[#allocation6 + $0x9b8] sm:$0xff] }
 0x285   :  { %v2418_v31 = vadd.f32 %v2417_v26, %v1906_v20  ;;  %v1409_v20 = vsub.f32 %v385_v13, %v897_v14  ;;  %v1920_v26 = vmul.f32 %v1408_v15, %v1408_v15  ;;  %v398_v14 = vld [vmem:[#allocation3 + $0x9c0] sm:$0xff] }
 0x286   :  { %v910_v15 = vld [vmem:[#allocation6 + $0x9c0] sm:$0xff] }
 0x287   :  { %v2419_v36 = vadd.f32 %v2418_v31, %v1907_v25  ;;  %v1410_v25 = vsub.f32 %v386_v18, %v898_v19  ;;  %v1921_v31 = vmul.f32 %v1409_v20, %v1409_v20  ;;  %v399_v19 = vld [vmem:[#allocation3 + $0x9c8] sm:$0xff] }
 0x288   :  { %v911_v20 = vld [vmem:[#allocation6 + $0x9c8] sm:$0xff] }
 0x289   :  { %v2420_v41 = vadd.f32 %v2419_v36, %v1908_v30  ;;  %v1411_v30 = vsub.f32 %v387_v23, %v899_v24  ;;  %v1922_v36 = vmul.f32 %v1410_v25, %v1410_v25  ;;  %v400_v24 = vld [vmem:[#allocation3 + $0x9d0] sm:$0xff] }
 0x28a   :  { %v912_v25 = vld [vmem:[#allocation6 + $0x9d0] sm:$0xff] }
 0x28b   :  { %v2421_v46 = vadd.f32 %v2420_v41, %v1909_v35  ;;  %v1412_v35 = vsub.f32 %v388_v28, %v900_v29  ;;  %v1923_v41 = vmul.f32 %v1411_v30, %v1411_v30  ;;  %v401_v29 = vld [vmem:[#allocation3 + $0x9d8] sm:$0xff] }
 0x28c   :  { %v913_v30 = vld [vmem:[#allocation6 + $0x9d8] sm:$0xff] }
 0x28d   :  { %v2422_v51 = vadd.f32 %v2421_v46, %v1910_v40  ;;  %v1413_v40 = vsub.f32 %v389_v33, %v901_v34  ;;  %v1924_v46 = vmul.f32 %v1412_v35, %v1412_v35  ;;  %v402_v34 = vld [vmem:[#allocation3 + $0x9e0] sm:$0xff] }
 0x28e   :  { %v914_v35 = vld [vmem:[#allocation6 + $0x9e0] sm:$0xff] }
 0x28f   :  { %v2423_v56 = vadd.f32 %v2422_v51, %v1911_v45  ;;  %v1414_v45 = vsub.f32 %v390_v38, %v902_v39  ;;  %v1925_v51 = vmul.f32 %v1413_v40, %v1413_v40  ;;  %v403_v39 = vld [vmem:[#allocation3 + $0x9e8] sm:$0xff] }
 0x290   :  { %v915_v40 = vld [vmem:[#allocation6 + $0x9e8] sm:$0xff] }
 0x291   :  { %v2424_v61 = vadd.f32 %v2423_v56, %v1912_v50  ;;  %v1415_v50 = vsub.f32 %v391_v43, %v903_v44  ;;  %v1926_v56 = vmul.f32 %v1414_v45, %v1414_v45  ;;  %v404_v44 = vld [vmem:[#allocation3 + $0x9f0] sm:$0xff] }
 0x292   :  { %v916_v45 = vld [vmem:[#allocation6 + $0x9f0] sm:$0xff] }
 0x293   :  { %v2425_v2 = vadd.f32 %v2424_v61, %v1913_v55  ;;  %v1416_v55 = vsub.f32 %v392_v48, %v904_v49  ;;  %v1927_v61 = vmul.f32 %v1415_v50, %v1415_v50  ;;  %v405_v49 = vld [vmem:[#allocation3 + $0x9f8] sm:$0xff] }
 0x294   :  { %v917_v50 = vld [vmem:[#allocation6 + $0x9f8] sm:$0xff] }
 0x295   :  { %v2426_v7 = vadd.f32 %v2425_v2, %v1914_v60  ;;  %v1417_v60 = vsub.f32 %v393_v53, %v905_v54  ;;  %v1928_v2 = vmul.f32 %v1416_v55, %v1416_v55  ;;  %v406_v54 = vld [vmem:[#allocation3 + $0xa00] sm:$0xff] }
 0x296   :  { %v918_v55 = vld [vmem:[#allocation6 + $0xa00] sm:$0xff] }
 0x297   :  { %v2427_v12 = vadd.f32 %v2426_v7, %v1915_v1  ;;  %v1418_v1 = vsub.f32 %v394_v58, %v906_v59  ;;  %v1929_v7 = vmul.f32 %v1417_v60, %v1417_v60  ;;  %v407_v59 = vld [vmem:[#allocation3 + $0xa08] sm:$0xff] }
 0x298   :  { %v919_v60 = vld [vmem:[#allocation6 + $0xa08] sm:$0xff] }
 0x299   :  { %v2428_v17 = vadd.f32 %v2427_v12, %v1916_v6  ;;  %v1419_v6 = vsub.f32 %v395_v63, %v907_v0  ;;  %v1930_v12 = vmul.f32 %v1418_v1, %v1418_v1  ;;  %v408_v0 = vld [vmem:[#allocation3 + $0xa10] sm:$0xff] }
 0x29a   :  { %v920_v1 = vld [vmem:[#allocation6 + $0xa10] sm:$0xff] }
 0x29b   :  { %v2429_v22 = vadd.f32 %v2428_v17, %v1917_v11  ;;  %v1420_v11 = vsub.f32 %v396_v4, %v908_v5  ;;  %v1931_v17 = vmul.f32 %v1419_v6, %v1419_v6  ;;  %v409_v5 = vld [vmem:[#allocation3 + $0xa18] sm:$0xff] }
 0x29c   :  { %v921_v6 = vld [vmem:[#allocation6 + $0xa18] sm:$0xff] }
 0x29d   :  { %v2430_v27 = vadd.f32 %v2429_v22, %v1918_v16  ;;  %v1421_v16 = vsub.f32 %v397_v9, %v909_v10  ;;  %v1932_v22 = vmul.f32 %v1420_v11, %v1420_v11  ;;  %v410_v10 = vld [vmem:[#allocation3 + $0xa20] sm:$0xff] }
 0x29e   :  { %v922_v11 = vld [vmem:[#allocation6 + $0xa20] sm:$0xff] }
 0x29f   :  { %v2431_v32 = vadd.f32 %v2430_v27, %v1919_v21  ;;  %v1422_v21 = vsub.f32 %v398_v14, %v910_v15  ;;  %v1933_v27 = vmul.f32 %v1421_v16, %v1421_v16  ;;  %v411_v15 = vld [vmem:[#allocation3 + $0xa28] sm:$0xff] }
 0x2a0   :  { %v923_v16 = vld [vmem:[#allocation6 + $0xa28] sm:$0xff] }
 0x2a1   :  { %v2432_v37 = vadd.f32 %v2431_v32, %v1920_v26  ;;  %v1423_v26 = vsub.f32 %v399_v19, %v911_v20  ;;  %v1934_v32 = vmul.f32 %v1422_v21, %v1422_v21  ;;  %v412_v20 = vld [vmem:[#allocation3 + $0xa30] sm:$0xff] }
 0x2a2   :  { %v924_v21 = vld [vmem:[#allocation6 + $0xa30] sm:$0xff] }
 0x2a3   :  { %v2433_v42 = vadd.f32 %v2432_v37, %v1921_v31  ;;  %v1424_v31 = vsub.f32 %v400_v24, %v912_v25  ;;  %v1935_v37 = vmul.f32 %v1423_v26, %v1423_v26  ;;  %v413_v25 = vld [vmem:[#allocation3 + $0xa38] sm:$0xff] }
 0x2a4   :  { %v925_v26 = vld [vmem:[#allocation6 + $0xa38] sm:$0xff] }
 0x2a5   :  { %v2434_v47 = vadd.f32 %v2433_v42, %v1922_v36  ;;  %v1425_v36 = vsub.f32 %v401_v29, %v913_v30  ;;  %v1936_v42 = vmul.f32 %v1424_v31, %v1424_v31  ;;  %v414_v30 = vld [vmem:[#allocation3 + $0xa40] sm:$0xff] }
 0x2a6   :  { %v926_v31 = vld [vmem:[#allocation6 + $0xa40] sm:$0xff] }
 0x2a7   :  { %v2435_v52 = vadd.f32 %v2434_v47, %v1923_v41  ;;  %v1426_v41 = vsub.f32 %v402_v34, %v914_v35  ;;  %v1937_v47 = vmul.f32 %v1425_v36, %v1425_v36  ;;  %v415_v35 = vld [vmem:[#allocation3 + $0xa48] sm:$0xff] }
 0x2a8   :  { %v927_v36 = vld [vmem:[#allocation6 + $0xa48] sm:$0xff] }
 0x2a9   :  { %v2436_v57 = vadd.f32 %v2435_v52, %v1924_v46  ;;  %v1427_v46 = vsub.f32 %v403_v39, %v915_v40  ;;  %v1938_v52 = vmul.f32 %v1426_v41, %v1426_v41  ;;  %v416_v40 = vld [vmem:[#allocation3 + $0xa50] sm:$0xff] }
 0x2aa   :  { %v928_v41 = vld [vmem:[#allocation6 + $0xa50] sm:$0xff] }
 0x2ab   :  { %v2437_v62 = vadd.f32 %v2436_v57, %v1925_v51  ;;  %v1428_v51 = vsub.f32 %v404_v44, %v916_v45  ;;  %v1939_v57 = vmul.f32 %v1427_v46, %v1427_v46  ;;  %v417_v45 = vld [vmem:[#allocation3 + $0xa58] sm:$0xff] }
 0x2ac   :  { %v929_v46 = vld [vmem:[#allocation6 + $0xa58] sm:$0xff] }
 0x2ad   :  { %v2438_v3 = vadd.f32 %v2437_v62, %v1926_v56  ;;  %v1429_v56 = vsub.f32 %v405_v49, %v917_v50  ;;  %v1940_v62 = vmul.f32 %v1428_v51, %v1428_v51  ;;  %v418_v50 = vld [vmem:[#allocation3 + $0xa60] sm:$0xff] }
 0x2ae   :  { %v930_v51 = vld [vmem:[#allocation6 + $0xa60] sm:$0xff] }
 0x2af   :  { %v2439_v8 = vadd.f32 %v2438_v3, %v1927_v61  ;;  %v1430_v61 = vsub.f32 %v406_v54, %v918_v55  ;;  %v1941_v3 = vmul.f32 %v1429_v56, %v1429_v56  ;;  %v419_v55 = vld [vmem:[#allocation3 + $0xa68] sm:$0xff] }
 0x2b0   :  { %v931_v56 = vld [vmem:[#allocation6 + $0xa68] sm:$0xff] }
 0x2b1   :  { %v2440_v13 = vadd.f32 %v2439_v8, %v1928_v2  ;;  %v1431_v2 = vsub.f32 %v407_v59, %v919_v60  ;;  %v1942_v8 = vmul.f32 %v1430_v61, %v1430_v61  ;;  %v420_v60 = vld [vmem:[#allocation3 + $0xa70] sm:$0xff] }
 0x2b2   :  { %v932_v61 = vld [vmem:[#allocation6 + $0xa70] sm:$0xff] }
 0x2b3   :  { %v2441_v18 = vadd.f32 %v2440_v13, %v1929_v7  ;;  %v1432_v7 = vsub.f32 %v408_v0, %v920_v1  ;;  %v1943_v13 = vmul.f32 %v1431_v2, %v1431_v2  ;;  %v421_v1 = vld [vmem:[#allocation3 + $0xa78] sm:$0xff] }
 0x2b4   :  { %v933_v2 = vld [vmem:[#allocation6 + $0xa78] sm:$0xff] }
 0x2b5   :  { %v2442_v23 = vadd.f32 %v2441_v18, %v1930_v12  ;;  %v1433_v12 = vsub.f32 %v409_v5, %v921_v6  ;;  %v1944_v18 = vmul.f32 %v1432_v7, %v1432_v7  ;;  %v422_v6 = vld [vmem:[#allocation3 + $0xa80] sm:$0xff] }
 0x2b6   :  { %v934_v7 = vld [vmem:[#allocation6 + $0xa80] sm:$0xff] }
 0x2b7   :  { %v2443_v28 = vadd.f32 %v2442_v23, %v1931_v17  ;;  %v1434_v17 = vsub.f32 %v410_v10, %v922_v11  ;;  %v1945_v23 = vmul.f32 %v1433_v12, %v1433_v12  ;;  %v423_v11 = vld [vmem:[#allocation3 + $0xa88] sm:$0xff] }
 0x2b8   :  { %v935_v12 = vld [vmem:[#allocation6 + $0xa88] sm:$0xff] }
 0x2b9   :  { %v2444_v33 = vadd.f32 %v2443_v28, %v1932_v22  ;;  %v1435_v22 = vsub.f32 %v411_v15, %v923_v16  ;;  %v1946_v28 = vmul.f32 %v1434_v17, %v1434_v17  ;;  %v424_v16 = vld [vmem:[#allocation3 + $0xa90] sm:$0xff] }
 0x2ba   :  { %v936_v17 = vld [vmem:[#allocation6 + $0xa90] sm:$0xff] }
 0x2bb   :  { %v2445_v38 = vadd.f32 %v2444_v33, %v1933_v27  ;;  %v1436_v27 = vsub.f32 %v412_v20, %v924_v21  ;;  %v1947_v33 = vmul.f32 %v1435_v22, %v1435_v22  ;;  %v425_v21 = vld [vmem:[#allocation3 + $0xa98] sm:$0xff] }
 0x2bc   :  { %v937_v22 = vld [vmem:[#allocation6 + $0xa98] sm:$0xff] }
 0x2bd   :  { %v2446_v43 = vadd.f32 %v2445_v38, %v1934_v32  ;;  %v1437_v32 = vsub.f32 %v413_v25, %v925_v26  ;;  %v1948_v38 = vmul.f32 %v1436_v27, %v1436_v27  ;;  %v426_v26 = vld [vmem:[#allocation3 + $0xaa0] sm:$0xff] }
 0x2be   :  { %v938_v27 = vld [vmem:[#allocation6 + $0xaa0] sm:$0xff] }
 0x2bf   :  { %v2447_v48 = vadd.f32 %v2446_v43, %v1935_v37  ;;  %v1438_v37 = vsub.f32 %v414_v30, %v926_v31  ;;  %v1949_v43 = vmul.f32 %v1437_v32, %v1437_v32  ;;  %v427_v31 = vld [vmem:[#allocation3 + $0xaa8] sm:$0xff] }
 0x2c0   :  { %v939_v32 = vld [vmem:[#allocation6 + $0xaa8] sm:$0xff] }
 0x2c1   :  { %v2448_v53 = vadd.f32 %v2447_v48, %v1936_v42  ;;  %v1439_v42 = vsub.f32 %v415_v35, %v927_v36  ;;  %v1950_v48 = vmul.f32 %v1438_v37, %v1438_v37  ;;  %v428_v36 = vld [vmem:[#allocation3 + $0xab0] sm:$0xff] }
 0x2c2   :  { %v940_v37 = vld [vmem:[#allocation6 + $0xab0] sm:$0xff] }
 0x2c3   :  { %v2449_v58 = vadd.f32 %v2448_v53, %v1937_v47  ;;  %v1440_v47 = vsub.f32 %v416_v40, %v928_v41  ;;  %v1951_v53 = vmul.f32 %v1439_v42, %v1439_v42  ;;  %v429_v41 = vld [vmem:[#allocation3 + $0xab8] sm:$0xff] }
 0x2c4   :  { %v941_v42 = vld [vmem:[#allocation6 + $0xab8] sm:$0xff] }
 0x2c5   :  { %v2450_v63 = vadd.f32 %v2449_v58, %v1938_v52  ;;  %v1441_v52 = vsub.f32 %v417_v45, %v929_v46  ;;  %v1952_v58 = vmul.f32 %v1440_v47, %v1440_v47  ;;  %v430_v46 = vld [vmem:[#allocation3 + $0xac0] sm:$0xff] }
 0x2c6   :  { %v942_v47 = vld [vmem:[#allocation6 + $0xac0] sm:$0xff] }
 0x2c7   :  { %v2451_v4 = vadd.f32 %v2450_v63, %v1939_v57  ;;  %v1442_v57 = vsub.f32 %v418_v50, %v930_v51  ;;  %v1953_v63 = vmul.f32 %v1441_v52, %v1441_v52  ;;  %v431_v51 = vld [vmem:[#allocation3 + $0xac8] sm:$0xff] }
 0x2c8   :  { %v943_v52 = vld [vmem:[#allocation6 + $0xac8] sm:$0xff] }
 0x2c9   :  { %v2452_v9 = vadd.f32 %v2451_v4, %v1940_v62  ;;  %v1443_v62 = vsub.f32 %v419_v55, %v931_v56  ;;  %v1954_v4 = vmul.f32 %v1442_v57, %v1442_v57  ;;  %v432_v56 = vld [vmem:[#allocation3 + $0xad0] sm:$0xff] }
 0x2ca   :  { %v944_v57 = vld [vmem:[#allocation6 + $0xad0] sm:$0xff] }
 0x2cb   :  { %v2453_v14 = vadd.f32 %v2452_v9, %v1941_v3  ;;  %v1444_v3 = vsub.f32 %v420_v60, %v932_v61  ;;  %v1955_v9 = vmul.f32 %v1443_v62, %v1443_v62 }
 0x2cd   :  { %v2454_v19 = vadd.f32 %v2453_v14, %v1942_v8  ;;  %v1445_v8 = vsub.f32 %v421_v1, %v933_v2  ;;  %v1956_v14 = vmul.f32 %v1444_v3, %v1444_v3  ;;  %v1456_v1 = vsub.f32 %v432_v56, %v944_v57 }
 0x2cf   :  { %v2455_v24 = vadd.f32 %v2454_v19, %v1943_v13  ;;  %v1446_v13 = vsub.f32 %v422_v6, %v934_v7  ;;  %v1957_v19 = vmul.f32 %v1445_v8, %v1445_v8 }
 0x2d1   :  { %v2456_v29 = vadd.f32 %v2455_v24, %v1944_v18  ;;  %v1447_v18 = vsub.f32 %v423_v11, %v935_v12  ;;  %v1958_v24 = vmul.f32 %v1446_v13, %v1446_v13  ;;  %v1968_v12 = vmul.f32 %v1456_v1, %v1456_v1  ;;  %v955_v1 = vld [vmem:[#allocation6 + $0xb28] sm:$0xff] }
 0x2d3   :  { %v2457_v34 = vadd.f32 %v2456_v29, %v1945_v23  ;;  %v1448_v23 = vsub.f32 %v424_v16, %v936_v17  ;;  %v1959_v29 = vmul.f32 %v1447_v18, %v1447_v18 }
 0x2d5   :  { %v2458_v39 = vadd.f32 %v2457_v34, %v1946_v28  ;;  %v1449_v28 = vsub.f32 %v425_v21, %v937_v22  ;;  %v1960_v34 = vmul.f32 %v1448_v23, %v1448_v23  ;;  %v949_v21 = vld [vmem:[#allocation6 + $0xaf8] sm:$0xff] }
 0x2d7   :  { %v2459_v44 = vadd.f32 %v2458_v39, %v1947_v33  ;;  %v1450_v33 = vsub.f32 %v426_v26, %v938_v27  ;;  %v1961_v39 = vmul.f32 %v1449_v28, %v1449_v28  ;;  %v438_v28 = vld [vmem:[#allocation3 + $0xb00] sm:$0xff] }
 0x2d9   :  { %v2460_v49 = vadd.f32 %v2459_v44, %v1948_v38  ;;  %v1451_v38 = vsub.f32 %v427_v31, %v939_v32  ;;  %v1962_v44 = vmul.f32 %v1450_v33, %v1450_v33 }
 0x2db   :  { %v2461_v54 = vadd.f32 %v2460_v49, %v1949_v43  ;;  %v1452_v43 = vsub.f32 %v428_v36, %v940_v37  ;;  %v1963_v49 = vmul.f32 %v1451_v38, %v1451_v38  ;;  %v439_v36 = vld [vmem:[#allocation3 + $0xb08] sm:$0xff] }
 0x2dc   :  { %v951_v37 = vld [vmem:[#allocation6 + $0xb08] sm:$0xff] }
 0x2dd   :  { %v2462_v59 = vadd.f32 %v2461_v54, %v1950_v48  ;;  %v1453_v48 = vsub.f32 %v429_v41, %v941_v42  ;;  %v1964_v54 = vmul.f32 %v1452_v43, %v1452_v43 }
 0x2df   :  { %v2463_v0 = vadd.f32 %v2462_v59, %v1951_v53  ;;  %v1454_v53 = vsub.f32 %v430_v46, %v942_v47  ;;  %v1455_v59 = vsub.f32 %v431_v51, %v943_v52  ;;  %v1965_v60 = vmul.f32 %v1453_v48, %v1453_v48  ;;  %v441_v51 = vld [vmem:[#allocation3 + $0xb18] sm:$0xff] }
 0x2e0   :  { %v1463_v48 = vsub.f32 %v439_v36, %v951_v37  ;;  %v953_v52 = vld [vmem:[#allocation6 + $0xb18] sm:$0xff]  ;;  %v450_v36 = vld [vmem:[#allocation3 + $0xb60] sm:$0xff] }
 0x2e1   :  { %v2464_v5 = vadd.f32 %v2463_v0, %v1952_v58  ;;  %v2664_v58 = vld [vmem:[#allocation9] sm:$0x3]  ;;  %v945_v0 = vld [vmem:[#allocation6 + $0xad8] sm:$0xff]  ;;  %v1966_v2 = vmul.f32 %v1454_v53, %v1454_v53  ;;  %v1967_v7 = vmul.f32 %v1455_v59, %v1455_v59 }
 0x2e2   :  { %v2668_v62 = vmul.f32 1.442695, %v2664_v58  ;;  %v2665_v22 = vadd.f32 1.0, %v2664_v58  ;;  %v442_v59 = vld [vmem:[#allocation3 + $0xb20] sm:$0xff] }
 0x2e3   :  { %v2465_v10 = vadd.f32 %v2464_v5, %v1953_v63  ;;  %v433_v63 = vld [vmem:[#allocation3 + $0xad8] sm:$0xff]  ;;  %v946_v5 = vld [vmem:[#allocation6 + $0xae0] sm:$0xff] }
 0x2e4   :  { %2730 = vpow2.f32 %v2668_v62  ;;  %v1457_v6 = vsub.f32 %v433_v63, %v945_v0  ;;  %v1975_v62 = vmul.f32 %v1463_v48, %v1463_v48  ;;  %v443_v0 = vld [vmem:[#allocation3 + $0xb28] sm:$0xff]  ;;  %v962_v37 = vld [vmem:[#allocation6 + $0xb60] sm:$0xff] }
 0x2e5   :  { %v2466_v15 = vadd.f32 %v2465_v10, %v1954_v4  ;;  %v434_v4 = vld [vmem:[#allocation3 + $0xae0] sm:$0xff]  ;;  %v947_v10 = vld [vmem:[#allocation6 + $0xae8] sm:$0xff] }
 0x2e6   :  { %v1458_v11 = vsub.f32 %v434_v4, %v946_v5  ;;  %v1969_v17 = vmul.f32 %v1457_v6, %v1457_v6  ;;  %v444_v5 = vld [vmem:[#allocation3 + $0xb30] sm:$0xff] }
 0x2e7   :  { %v2467_v20 = vadd.f32 %v2466_v15, %v1955_v9  ;;  %v435_v9 = vld [vmem:[#allocation3 + $0xae8] sm:$0xff]  ;;  %v948_v15 = vld [vmem:[#allocation6 + $0xaf0] sm:$0xff] }
 0x2e8   :  { %v1459_v16 = vsub.f32 %v435_v9, %v947_v10  ;;  %v1970_v26 = vmul.f32 %v1458_v11, %v1458_v11  ;;  %v956_v6 = vld [vmem:[#allocation6 + $0xb30] sm:$0xff]  ;;  %v445_v10 = vld [vmem:[#allocation3 + $0xb38] sm:$0xff] }
 0x2e9   :  { %v2468_v25 = vadd.f32 %v2467_v20, %v1956_v14  ;;  %v436_v14 = vld [vmem:[#allocation3 + $0xaf0] sm:$0xff]  ;;  %v437_v20 = vld [vmem:[#allocation3 + $0xaf8] sm:$0xff] }
 0x2ea   :  { %v1461_v33 = vsub.f32 %v437_v20, %v949_v21  ;;  %v957_v11 = vld [vmem:[#allocation6 + $0xb38] sm:$0xff]  ;;  %v447_v20 = vld [vmem:[#allocation3 + $0xb48] sm:$0xff] }
 0x2eb   :  { %v2469_v30 = vadd.f32 %v2468_v25, %v1957_v19  ;;  %v2663_v19 = vld [vmem:[#allocation8] sm:$0x3]  ;;  %v1460_v25 = vsub.f32 %v436_v14, %v948_v15  ;;  %v959_v21 = vld [vmem:[#allocation6 + $0xb48] sm:$0xff] }
 0x2ec   :  { %v2666_v23 = vmul.f32 %v2663_v19, %v2663_v19  ;;  %v446_v15 = vld [vmem:[#allocation3 + $0xb40] sm:$0xff] }
 0x2ed   :  { %v2470_v35 = vadd.f32 %v2469_v30, %v1958_v24  ;;  %v2672_v24 = vlaneseq  ;;  %v1972_v42 = vmul.f32 %v1460_v25, %v1460_v25 }
 0x2ee   :  { %v2667_v30 = vsub.f32 %v2665_v22, %v2666_v23  ;;  %v2731_v32 = vpop.eup %2730 }
 0x2ef   :  { %v2471_v40 = vadd.f32 %v2470_v35, %v1959_v29  ;;  %v950_v29 = vld [vmem:[#allocation6 + $0xb00] sm:$0xff]  ;;  %v2673_v31 = vshrl.u32 %v2672_v24, 7 }
 0x2f0   :  { %v2670_v38 = vsub.f32 %v2667_v30, %v2731_v32  ;;  %v1462_v41 = vsub.f32 %v438_v28, %v950_v29  ;;  %v1471_v28 = vsub.f32 %v447_v20, %v959_v21  ;;  %v961_v32 = vld [vmem:[#allocation6 + $0xb58] sm:$0xff] }
 0x2f1   :  { %v2472_v45 = vadd.f32 %v2471_v40, %v1960_v34  ;;  %v1971_v34 = vmul.f32 %v1459_v16, %v1459_v16  ;;  %v2678_v40 = vsub.s32 1, %v2673_v31  ;;  %v958_v16 = vld [vmem:[#allocation6 + $0xb40] sm:$0xff] }
 0x2f2   :  { %v1974_v56 = vmul.f32 %v1462_v41, %v1462_v41  ;;  %v1470_v22 = vsub.f32 %v446_v15, %v958_v16  ;;  %v451_v41 = vld [vmem:[#allocation3 + $0xb68] sm:$0xff] }
 0x2f3   :  { %v2473_v50 = vadd.f32 %v2472_v45, %v1961_v39  ;;  %v2674_v39 = vsub.s32 0, %v2673_v31  ;;  %v952_v45 = vld [vmem:[#allocation6 + $0xb10] sm:$0xff]  ;;  %v2679_v47 = vrot.slane %v2670_v38, %v2678_v40  ;;  %v449_v31 = vld [vmem:[#allocation3 + $0xb58] sm:$0xff] }
 0x2f5   :  { %v2474_v55 = vadd.f32 %v2473_v50, %v1962_v44  ;;  %v440_v44 = vld [vmem:[#allocation3 + $0xb10] sm:$0xff]  ;;  %v2675_v46 = vrot.slane %v2670_v38, %v2674_v39  ;;  %v1473_v38 = vsub.f32 %v449_v31, %v961_v32  ;;  %v1983_v39 = vmul.f32 %v1471_v28, %v1471_v28  ;;  %v461_v28 = vld [vmem:[#allocation3 + $0xbb8] sm:$0xff] }
 0x2f7   :  { %v2475_v61 = vadd.f32 %v2474_v55, %v1963_v49  ;;  %v1973_v49 = vmul.f32 %v1461_v33, %v1461_v33  ;;  %v2683_v53 = vsel %vm2682_vm0, %v2675_v46, 0.0  ;;  %v1464_v55 = vsub.f32 %v440_v44, %v952_v45  ;;  %v452_v46 = vld [vmem:[#allocation3 + $0xb70] sm:$0xff] }
 0x2f9   :  { %v2476_v3 = vadd.f32 %v2475_v61, %v1964_v54  ;;  %v2684_v54 = vsel %vm2682_vm0, %v2679_v47, 0.0  ;;  %v1465_v61 = vsub.f32 %v441_v51, %v953_v52  ;;  %v964_v47 = vld [vmem:[#allocation6 + $0xb70] sm:$0xff]  ;;  %v453_v51 = vld [vmem:[#allocation3 + $0xb78] sm:$0xff] }
 0x2fa   :  { %v2685_v58 = vadd.f32 %v2684_v54, %v2683_v53  ;;  %v965_v52 = vld [vmem:[#allocation6 + $0xb78] sm:$0xff]  ;;  %v1476_v53 = vsub.f32 %v452_v46, %v964_v47 }
 0x2fb   :  { %v2477_v8 = vadd.f32 %v2476_v3, %v1965_v60  ;;  %v954_v60 = vld [vmem:[#allocation6 + $0xb20] sm:$0xff]  ;;  %v1976_v3 = vmul.f32 %v1464_v55, %v1464_v55 }
 0x2fc   :  { %2686 = vadd.xlane.f32.xlu0 %v2685_v58  ;;  %v1477_v58 = vsub.f32 %v453_v51, %v965_v52 }
 0x2fd   :  { %v2478_v13 = vadd.f32 %v2477_v8, %v1966_v2  ;;  %v1466_v2 = vsub.f32 %v442_v59, %v954_v60  ;;  %v1977_v8 = vmul.f32 %v1465_v61, %v1465_v61  ;;  %v455_v61 = vld [vmem:[#allocation3 + $0xb88] sm:$0xff] }
 0x2ff   :  { %v2479_v18 = vadd.f32 %v2478_v13, %v1967_v7  ;;  %v1467_v7 = vsub.f32 %v443_v0, %v955_v1  ;;  %v1978_v13 = vmul.f32 %v1466_v2, %v1466_v2  ;;  %v1988_v0 = vmul.f32 %v1476_v53, %v1476_v53  ;;  %v456_v2 = vld [vmem:[#allocation3 + $0xb90] sm:$0xff]  ;;  %v466_v53 = vld [vmem:[#allocation3 + $0xbe0] sm:$0xff] }
 0x301   :  { %v2480_v27 = vadd.f32 %v2479_v18, %v1968_v12  ;;  %v1468_v12 = vsub.f32 %v444_v5, %v956_v6  ;;  %v1979_v18 = vmul.f32 %v1467_v7, %v1467_v7  ;;  %v1989_v5 = vmul.f32 %v1477_v58, %v1477_v58  ;;  %v457_v7 = vld [vmem:[#allocation3 + $0xb98] sm:$0xff]  ;;  %v467_v58 = vld [vmem:[#allocation3 + $0xbe8] sm:$0xff] }
 0x303   :  { %v2481_v35 = vadd.f32 %v2480_v27, %v1969_v17  ;;  %v1469_v17 = vsub.f32 %v445_v10, %v957_v11  ;;  %v1980_v23 = vmul.f32 %v1468_v12, %v1468_v12  ;;  %v960_v27 = vld [vmem:[#allocation6 + $0xb50] sm:$0xff]  ;;  %v458_v12 = vld [vmem:[#allocation3 + $0xba0] sm:$0xff] }
 0x305   :  { %v2482_v43 = vadd.f32 %v2481_v35, %v1970_v26  ;;  %v448_v26 = vld [vmem:[#allocation3 + $0xb50] sm:$0xff]  ;;  %v1981_v29 = vmul.f32 %v1469_v17, %v1469_v17  ;;  %v459_v17 = vld [vmem:[#allocation3 + $0xba8] sm:$0xff] }
 0x306   :  { %v1472_v33 = vsub.f32 %v448_v26, %v960_v27 }
 0x307   :  { %v2483_v50 = vadd.f32 %v2482_v43, %v1971_v34  ;;  %v1982_v34 = vmul.f32 %v1470_v22, %v1470_v22  ;;  %v1474_v43 = vsub.f32 %v450_v36, %v962_v37  ;;  %v460_v22 = vld [vmem:[#allocation3 + $0xbb0] sm:$0xff] }
 0x308   :  { %v1984_v44 = vmul.f32 %v1472_v33, %v1472_v33  ;;  %v462_v33 = vld [vmem:[#allocation3 + $0xbc0] sm:$0xff] }
 0x309   :  { %v2484_v57 = vadd.f32 %v2483_v50, %v1972_v42  ;;  %v963_v42 = vld [vmem:[#allocation6 + $0xb68] sm:$0xff]  ;;  %v1986_v54 = vmul.f32 %v1474_v43, %v1474_v43  ;;  %v464_v43 = vld [vmem:[#allocation3 + $0xbd0] sm:$0xff] }
 0x30a   :  { %v1475_v48 = vsub.f32 %v451_v41, %v963_v42 }
 0x30b   :  { %v2485_v63 = vadd.f32 %v2484_v57, %v1973_v49  ;;  %v1985_v49 = vmul.f32 %v1473_v38, %v1473_v38  ;;  %v966_v57 = vld [vmem:[#allocation6 + $0xb80] sm:$0xff]  ;;  %v463_v38 = vld [vmem:[#allocation3 + $0xbc8] sm:$0xff] }
 0x30c   :  { %v1987_v59 = vmul.f32 %v1475_v48, %v1475_v48  ;;  %v465_v48 = vld [vmem:[#allocation3 + $0xbd8] sm:$0xff] }
 0x30d   :  { %v2486_v4 = vadd.f32 %v2485_v63, %v1974_v56  ;;  %v454_v56 = vld [vmem:[#allocation3 + $0xb80] sm:$0xff] }
 0x30e   :  { %v1478_v63 = vsub.f32 %v454_v56, %v966_v57 }
 0x30f   :  { %v2487_v9 = vadd.f32 %v2486_v4, %v1975_v62  ;;  %v967_v62 = vld [vmem:[#allocation6 + $0xb88] sm:$0xff] }
 0x310   :  { %v1479_v4 = vsub.f32 %v455_v61, %v967_v62  ;;  %v1990_v10 = vmul.f32 %v1478_v63, %v1478_v63  ;;  %v468_v63 = vld [vmem:[#allocation3 + $0xbf0] sm:$0xff] }
 0x311   :  { %v2488_v14 = vadd.f32 %v2487_v9, %v1976_v3  ;;  %v968_v3 = vld [vmem:[#allocation6 + $0xb90] sm:$0xff] }
 0x312   :  { %v1480_v9 = vsub.f32 %v456_v2, %v968_v3  ;;  %v1991_v15 = vmul.f32 %v1479_v4, %v1479_v4  ;;  %v469_v4 = vld [vmem:[#allocation3 + $0xbf8] sm:$0xff] }
 0x313   :  { %v2489_v19 = vadd.f32 %v2488_v14, %v1977_v8  ;;  %v969_v8 = vld [vmem:[#allocation6 + $0xb98] sm:$0xff] }
 0x314   :  { %v1481_v14 = vsub.f32 %v457_v7, %v969_v8  ;;  %v1992_v20 = vmul.f32 %v1480_v9, %v1480_v9  ;;  %v470_v9 = vld [vmem:[#allocation3 + $0xc00] sm:$0xff] }
 0x315   :  { %v2490_v25 = vadd.f32 %v2489_v19, %v1978_v13  ;;  %v970_v13 = vld [vmem:[#allocation6 + $0xba0] sm:$0xff] }
 0x316   :  { %v1482_v19 = vsub.f32 %v458_v12, %v970_v13  ;;  %v1993_v26 = vmul.f32 %v1481_v14, %v1481_v14  ;;  %v471_v14 = vld [vmem:[#allocation3 + $0xc08] sm:$0xff] }
 0x317   :  { %v2491_v30 = vadd.f32 %v2490_v25, %v1979_v18  ;;  %v971_v18 = vld [vmem:[#allocation6 + $0xba8] sm:$0xff] }
 0x318   :  { %v1483_v25 = vsub.f32 %v459_v17, %v971_v18  ;;  %v1994_v31 = vmul.f32 %v1482_v19, %v1482_v19  ;;  %v472_v19 = vld [vmem:[#allocation3 + $0xc10] sm:$0xff] }
 0x319   :  { %v2492_v35 = vadd.f32 %v2491_v30, %v1980_v23  ;;  %v972_v23 = vld [vmem:[#allocation6 + $0xbb0] sm:$0xff] }
 0x31a   :  { %v1484_v30 = vsub.f32 %v460_v22, %v972_v23  ;;  %v1995_v36 = vmul.f32 %v1483_v25, %v1483_v25  ;;  %v473_v25 = vld [vmem:[#allocation3 + $0xc18] sm:$0xff] }
 0x31b   :  { %v2493_v40 = vadd.f32 %v2492_v35, %v1981_v29  ;;  %v973_v29 = vld [vmem:[#allocation6 + $0xbb8] sm:$0xff] }
 0x31c   :  { %v1485_v35 = vsub.f32 %v461_v28, %v973_v29  ;;  %v1996_v41 = vmul.f32 %v1484_v30, %v1484_v30  ;;  %v474_v30 = vld [vmem:[#allocation3 + $0xc20] sm:$0xff] }
 0x31d   :  { %v2494_v45 = vadd.f32 %v2493_v40, %v1982_v34  ;;  %v974_v34 = vld [vmem:[#allocation6 + $0xbc0] sm:$0xff] }
 0x31e   :  { %v1486_v40 = vsub.f32 %v462_v33, %v974_v34  ;;  %v1997_v46 = vmul.f32 %v1485_v35, %v1485_v35  ;;  %v475_v35 = vld [vmem:[#allocation3 + $0xc28] sm:$0xff] }
 0x31f   :  { %v2495_v50 = vadd.f32 %v2494_v45, %v1983_v39  ;;  %v975_v39 = vld [vmem:[#allocation6 + $0xbc8] sm:$0xff] }
 0x320   :  { %v1487_v45 = vsub.f32 %v463_v38, %v975_v39  ;;  %v1998_v51 = vmul.f32 %v1486_v40, %v1486_v40  ;;  %v476_v40 = vld [vmem:[#allocation3 + $0xc30] sm:$0xff] }
 0x321   :  { %v2496_v55 = vadd.f32 %v2495_v50, %v1984_v44  ;;  %v976_v44 = vld [vmem:[#allocation6 + $0xbd0] sm:$0xff] }
 0x322   :  { %v1488_v50 = vsub.f32 %v464_v43, %v976_v44  ;;  %v1999_v56 = vmul.f32 %v1487_v45, %v1487_v45  ;;  %v477_v45 = vld [vmem:[#allocation3 + $0xc38] sm:$0xff] }
 0x323   :  { %v2497_v60 = vadd.f32 %v2496_v55, %v1985_v49  ;;  %v977_v49 = vld [vmem:[#allocation6 + $0xbd8] sm:$0xff] }
 0x324   :  { %v1489_v55 = vsub.f32 %v465_v48, %v977_v49  ;;  %v2000_v61 = vmul.f32 %v1488_v50, %v1488_v50  ;;  %v478_v50 = vld [vmem:[#allocation3 + $0xc40] sm:$0xff] }
 0x325   :  { %v2498_v1 = vadd.f32 %v2497_v60, %v1986_v54  ;;  %v978_v54 = vld [vmem:[#allocation6 + $0xbe0] sm:$0xff] }
 0x326   :  { %v1490_v60 = vsub.f32 %v466_v53, %v978_v54  ;;  %v2001_v2 = vmul.f32 %v1489_v55, %v1489_v55  ;;  %v479_v55 = vld [vmem:[#allocation3 + $0xc48] sm:$0xff] }
 0x327   :  { %v2499_v6 = vadd.f32 %v2498_v1, %v1987_v59  ;;  %v979_v59 = vld [vmem:[#allocation6 + $0xbe8] sm:$0xff] }
 0x328   :  { %v1491_v1 = vsub.f32 %v467_v58, %v979_v59  ;;  %v2002_v7 = vmul.f32 %v1490_v60, %v1490_v60  ;;  %v480_v60 = vld [vmem:[#allocation3 + $0xc50] sm:$0xff] }
 0x329   :  { %v2500_v11 = vadd.f32 %v2499_v6, %v1988_v0  ;;  %v980_v0 = vld [vmem:[#allocation6 + $0xbf0] sm:$0xff] }
 0x32a   :  { %v1492_v6 = vsub.f32 %v468_v63, %v980_v0  ;;  %v2003_v12 = vmul.f32 %v1491_v1, %v1491_v1  ;;  %v481_v1 = vld [vmem:[#allocation3 + $0xc58] sm:$0xff] }
 0x32b   :  { %v2501_v16 = vadd.f32 %v2500_v11, %v1989_v5  ;;  %v981_v5 = vld [vmem:[#allocation6 + $0xbf8] sm:$0xff] }
 0x32c   :  { %v1493_v11 = vsub.f32 %v469_v4, %v981_v5  ;;  %v2004_v17 = vmul.f32 %v1492_v6, %v1492_v6  ;;  %v482_v6 = vld [vmem:[#allocation3 + $0xc60] sm:$0xff] }
 0x32d   :  { %v2502_v21 = vadd.f32 %v2501_v16, %v1990_v10  ;;  %v982_v10 = vld [vmem:[#allocation6 + $0xc00] sm:$0xff] }
 0x32e   :  { %v1494_v16 = vsub.f32 %v470_v9, %v982_v10  ;;  %v2005_v22 = vmul.f32 %v1493_v11, %v1493_v11  ;;  %v483_v11 = vld [vmem:[#allocation3 + $0xc68] sm:$0xff] }
 0x32f   :  { %v2503_v27 = vadd.f32 %v2502_v21, %v1991_v15  ;;  %v983_v15 = vld [vmem:[#allocation6 + $0xc08] sm:$0xff] }
 0x330   :  { %v1495_v21 = vsub.f32 %v471_v14, %v983_v15  ;;  %v2006_v28 = vmul.f32 %v1494_v16, %v1494_v16  ;;  %v484_v16 = vld [vmem:[#allocation3 + $0xc70] sm:$0xff] }
 0x331   :  { %v2504_v32 = vadd.f32 %v2503_v27, %v1992_v20  ;;  %v984_v20 = vld [vmem:[#allocation6 + $0xc10] sm:$0xff] }
 0x332   :  { %v1496_v27 = vsub.f32 %v472_v19, %v984_v20  ;;  %v2007_v33 = vmul.f32 %v1495_v21, %v1495_v21  ;;  %v485_v21 = vld [vmem:[#allocation3 + $0xc78] sm:$0xff] }
 0x333   :  { %v2505_v37 = vadd.f32 %v2504_v32, %v1993_v26  ;;  %v985_v26 = vld [vmem:[#allocation6 + $0xc18] sm:$0xff] }
 0x334   :  { %v1497_v32 = vsub.f32 %v473_v25, %v985_v26  ;;  %v2008_v38 = vmul.f32 %v1496_v27, %v1496_v27  ;;  %v486_v27 = vld [vmem:[#allocation3 + $0xc80] sm:$0xff] }
 0x335   :  { %v2506_v42 = vadd.f32 %v2505_v37, %v1994_v31  ;;  %v986_v31 = vld [vmem:[#allocation6 + $0xc20] sm:$0xff] }
 0x336   :  { %v1498_v37 = vsub.f32 %v474_v30, %v986_v31  ;;  %v2009_v43 = vmul.f32 %v1497_v32, %v1497_v32  ;;  %v487_v32 = vld [vmem:[#allocation3 + $0xc88] sm:$0xff] }
 0x337   :  { %v2507_v47 = vadd.f32 %v2506_v42, %v1995_v36  ;;  %v987_v36 = vld [vmem:[#allocation6 + $0xc28] sm:$0xff] }
 0x338   :  { %v1499_v42 = vsub.f32 %v475_v35, %v987_v36  ;;  %v2010_v48 = vmul.f32 %v1498_v37, %v1498_v37  ;;  %v488_v37 = vld [vmem:[#allocation3 + $0xc90] sm:$0xff] }
 0x339   :  { %v2508_v52 = vadd.f32 %v2507_v47, %v1996_v41  ;;  %v988_v41 = vld [vmem:[#allocation6 + $0xc30] sm:$0xff] }
 0x33a   :  { %v1500_v47 = vsub.f32 %v476_v40, %v988_v41  ;;  %v2011_v53 = vmul.f32 %v1499_v42, %v1499_v42  ;;  %v489_v42 = vld [vmem:[#allocation3 + $0xc98] sm:$0xff] }
 0x33b   :  { %v2509_v57 = vadd.f32 %v2508_v52, %v1997_v46  ;;  %v989_v46 = vld [vmem:[#allocation6 + $0xc38] sm:$0xff] }
 0x33c   :  { %v1501_v52 = vsub.f32 %v477_v45, %v989_v46  ;;  %v2012_v58 = vmul.f32 %v1500_v47, %v1500_v47  ;;  %v490_v47 = vld [vmem:[#allocation3 + $0xca0] sm:$0xff] }
 0x33d   :  { %v2510_v62 = vadd.f32 %v2509_v57, %v1998_v51  ;;  %v990_v51 = vld [vmem:[#allocation6 + $0xc40] sm:$0xff] }
 0x33e   :  { %v1502_v57 = vsub.f32 %v478_v50, %v990_v51  ;;  %v2013_v63 = vmul.f32 %v1501_v52, %v1501_v52  ;;  %v491_v52 = vld [vmem:[#allocation3 + $0xca8] sm:$0xff] }
 0x33f   :  { %v2511_v3 = vadd.f32 %v2510_v62, %v1999_v56  ;;  %v991_v56 = vld [vmem:[#allocation6 + $0xc48] sm:$0xff] }
 0x340   :  { %v1503_v62 = vsub.f32 %v479_v55, %v991_v56  ;;  %v2014_v4 = vmul.f32 %v1502_v57, %v1502_v57  ;;  %v492_v57 = vld [vmem:[#allocation3 + $0xcb0] sm:$0xff] }
 0x341   :  { %v2512_v8 = vadd.f32 %v2511_v3, %v2000_v61  ;;  %v992_v61 = vld [vmem:[#allocation6 + $0xc50] sm:$0xff] }
 0x342   :  { %v1504_v3 = vsub.f32 %v480_v60, %v992_v61  ;;  %v2015_v9 = vmul.f32 %v1503_v62, %v1503_v62  ;;  %v493_v62 = vld [vmem:[#allocation3 + $0xcb8] sm:$0xff] }
 0x343   :  { %v2513_v13 = vadd.f32 %v2512_v8, %v2001_v2  ;;  %v993_v2 = vld [vmem:[#allocation6 + $0xc58] sm:$0xff] }
 0x344   :  { %v1505_v8 = vsub.f32 %v481_v1, %v993_v2  ;;  %v2016_v14 = vmul.f32 %v1504_v3, %v1504_v3  ;;  %v494_v3 = vld [vmem:[#allocation3 + $0xcc0] sm:$0xff] }
 0x345   :  { %v2514_v18 = vadd.f32 %v2513_v13, %v2002_v7  ;;  %v994_v7 = vld [vmem:[#allocation6 + $0xc60] sm:$0xff] }
 0x346   :  { %v1506_v13 = vsub.f32 %v482_v6, %v994_v7  ;;  %v2017_v19 = vmul.f32 %v1505_v8, %v1505_v8  ;;  %v495_v8 = vld [vmem:[#allocation3 + $0xcc8] sm:$0xff] }
 0x347   :  { %v2515_v23 = vadd.f32 %v2514_v18, %v2003_v12  ;;  %v995_v12 = vld [vmem:[#allocation6 + $0xc68] sm:$0xff] }
 0x348   :  { %v1507_v18 = vsub.f32 %v483_v11, %v995_v12  ;;  %v2018_v25 = vmul.f32 %v1506_v13, %v1506_v13  ;;  %v496_v13 = vld [vmem:[#allocation3 + $0xcd0] sm:$0xff] }
 0x349   :  { %v2516_v29 = vadd.f32 %v2515_v23, %v2004_v17  ;;  %v996_v17 = vld [vmem:[#allocation6 + $0xc70] sm:$0xff] }
 0x34a   :  { %v1508_v23 = vsub.f32 %v484_v16, %v996_v17  ;;  %v2019_v30 = vmul.f32 %v1507_v18, %v1507_v18  ;;  %v497_v18 = vld [vmem:[#allocation3 + $0xcd8] sm:$0xff] }
 0x34b   :  { %v2517_v34 = vadd.f32 %v2516_v29, %v2005_v22  ;;  %v997_v22 = vld [vmem:[#allocation6 + $0xc78] sm:$0xff] }
 0x34c   :  { %v1509_v29 = vsub.f32 %v485_v21, %v997_v22  ;;  %v2020_v35 = vmul.f32 %v1508_v23, %v1508_v23  ;;  %v498_v23 = vld [vmem:[#allocation3 + $0xce0] sm:$0xff] }
 0x34d   :  { %v2518_v39 = vadd.f32 %v2517_v34, %v2006_v28  ;;  %v998_v28 = vld [vmem:[#allocation6 + $0xc80] sm:$0xff] }
 0x34e   :  { %v1510_v34 = vsub.f32 %v486_v27, %v998_v28  ;;  %v2021_v40 = vmul.f32 %v1509_v29, %v1509_v29  ;;  %v499_v29 = vld [vmem:[#allocation3 + $0xce8] sm:$0xff] }
 0x34f   :  { %v2519_v44 = vadd.f32 %v2518_v39, %v2007_v33  ;;  %v999_v33 = vld [vmem:[#allocation6 + $0xc88] sm:$0xff] }
 0x350   :  { %v1511_v39 = vsub.f32 %v487_v32, %v999_v33  ;;  %v2022_v45 = vmul.f32 %v1510_v34, %v1510_v34  ;;  %v500_v34 = vld [vmem:[#allocation3 + $0xcf0] sm:$0xff] }
 0x351   :  { %v2520_v49 = vadd.f32 %v2519_v44, %v2008_v38  ;;  %v1000_v38 = vld [vmem:[#allocation6 + $0xc90] sm:$0xff] }
 0x352   :  { %v1512_v44 = vsub.f32 %v488_v37, %v1000_v38  ;;  %v2023_v50 = vmul.f32 %v1511_v39, %v1511_v39  ;;  %v501_v39 = vld [vmem:[#allocation3 + $0xcf8] sm:$0xff] }
 0x353   :  { %v2521_v54 = vadd.f32 %v2520_v49, %v2009_v43  ;;  %v1001_v43 = vld [vmem:[#allocation6 + $0xc98] sm:$0xff] }
 0x354   :  { %v1513_v49 = vsub.f32 %v489_v42, %v1001_v43  ;;  %v2024_v55 = vmul.f32 %v1512_v44, %v1512_v44  ;;  %v502_v44 = vld [vmem:[#allocation3 + $0xd00] sm:$0xff] }
 0x355   :  { %v2522_v59 = vadd.f32 %v2521_v54, %v2010_v48  ;;  %v1002_v48 = vld [vmem:[#allocation6 + $0xca0] sm:$0xff] }
 0x356   :  { %v1514_v54 = vsub.f32 %v490_v47, %v1002_v48  ;;  %v2025_v60 = vmul.f32 %v1513_v49, %v1513_v49  ;;  %v503_v49 = vld [vmem:[#allocation3 + $0xd08] sm:$0xff] }
 0x357   :  { %v2523_v0 = vadd.f32 %v2522_v59, %v2011_v53  ;;  %v1003_v53 = vld [vmem:[#allocation6 + $0xca8] sm:$0xff] }
 0x358   :  { %v1515_v59 = vsub.f32 %v491_v52, %v1003_v53  ;;  %v2026_v1 = vmul.f32 %v1514_v54, %v1514_v54  ;;  %v504_v54 = vld [vmem:[#allocation3 + $0xd10] sm:$0xff] }
 0x359   :  { %v2524_v5 = vadd.f32 %v2523_v0, %v2012_v58  ;;  %v1004_v58 = vld [vmem:[#allocation6 + $0xcb0] sm:$0xff] }
 0x35a   :  { %v1516_v0 = vsub.f32 %v492_v57, %v1004_v58  ;;  %v2027_v6 = vmul.f32 %v1515_v59, %v1515_v59  ;;  %v505_v59 = vld [vmem:[#allocation3 + $0xd18] sm:$0xff] }
 0x35b   :  { %v2525_v10 = vadd.f32 %v2524_v5, %v2013_v63  ;;  %v1005_v63 = vld [vmem:[#allocation6 + $0xcb8] sm:$0xff] }
 0x35c   :  { %v1517_v5 = vsub.f32 %v493_v62, %v1005_v63  ;;  %v2028_v11 = vmul.f32 %v1516_v0, %v1516_v0  ;;  %v506_v0 = vld [vmem:[#allocation3 + $0xd20] sm:$0xff] }
 0x35d   :  { %v2526_v15 = vadd.f32 %v2525_v10, %v2014_v4  ;;  %v1006_v4 = vld [vmem:[#allocation6 + $0xcc0] sm:$0xff] }
 0x35e   :  { %v1518_v10 = vsub.f32 %v494_v3, %v1006_v4  ;;  %v2029_v16 = vmul.f32 %v1517_v5, %v1517_v5  ;;  %v507_v5 = vld [vmem:[#allocation3 + $0xd28] sm:$0xff] }
 0x35f   :  { %v2527_v20 = vadd.f32 %v2526_v15, %v2015_v9  ;;  %v1007_v9 = vld [vmem:[#allocation6 + $0xcc8] sm:$0xff] }
 0x360   :  { %v1519_v15 = vsub.f32 %v495_v8, %v1007_v9  ;;  %v2030_v21 = vmul.f32 %v1518_v10, %v1518_v10  ;;  %v508_v10 = vld [vmem:[#allocation3 + $0xd30] sm:$0xff] }
 0x361   :  { %v2528_v26 = vadd.f32 %v2527_v20, %v2016_v14  ;;  %v1008_v14 = vld [vmem:[#allocation6 + $0xcd0] sm:$0xff] }
 0x362   :  { %v1520_v20 = vsub.f32 %v496_v13, %v1008_v14  ;;  %v2031_v27 = vmul.f32 %v1519_v15, %v1519_v15  ;;  %v509_v15 = vld [vmem:[#allocation3 + $0xd38] sm:$0xff] }
 0x363   :  { %v2529_v31 = vadd.f32 %v2528_v26, %v2017_v19  ;;  %v1009_v19 = vld [vmem:[#allocation6 + $0xcd8] sm:$0xff] }
 0x364   :  { %v1521_v26 = vsub.f32 %v497_v18, %v1009_v19  ;;  %v2032_v32 = vmul.f32 %v1520_v20, %v1520_v20  ;;  %v510_v20 = vld [vmem:[#allocation3 + $0xd40] sm:$0xff] }
 0x365   :  { %v2530_v36 = vadd.f32 %v2529_v31, %v2018_v25  ;;  %v1010_v25 = vld [vmem:[#allocation6 + $0xce0] sm:$0xff] }
 0x366   :  { %v1522_v31 = vsub.f32 %v498_v23, %v1010_v25  ;;  %v2033_v37 = vmul.f32 %v1521_v26, %v1521_v26  ;;  %v511_v26 = vld [vmem:[#allocation3 + $0xd48] sm:$0xff] }
 0x367   :  { %v2531_v41 = vadd.f32 %v2530_v36, %v2019_v30  ;;  %v1011_v30 = vld [vmem:[#allocation6 + $0xce8] sm:$0xff] }
 0x368   :  { %v1523_v36 = vsub.f32 %v499_v29, %v1011_v30  ;;  %v2034_v42 = vmul.f32 %v1522_v31, %v1522_v31  ;;  %v512_v31 = vld [vmem:[#allocation3 + $0xd50] sm:$0xff] }
 0x369   :  { %v2532_v46 = vadd.f32 %v2531_v41, %v2020_v35  ;;  %v1012_v35 = vld [vmem:[#allocation6 + $0xcf0] sm:$0xff] }
 0x36a   :  { %v1524_v41 = vsub.f32 %v500_v34, %v1012_v35  ;;  %v2035_v47 = vmul.f32 %v1523_v36, %v1523_v36  ;;  %v513_v36 = vld [vmem:[#allocation3 + $0xd58] sm:$0xff] }
 0x36b   :  { %v2533_v51 = vadd.f32 %v2532_v46, %v2021_v40  ;;  %v1013_v40 = vld [vmem:[#allocation6 + $0xcf8] sm:$0xff] }
 0x36c   :  { %v1525_v46 = vsub.f32 %v501_v39, %v1013_v40  ;;  %v2036_v52 = vmul.f32 %v1524_v41, %v1524_v41 }
 0x36d   :  { %v2534_v56 = vadd.f32 %v2533_v51, %v2022_v45  ;;  %v1014_v45 = vld [vmem:[#allocation6 + $0xd00] sm:$0xff] }
 0x36e   :  { %v1526_v51 = vsub.f32 %v502_v44, %v1014_v45  ;;  %v2037_v57 = vmul.f32 %v1525_v46, %v1525_v46  ;;  %v1026_v44 = vld [vmem:[#allocation6 + $0xd60] sm:$0xff] }
 0x36f   :  { %v2535_v61 = vadd.f32 %v2534_v56, %v2023_v50  ;;  %v1015_v50 = vld [vmem:[#allocation6 + $0xd08] sm:$0xff] }
 0x370   :  { %v1527_v56 = vsub.f32 %v503_v49, %v1015_v50  ;;  %v2038_v62 = vmul.f32 %v1526_v51, %v1526_v51  ;;  %v515_v49 = vld [vmem:[#allocation3 + $0xd68] sm:$0xff] }
 0x371   :  { %v2536_v2 = vadd.f32 %v2535_v61, %v2024_v55  ;;  %v1016_v55 = vld [vmem:[#allocation6 + $0xd10] sm:$0xff]  ;;  %v1027_v50 = vld [vmem:[#allocation6 + $0xd68] sm:$0xff] }
 0x372   :  { %v1528_v61 = vsub.f32 %v504_v54, %v1016_v55  ;;  %v2039_v3 = vmul.f32 %v1527_v56, %v1527_v56  ;;  %v516_v55 = vld [vmem:[#allocation3 + $0xd70] sm:$0xff] }
 0x373   :  { %v2537_v7 = vadd.f32 %v2536_v2, %v2025_v60  ;;  %v1017_v60 = vld [vmem:[#allocation6 + $0xd18] sm:$0xff]  ;;  %v1028_v56 = vld [vmem:[#allocation6 + $0xd70] sm:$0xff] }
 0x374   :  { %v1529_v2 = vsub.f32 %v505_v59, %v1017_v60  ;;  %v2040_v8 = vmul.f32 %v1528_v61, %v1528_v61  ;;  %v517_v61 = vld [vmem:[#allocation3 + $0xd78] sm:$0xff] }
 0x375   :  { %v2538_v12 = vadd.f32 %v2537_v7, %v2026_v1  ;;  %v1018_v1 = vld [vmem:[#allocation6 + $0xd20] sm:$0xff] }
 0x376   :  { %v1530_v7 = vsub.f32 %v506_v0, %v1018_v1  ;;  %v2041_v13 = vmul.f32 %v1529_v2, %v1529_v2 }
 0x377   :  { %v2539_v17 = vadd.f32 %v2538_v12, %v2027_v6  ;;  %v1019_v6 = vld [vmem:[#allocation6 + $0xd28] sm:$0xff] }
 0x378   :  { %v1531_v12 = vsub.f32 %v507_v5, %v1019_v6  ;;  %v2042_v18 = vmul.f32 %v1530_v7, %v1530_v7 }
 0x379   :  { %v2540_v22 = vadd.f32 %v2539_v17, %v2028_v11  ;;  %v1020_v11 = vld [vmem:[#allocation6 + $0xd30] sm:$0xff] }
 0x37a   :  { %v1532_v17 = vsub.f32 %v508_v10, %v1020_v11  ;;  %v2043_v23 = vmul.f32 %v1531_v12, %v1531_v12  ;;  %v1031_v10 = vld [vmem:[#allocation6 + $0xd88] sm:$0xff] }
 0x37b   :  { %v2541_v28 = vadd.f32 %v2540_v22, %v2029_v16  ;;  %v1021_v16 = vld [vmem:[#allocation6 + $0xd38] sm:$0xff] }
 0x37c   :  { %v1533_v22 = vsub.f32 %v509_v15, %v1021_v16  ;;  %v2044_v29 = vmul.f32 %v1532_v17, %v1532_v17  ;;  %v1032_v15 = vld [vmem:[#allocation6 + $0xd90] sm:$0xff] }
 0x37d   :  { %v2542_v33 = vadd.f32 %v2541_v28, %v2030_v21  ;;  %v1022_v21 = vld [vmem:[#allocation6 + $0xd40] sm:$0xff] }
 0x37e   :  { %v1534_v28 = vsub.f32 %v510_v20, %v1022_v21  ;;  %v2045_v34 = vmul.f32 %v1533_v22, %v1533_v22  ;;  %v1033_v20 = vld [vmem:[#allocation6 + $0xd98] sm:$0xff] }
 0x37f   :  { %v2543_v38 = vadd.f32 %v2542_v33, %v2031_v27  ;;  %v1023_v27 = vld [vmem:[#allocation6 + $0xd48] sm:$0xff] }
 0x380   :  { %v1535_v33 = vsub.f32 %v511_v26, %v1023_v27  ;;  %v2046_v40 = vmul.f32 %v1534_v28, %v1534_v28  ;;  %v1034_v26 = vld [vmem:[#allocation6 + $0xda0] sm:$0xff] }
 0x381   :  { %v2544_v43 = vadd.f32 %v2543_v38, %v2032_v32  ;;  %v1024_v32 = vld [vmem:[#allocation6 + $0xd50] sm:$0xff] }
 0x382   :  { %v1536_v39 = vsub.f32 %v512_v31, %v1024_v32  ;;  %v2047_v46 = vmul.f32 %v1535_v33, %v1535_v33  ;;  %v1035_v31 = vld [vmem:[#allocation6 + $0xda8] sm:$0xff] }
 0x383   :  { %v2545_v48 = vadd.f32 %v2544_v43, %v2033_v37  ;;  %v1025_v37 = vld [vmem:[#allocation6 + $0xd58] sm:$0xff]  ;;  %v514_v43 = vld [vmem:[#allocation3 + $0xd60] sm:$0xff] }
 0x384   :  { %v1537_v45 = vsub.f32 %v513_v36, %v1025_v37  ;;  %v1538_v51 = vsub.f32 %v514_v43, %v1026_v44  ;;  %v1036_v36 = vld [vmem:[#allocation6 + $0xdb0] sm:$0xff] }
 0x385   :  { %v2546_v53 = vadd.f32 %v2545_v48, %v2034_v42 }
 0x386   :  { %v2050_v0 = vmul.f32 %v1538_v51, %v1538_v51  ;;  %v1039_v51 = vld [vmem:[#allocation6 + $0xdc8] sm:$0xff] }
 0x387   :  { %v2547_v58 = vadd.f32 %v2546_v53, %v2035_v47 }
 0x389   :  { %v2548_v63 = vadd.f32 %v2547_v58, %v2036_v52  ;;  %v2687_v38 = vpop.xlane.xlu0 %2686  ;;  %v2048_v52 = vmul.f32 %v1536_v39, %v1536_v39  ;;  %v2049_v58 = vmul.f32 %v1537_v45, %v1537_v45  ;;  %v526_v45 = vld [vmem:[#allocation3 + $0xdc0] sm:$0xff] }
 0x38a   :  { %v2688_v42 = vrot.slane %v2687_v38, 4 }
 0x38b   :  { %v2549_v4 = vadd.f32 %v2548_v63, %v2037_v57  ;;  %v1539_v57 = vsub.f32 %v515_v49, %v1027_v50  ;;  %v1540_v63 = vsub.f32 %v516_v55, %v1028_v56  ;;  %v527_v50 = vld [vmem:[#allocation3 + $0xdc8] sm:$0xff]  ;;  %v528_v55 = vld [vmem:[#allocation3 + $0xdd0] sm:$0xff] }
 0x38c   :  { %v2689_v48 = vadd.f32 %v2688_v42, %v2687_v38  ;;  %v1040_v56 = vld [vmem:[#allocation6 + $0xdd0] sm:$0xff] }
 0x38d   :  { %v2550_v9 = vadd.f32 %v2549_v4, %v2038_v62  ;;  %v1029_v62 = vld [vmem:[#allocation6 + $0xd78] sm:$0xff]  ;;  %v1030_v4 = vld [vmem:[#allocation6 + $0xd80] sm:$0xff]  ;;  %v2051_v6 = vmul.f32 %v1539_v57, %v1539_v57  ;;  %v2052_v12 = vmul.f32 %v1540_v63, %v1540_v63  ;;  %v1551_v57 = vsub.f32 %v527_v50, %v1039_v51 }
 0x38e   :  { %v2690_v54 = vrot.slane %v2689_v48, 2  ;;  %v1541_v5 = vsub.f32 %v517_v61, %v1029_v62  ;;  %v1041_v61 = vld [vmem:[#allocation6 + $0xdd8] sm:$0xff]  ;;  %v1552_v62 = vsub.f32 %v528_v55, %v1040_v56 }
 0x38f   :  { %v2551_v14 = vadd.f32 %v2550_v9, %v2039_v3  ;;  %v518_v3 = vld [vmem:[#allocation3 + $0xd80] sm:$0xff]  ;;  %v519_v9 = vld [vmem:[#allocation3 + $0xd88] sm:$0xff] }
 0x390   :  { %v2691_v60 = vadd.f32 %v2690_v54, %v2689_v48  ;;  %v1542_v11 = vsub.f32 %v518_v3, %v1030_v4  ;;  %v1543_v16 = vsub.f32 %v519_v9, %v1031_v10  ;;  %v2053_v17 = vmul.f32 %v1541_v5, %v1541_v5 }
 0x391   :  { %v2552_v19 = vadd.f32 %v2551_v14, %v2040_v8  ;;  %v520_v14 = vld [vmem:[#allocation3 + $0xd90] sm:$0xff]  ;;  %v2063_v4 = vmul.f32 %v1551_v57, %v1551_v57  ;;  %v2064_v9 = vmul.f32 %v1552_v62, %v1552_v62  ;;  %v541_v57 = vld [vmem:[#allocation3 + $0xe38] sm:$0xff]  ;;  %v542_v62 = vld [vmem:[#allocation3 + $0xe40] sm:$0xff] }
 0x392   :  { %v2692_v2 = vrot.slane %v2691_v60, 1  ;;  %v1544_v21 = vsub.f32 %v520_v14, %v1032_v15  ;;  %v2054_v22 = vmul.f32 %v1542_v11, %v1542_v11  ;;  %v2055_v28 = vmul.f32 %v1543_v16, %v1543_v16  ;;  %v532_v11 = vld [vmem:[#allocation3 + $0xdf0] sm:$0xff]  ;;  %v533_v16 = vld [vmem:[#allocation3 + $0xdf8] sm:$0xff] }
 0x393   :  { %v2553_v25 = vadd.f32 %v2552_v19, %v2041_v13  ;;  %v521_v19 = vld [vmem:[#allocation3 + $0xd98] sm:$0xff] }
 0x394   :  { %v2693_v8 = vadd.f32 %v2692_v2, %v2691_v60  ;;  %v1545_v27 = vsub.f32 %v521_v19, %v1033_v20  ;;  %v2056_v33 = vmul.f32 %v1544_v21, %v1544_v21  ;;  %v529_v60 = vld [vmem:[#allocation3 + $0xdd8] sm:$0xff]  ;;  %v1042_v2 = vld [vmem:[#allocation6 + $0xde0] sm:$0xff] }
 0x395   :  { %v2554_v30 = vadd.f32 %v2553_v25, %v2042_v18  ;;  %v522_v25 = vld [vmem:[#allocation3 + $0xda0] sm:$0xff]  ;;  %v1553_v3 = vsub.f32 %v529_v60, %v1041_v61 }
 0x396   :  { %2721 = vpush %v2693_v8  ;;  %v1546_v32 = vsub.f32 %v522_v25, %v1034_v26  ;;  %v2057_v38 = vmul.f32 %v1545_v27, %v1545_v27  ;;  %v534_v21 = vld [vmem:[#allocation3 + $0xe00] sm:$0xff]  ;;  %v535_v27 = vld [vmem:[#allocation3 + $0xe08] sm:$0xff] }
 0x397   :  { %v2555_v35 = vadd.f32 %v2554_v30, %v2043_v23  ;;  %v523_v30 = vld [vmem:[#allocation3 + $0xda8] sm:$0xff]  ;;  %v2065_v14 = vmul.f32 %v1553_v3, %v1553_v3 }
 0x398   :  { %v1547_v37 = vsub.f32 %v523_v30, %v1035_v31  ;;  %v2058_v43 = vmul.f32 %v1546_v32, %v1546_v32  ;;  %v536_v32 = vld [vmem:[#allocation3 + $0xe10] sm:$0xff]  ;;  %v543_v3 = vld [vmem:[#allocation3 + $0xe48] sm:$0xff] }
 0x399   :  { %v2556_v41 = vadd.f32 %v2555_v35, %v2044_v29  ;;  %v524_v35 = vld [vmem:[#allocation3 + $0xdb0] sm:$0xff] }
 0x39a   :  { %v1548_v42 = vsub.f32 %v524_v35, %v1036_v36  ;;  %v2059_v48 = vmul.f32 %v1547_v37, %v1547_v37  ;;  %v537_v37 = vld [vmem:[#allocation3 + $0xe18] sm:$0xff] }
 0x39b   :  { %v2557_v47 = vadd.f32 %v2556_v41, %v2045_v34  ;;  %v1037_v41 = vld [vmem:[#allocation6 + $0xdb8] sm:$0xff] }
 0x39d   :  { %v2558_v53 = vadd.f32 %v2557_v47, %v2046_v40  ;;  %v525_v40 = vld [vmem:[#allocation3 + $0xdb8] sm:$0xff] }
 0x39e   :  { %v1549_v47 = vsub.f32 %v525_v40, %v1037_v41 }
 0x39f   :  { %v2559_v59 = vadd.f32 %v2558_v53, %v2047_v46  ;;  %v1038_v46 = vld [vmem:[#allocation6 + $0xdc0] sm:$0xff]  ;;  %v2060_v53 = vmul.f32 %v1548_v42, %v1548_v42 }
 0x3a0   :  { %v538_v42 = vld [vmem:[#allocation3 + $0xe20] sm:$0xff] }
 0x3a1   :  { %v2560_v1 = vadd.f32 %v2559_v59, %v2048_v52  ;;  %v1550_v52 = vsub.f32 %v526_v45, %v1038_v46 }
 0x3a3   :  { %v2561_v7 = vadd.f32 %v2560_v1, %v2049_v58  ;;  %v2061_v58 = vmul.f32 %v1549_v47, %v1549_v47  ;;  %v2062_v63 = vmul.f32 %v1550_v52, %v1550_v52  ;;  %v530_v1 = vld [vmem:[#allocation3 + $0xde0] sm:$0xff]  ;;  %v539_v47 = vld [vmem:[#allocation3 + $0xe28] sm:$0xff]  ;;  %v540_v52 = vld [vmem:[#allocation3 + $0xe30] sm:$0xff] }
 0x3a4   :  { %v1554_v8 = vsub.f32 %v530_v1, %v1042_v2 }
 0x3a5   :  { %v2562_v13 = vadd.f32 %v2561_v7, %v2050_v0  ;;  %v1043_v7 = vld [vmem:[#allocation6 + $0xde8] sm:$0xff] }
 0x3a6   :  { %v2066_v19 = vmul.f32 %v1554_v8, %v1554_v8  ;;  %v544_v8 = vld [vmem:[#allocation3 + $0xe50] sm:$0xff] }
 0x3a7   :  { %v2563_v18 = vadd.f32 %v2562_v13, %v2051_v6  ;;  %v531_v6 = vld [vmem:[#allocation3 + $0xde8] sm:$0xff] }
 0x3a8   :  { %v1555_v13 = vsub.f32 %v531_v6, %v1043_v7 }
 0x3a9   :  { %v2564_v23 = vadd.f32 %v2563_v18, %v2052_v12  ;;  %v1044_v12 = vld [vmem:[#allocation6 + $0xdf0] sm:$0xff] }
 0x3aa   :  { %v1556_v18 = vsub.f32 %v532_v11, %v1044_v12  ;;  %v2067_v25 = vmul.f32 %v1555_v13, %v1555_v13  ;;  %v545_v13 = vld [vmem:[#allocation3 + $0xe58] sm:$0xff] }
 0x3ab   :  { %v2565_v29 = vadd.f32 %v2564_v23, %v2053_v17  ;;  %v1045_v17 = vld [vmem:[#allocation6 + $0xdf8] sm:$0xff] }
 0x3ac   :  { %v1557_v23 = vsub.f32 %v533_v16, %v1045_v17  ;;  %v2068_v30 = vmul.f32 %v1556_v18, %v1556_v18  ;;  %v546_v18 = vld [vmem:[#allocation3 + $0xe60] sm:$0xff] }
 0x3ad   :  { %v2566_v34 = vadd.f32 %v2565_v29, %v2054_v22  ;;  %v1046_v22 = vld [vmem:[#allocation6 + $0xe00] sm:$0xff] }
 0x3ae   :  { %v1558_v29 = vsub.f32 %v534_v21, %v1046_v22  ;;  %v2069_v35 = vmul.f32 %v1557_v23, %v1557_v23  ;;  %v547_v23 = vld [vmem:[#allocation3 + $0xe68] sm:$0xff] }
 0x3af   :  { %v2567_v39 = vadd.f32 %v2566_v34, %v2055_v28  ;;  %v1047_v28 = vld [vmem:[#allocation6 + $0xe08] sm:$0xff] }
 0x3b0   :  { %v1559_v34 = vsub.f32 %v535_v27, %v1047_v28  ;;  %v2070_v40 = vmul.f32 %v1558_v29, %v1558_v29  ;;  %v548_v29 = vld [vmem:[#allocation3 + $0xe70] sm:$0xff] }
 0x3b1   :  { %v2568_v44 = vadd.f32 %v2567_v39, %v2056_v33  ;;  %v1048_v33 = vld [vmem:[#allocation6 + $0xe10] sm:$0xff] }
 0x3b2   :  { %v1560_v39 = vsub.f32 %v536_v32, %v1048_v33  ;;  %v2071_v45 = vmul.f32 %v1559_v34, %v1559_v34  ;;  %v549_v34 = vld [vmem:[#allocation3 + $0xe78] sm:$0xff] }
 0x3b3   :  { %v2569_v49 = vadd.f32 %v2568_v44, %v2057_v38  ;;  %v1049_v38 = vld [vmem:[#allocation6 + $0xe18] sm:$0xff] }
 0x3b4   :  { %v1561_v44 = vsub.f32 %v537_v37, %v1049_v38  ;;  %v2072_v50 = vmul.f32 %v1560_v39, %v1560_v39  ;;  %v550_v39 = vld [vmem:[#allocation3 + $0xe80] sm:$0xff] }
 0x3b5   :  { %v2570_v54 = vadd.f32 %v2569_v49, %v2058_v43  ;;  %v1050_v43 = vld [vmem:[#allocation6 + $0xe20] sm:$0xff] }
 0x3b6   :  { %v1562_v49 = vsub.f32 %v538_v42, %v1050_v43  ;;  %v2073_v55 = vmul.f32 %v1561_v44, %v1561_v44  ;;  %v551_v44 = vld [vmem:[#allocation3 + $0xe88] sm:$0xff] }
 0x3b7   :  { %v2571_v59 = vadd.f32 %v2570_v54, %v2059_v48  ;;  %v1051_v48 = vld [vmem:[#allocation6 + $0xe28] sm:$0xff] }
 0x3b8   :  { %v1563_v54 = vsub.f32 %v539_v47, %v1051_v48  ;;  %v2074_v60 = vmul.f32 %v1562_v49, %v1562_v49  ;;  %v552_v49 = vld [vmem:[#allocation3 + $0xe90] sm:$0xff] }
 0x3b9   :  { %v2572_v0 = vadd.f32 %v2571_v59, %v2060_v53  ;;  %v1052_v53 = vld [vmem:[#allocation6 + $0xe30] sm:$0xff] }
 0x3ba   :  { %v1564_v59 = vsub.f32 %v540_v52, %v1052_v53  ;;  %v2075_v1 = vmul.f32 %v1563_v54, %v1563_v54  ;;  %v553_v54 = vld [vmem:[#allocation3 + $0xe98] sm:$0xff] }
 0x3bb   :  { %v2573_v5 = vadd.f32 %v2572_v0, %v2061_v58  ;;  %v1053_v58 = vld [vmem:[#allocation6 + $0xe38] sm:$0xff] }
 0x3bc   :  { %v1565_v0 = vsub.f32 %v541_v57, %v1053_v58  ;;  %v2076_v6 = vmul.f32 %v1564_v59, %v1564_v59  ;;  %v554_v59 = vld [vmem:[#allocation3 + $0xea0] sm:$0xff] }
 0x3bd   :  { %v2574_v10 = vadd.f32 %v2573_v5, %v2062_v63  ;;  %v1054_v63 = vld [vmem:[#allocation6 + $0xe40] sm:$0xff] }
 0x3be   :  { %v1566_v5 = vsub.f32 %v542_v62, %v1054_v63  ;;  %v2077_v11 = vmul.f32 %v1565_v0, %v1565_v0  ;;  %v555_v0 = vld [vmem:[#allocation3 + $0xea8] sm:$0xff] }
 0x3bf   :  { %v2575_v15 = vadd.f32 %v2574_v10, %v2063_v4  ;;  %v1055_v4 = vld [vmem:[#allocation6 + $0xe48] sm:$0xff] }
 0x3c0   :  { %v1567_v10 = vsub.f32 %v543_v3, %v1055_v4  ;;  %v2078_v16 = vmul.f32 %v1566_v5, %v1566_v5  ;;  %v556_v5 = vld [vmem:[#allocation3 + $0xeb0] sm:$0xff] }
 0x3c1   :  { %v2576_v20 = vadd.f32 %v2575_v15, %v2064_v9  ;;  %v1056_v9 = vld [vmem:[#allocation6 + $0xe50] sm:$0xff] }
 0x3c2   :  { %v1568_v15 = vsub.f32 %v544_v8, %v1056_v9  ;;  %v2079_v21 = vmul.f32 %v1567_v10, %v1567_v10  ;;  %v557_v10 = vld [vmem:[#allocation3 + $0xeb8] sm:$0xff] }
 0x3c3   :  { %v2577_v26 = vadd.f32 %v2576_v20, %v2065_v14  ;;  %v1057_v14 = vld [vmem:[#allocation6 + $0xe58] sm:$0xff] }
 0x3c4   :  { %v1569_v20 = vsub.f32 %v545_v13, %v1057_v14  ;;  %v2080_v27 = vmul.f32 %v1568_v15, %v1568_v15  ;;  %v558_v15 = vld [vmem:[#allocation3 + $0xec0] sm:$0xff] }
 0x3c5   :  { %v2578_v31 = vadd.f32 %v2577_v26, %v2066_v19  ;;  %v1058_v19 = vld [vmem:[#allocation6 + $0xe60] sm:$0xff] }
 0x3c6   :  { %v1570_v26 = vsub.f32 %v546_v18, %v1058_v19  ;;  %v2081_v32 = vmul.f32 %v1569_v20, %v1569_v20  ;;  %v559_v20 = vld [vmem:[#allocation3 + $0xec8] sm:$0xff] }
 0x3c7   :  { %v2579_v36 = vadd.f32 %v2578_v31, %v2067_v25  ;;  %v1059_v25 = vld [vmem:[#allocation6 + $0xe68] sm:$0xff]  ;;  %s2722_s3 = spop %2721 }
 0x3c8   :  { %v1571_v31 = vsub.f32 %v547_v23, %v1059_v25  ;;  %v2082_v37 = vmul.f32 %v1570_v26, %v1570_v26  ;;  %v560_v26 = vld [vmem:[#allocation3 + $0xed0] sm:$0xff]  ;;  %s2695_s10 = smul.f32 -0.5, %s2722_s3 }
 0x3c9   :  { %v2580_v41 = vadd.f32 %v2579_v36, %v2068_v30  ;;  %v1060_v30 = vld [vmem:[#allocation6 + $0xe70] sm:$0xff] }
 0x3ca   :  { %v1572_v36 = vsub.f32 %v548_v29, %v1060_v30  ;;  %v2083_v42 = vmul.f32 %v1571_v31, %v1571_v31  ;;  %v561_v31 = vld [vmem:[#allocation3 + $0xed8] sm:$0xff] }
 0x3cb   :  { %v2581_v46 = vadd.f32 %v2580_v41, %v2069_v35  ;;  %v1061_v35 = vld [vmem:[#allocation6 + $0xe78] sm:$0xff] }
 0x3cc   :  { %v1573_v41 = vsub.f32 %v549_v34, %v1061_v35  ;;  %v2084_v47 = vmul.f32 %v1572_v36, %v1572_v36  ;;  %v562_v36 = vld [vmem:[#allocation3 + $0xee0] sm:$0xff] }
 0x3cd   :  { %v2582_v51 = vadd.f32 %v2581_v46, %v2070_v40  ;;  %v1062_v40 = vld [vmem:[#allocation6 + $0xe80] sm:$0xff] }
 0x3ce   :  { %v1574_v46 = vsub.f32 %v550_v39, %v1062_v40  ;;  %v2085_v52 = vmul.f32 %v1573_v41, %v1573_v41  ;;  %v563_v41 = vld [vmem:[#allocation3 + $0xee8] sm:$0xff] }
 0x3cf   :  { %v2583_v56 = vadd.f32 %v2582_v51, %v2071_v45  ;;  %v1063_v45 = vld [vmem:[#allocation6 + $0xe88] sm:$0xff] }
 0x3d0   :  { %v1575_v51 = vsub.f32 %v551_v44, %v1063_v45  ;;  %v2086_v57 = vmul.f32 %v1574_v46, %v1574_v46  ;;  %v564_v46 = vld [vmem:[#allocation3 + $0xef0] sm:$0xff] }
 0x3d1   :  { %v2584_v61 = vadd.f32 %v2583_v56, %v2072_v50  ;;  %v1064_v50 = vld [vmem:[#allocation6 + $0xe90] sm:$0xff] }
 0x3d2   :  { %v1576_v56 = vsub.f32 %v552_v49, %v1064_v50  ;;  %v2087_v62 = vmul.f32 %v1575_v51, %v1575_v51  ;;  %v565_v51 = vld [vmem:[#allocation3 + $0xef8] sm:$0xff] }
 0x3d3   :  { %v2585_v2 = vadd.f32 %v2584_v61, %v2073_v55  ;;  %v1065_v55 = vld [vmem:[#allocation6 + $0xe98] sm:$0xff] }
 0x3d4   :  { %v1577_v61 = vsub.f32 %v553_v54, %v1065_v55  ;;  %v2088_v3 = vmul.f32 %v1576_v56, %v1576_v56  ;;  %v566_v56 = vld [vmem:[#allocation3 + $0xf00] sm:$0xff] }
 0x3d5   :  { %v2586_v7 = vadd.f32 %v2585_v2, %v2074_v60  ;;  %v1066_v60 = vld [vmem:[#allocation6 + $0xea0] sm:$0xff] }
 0x3d6   :  { %v1578_v2 = vsub.f32 %v554_v59, %v1066_v60  ;;  %v2089_v8 = vmul.f32 %v1577_v61, %v1577_v61  ;;  %v567_v61 = vld [vmem:[#allocation3 + $0xf08] sm:$0xff] }
 0x3d7   :  { %v2587_v12 = vadd.f32 %v2586_v7, %v2075_v1  ;;  %v1067_v1 = vld [vmem:[#allocation6 + $0xea8] sm:$0xff] }
 0x3d8   :  { %v1579_v7 = vsub.f32 %v555_v0, %v1067_v1  ;;  %v2090_v13 = vmul.f32 %v1578_v2, %v1578_v2  ;;  %v568_v2 = vld [vmem:[#allocation3 + $0xf10] sm:$0xff] }
 0x3d9   :  { %v2588_v17 = vadd.f32 %v2587_v12, %v2076_v6  ;;  %v1068_v6 = vld [vmem:[#allocation6 + $0xeb0] sm:$0xff] }
 0x3da   :  { %v1580_v12 = vsub.f32 %v556_v5, %v1068_v6  ;;  %v2091_v18 = vmul.f32 %v1579_v7, %v1579_v7  ;;  %v569_v7 = vld [vmem:[#allocation3 + $0xf18] sm:$0xff] }
 0x3db   :  { %v2589_v22 = vadd.f32 %v2588_v17, %v2077_v11  ;;  %v1069_v11 = vld [vmem:[#allocation6 + $0xeb8] sm:$0xff] }
 0x3dc   :  { %v1581_v17 = vsub.f32 %v557_v10, %v1069_v11  ;;  %v2092_v23 = vmul.f32 %v1580_v12, %v1580_v12  ;;  %v570_v12 = vld [vmem:[#allocation3 + $0xf20] sm:$0xff] }
 0x3dd   :  { %v2590_v28 = vadd.f32 %v2589_v22, %v2078_v16  ;;  %v1070_v16 = vld [vmem:[#allocation6 + $0xec0] sm:$0xff] }
 0x3de   :  { %v1582_v22 = vsub.f32 %v558_v15, %v1070_v16  ;;  %v2093_v29 = vmul.f32 %v1581_v17, %v1581_v17  ;;  %v571_v17 = vld [vmem:[#allocation3 + $0xf28] sm:$0xff] }
 0x3df   :  { %v2591_v33 = vadd.f32 %v2590_v28, %v2079_v21  ;;  %v1071_v21 = vld [vmem:[#allocation6 + $0xec8] sm:$0xff] }
 0x3e0   :  { %v1583_v28 = vsub.f32 %v559_v20, %v1071_v21  ;;  %v2094_v34 = vmul.f32 %v1582_v22, %v1582_v22  ;;  %v572_v22 = vld [vmem:[#allocation3 + $0xf30] sm:$0xff] }
 0x3e1   :  { %v2592_v38 = vadd.f32 %v2591_v33, %v2080_v27  ;;  %v1072_v27 = vld [vmem:[#allocation6 + $0xed0] sm:$0xff] }
 0x3e2   :  { %v1584_v33 = vsub.f32 %v560_v26, %v1072_v27  ;;  %v2095_v39 = vmul.f32 %v1583_v28, %v1583_v28  ;;  %v573_v28 = vld [vmem:[#allocation3 + $0xf38] sm:$0xff] }
 0x3e3   :  { %v2593_v43 = vadd.f32 %v2592_v38, %v2081_v32  ;;  %v1073_v32 = vld [vmem:[#allocation6 + $0xed8] sm:$0xff] }
 0x3e4   :  { %v1585_v38 = vsub.f32 %v561_v31, %v1073_v32  ;;  %v2096_v44 = vmul.f32 %v1584_v33, %v1584_v33  ;;  %v574_v33 = vld [vmem:[#allocation3 + $0xf40] sm:$0xff] }
 0x3e5   :  { %v2594_v48 = vadd.f32 %v2593_v43, %v2082_v37  ;;  %v1074_v37 = vld [vmem:[#allocation6 + $0xee0] sm:$0xff] }
 0x3e6   :  { %v1586_v43 = vsub.f32 %v562_v36, %v1074_v37  ;;  %v2097_v49 = vmul.f32 %v1585_v38, %v1585_v38  ;;  %v575_v38 = vld [vmem:[#allocation3 + $0xf48] sm:$0xff] }
 0x3e7   :  { %v2595_v53 = vadd.f32 %v2594_v48, %v2083_v42  ;;  %v1075_v42 = vld [vmem:[#allocation6 + $0xee8] sm:$0xff] }
 0x3e8   :  { %v1587_v48 = vsub.f32 %v563_v41, %v1075_v42  ;;  %v2098_v54 = vmul.f32 %v1586_v43, %v1586_v43  ;;  %v576_v43 = vld [vmem:[#allocation3 + $0xf50] sm:$0xff] }
 0x3e9   :  { %v2596_v58 = vadd.f32 %v2595_v53, %v2084_v47  ;;  %v1076_v47 = vld [vmem:[#allocation6 + $0xef0] sm:$0xff] }
 0x3ea   :  { %v1588_v53 = vsub.f32 %v564_v46, %v1076_v47  ;;  %v2099_v59 = vmul.f32 %v1587_v48, %v1587_v48  ;;  %v577_v48 = vld [vmem:[#allocation3 + $0xf58] sm:$0xff] }
 0x3eb   :  { %v2597_v63 = vadd.f32 %v2596_v58, %v2085_v52  ;;  %v1077_v52 = vld [vmem:[#allocation6 + $0xef8] sm:$0xff] }
 0x3ec   :  { %v1589_v58 = vsub.f32 %v565_v51, %v1077_v52  ;;  %v2100_v0 = vmul.f32 %v1588_v53, %v1588_v53  ;;  %v578_v53 = vld [vmem:[#allocation3 + $0xf60] sm:$0xff] }
 0x3ed   :  { %v2598_v4 = vadd.f32 %v2597_v63, %v2086_v57  ;;  %v1078_v57 = vld [vmem:[#allocation6 + $0xf00] sm:$0xff] }
 0x3ee   :  { %v1590_v63 = vsub.f32 %v566_v56, %v1078_v57  ;;  %v2101_v5 = vmul.f32 %v1589_v58, %v1589_v58  ;;  %v579_v58 = vld [vmem:[#allocation3 + $0xf68] sm:$0xff] }
 0x3ef   :  { %v2599_v9 = vadd.f32 %v2598_v4, %v2087_v62  ;;  %v1079_v62 = vld [vmem:[#allocation6 + $0xf08] sm:$0xff] }
 0x3f0   :  { %v1591_v4 = vsub.f32 %v567_v61, %v1079_v62  ;;  %v2102_v10 = vmul.f32 %v1590_v63, %v1590_v63  ;;  %v580_v63 = vld [vmem:[#allocation3 + $0xf70] sm:$0xff] }
 0x3f1   :  { %v2600_v14 = vadd.f32 %v2599_v9, %v2088_v3  ;;  %v1080_v3 = vld [vmem:[#allocation6 + $0xf10] sm:$0xff] }
 0x3f2   :  { %v1592_v9 = vsub.f32 %v568_v2, %v1080_v3  ;;  %v2103_v15 = vmul.f32 %v1591_v4, %v1591_v4  ;;  %v581_v4 = vld [vmem:[#allocation3 + $0xf78] sm:$0xff] }
 0x3f3   :  { %v2601_v19 = vadd.f32 %v2600_v14, %v2089_v8  ;;  %v1081_v8 = vld [vmem:[#allocation6 + $0xf18] sm:$0xff] }
 0x3f4   :  { %v1593_v14 = vsub.f32 %v569_v7, %v1081_v8  ;;  %v2104_v20 = vmul.f32 %v1592_v9, %v1592_v9  ;;  %v582_v9 = vld [vmem:[#allocation3 + $0xf80] sm:$0xff] }
 0x3f5   :  { %v2602_v25 = vadd.f32 %v2601_v19, %v2090_v13  ;;  %v1082_v13 = vld [vmem:[#allocation6 + $0xf20] sm:$0xff] }
 0x3f6   :  { %v1594_v19 = vsub.f32 %v570_v12, %v1082_v13  ;;  %v2105_v26 = vmul.f32 %v1593_v14, %v1593_v14  ;;  %v583_v14 = vld [vmem:[#allocation3 + $0xf88] sm:$0xff] }
 0x3f7   :  { %v2603_v30 = vadd.f32 %v2602_v25, %v2091_v18  ;;  %v1083_v18 = vld [vmem:[#allocation6 + $0xf28] sm:$0xff] }
 0x3f8   :  { %v1595_v25 = vsub.f32 %v571_v17, %v1083_v18  ;;  %v2106_v31 = vmul.f32 %v1594_v19, %v1594_v19  ;;  %v584_v19 = vld [vmem:[#allocation3 + $0xf90] sm:$0xff] }
 0x3f9   :  { %v2604_v35 = vadd.f32 %v2603_v30, %v2092_v23  ;;  %v1084_v23 = vld [vmem:[#allocation6 + $0xf30] sm:$0xff] }
 0x3fa   :  { %v1596_v30 = vsub.f32 %v572_v22, %v1084_v23  ;;  %v2107_v36 = vmul.f32 %v1595_v25, %v1595_v25  ;;  %v585_v25 = vld [vmem:[#allocation3 + $0xf98] sm:$0xff] }
 0x3fb   :  { %v2605_v40 = vadd.f32 %v2604_v35, %v2093_v29  ;;  %v1085_v29 = vld [vmem:[#allocation6 + $0xf38] sm:$0xff] }
 0x3fc   :  { %v1597_v35 = vsub.f32 %v573_v28, %v1085_v29  ;;  %v2108_v41 = vmul.f32 %v1596_v30, %v1596_v30  ;;  %v586_v30 = vld [vmem:[#allocation3 + $0xfa0] sm:$0xff] }
 0x3fd   :  { %v2606_v45 = vadd.f32 %v2605_v40, %v2094_v34  ;;  %v1086_v34 = vld [vmem:[#allocation6 + $0xf40] sm:$0xff] }
 0x3fe   :  { %v1598_v40 = vsub.f32 %v574_v33, %v1086_v34  ;;  %v2109_v46 = vmul.f32 %v1597_v35, %v1597_v35  ;;  %v587_v35 = vld [vmem:[#allocation3 + $0xfa8] sm:$0xff] }
 0x3ff   :  { %v2607_v50 = vadd.f32 %v2606_v45, %v2095_v39  ;;  %v1087_v39 = vld [vmem:[#allocation6 + $0xf48] sm:$0xff] }
 0x400   :  { %v1599_v45 = vsub.f32 %v575_v38, %v1087_v39  ;;  %v2110_v51 = vmul.f32 %v1598_v40, %v1598_v40  ;;  %v588_v40 = vld [vmem:[#allocation3 + $0xfb0] sm:$0xff] }
 0x401   :  { %v2608_v55 = vadd.f32 %v2607_v50, %v2096_v44  ;;  %v1088_v44 = vld [vmem:[#allocation6 + $0xf50] sm:$0xff] }
 0x402   :  { %v1600_v50 = vsub.f32 %v576_v43, %v1088_v44  ;;  %v2111_v56 = vmul.f32 %v1599_v45, %v1599_v45  ;;  %v589_v45 = vld [vmem:[#allocation3 + $0xfb8] sm:$0xff] }
 0x403   :  { %v2609_v60 = vadd.f32 %v2608_v55, %v2097_v49  ;;  %v1089_v49 = vld [vmem:[#allocation6 + $0xf58] sm:$0xff] }
 0x404   :  { %v1601_v55 = vsub.f32 %v577_v48, %v1089_v49  ;;  %v2112_v61 = vmul.f32 %v1600_v50, %v1600_v50  ;;  %v590_v50 = vld [vmem:[#allocation3 + $0xfc0] sm:$0xff] }
 0x405   :  { %v2610_v1 = vadd.f32 %v2609_v60, %v2098_v54  ;;  %v1090_v54 = vld [vmem:[#allocation6 + $0xf60] sm:$0xff] }
 0x406   :  { %v1602_v60 = vsub.f32 %v578_v53, %v1090_v54  ;;  %v2113_v2 = vmul.f32 %v1601_v55, %v1601_v55  ;;  %v591_v55 = vld [vmem:[#allocation3 + $0xfc8] sm:$0xff] }
 0x407   :  { %v2611_v6 = vadd.f32 %v2610_v1, %v2099_v59  ;;  %v1091_v59 = vld [vmem:[#allocation6 + $0xf68] sm:$0xff] }
 0x408   :  { %v1603_v1 = vsub.f32 %v579_v58, %v1091_v59  ;;  %v2114_v7 = vmul.f32 %v1602_v60, %v1602_v60  ;;  %v592_v60 = vld [vmem:[#allocation3 + $0xfd0] sm:$0xff] }
 0x409   :  { %v2612_v11 = vadd.f32 %v2611_v6, %v2100_v0  ;;  %v1092_v0 = vld [vmem:[#allocation6 + $0xf70] sm:$0xff] }
 0x40a   :  { %v1604_v6 = vsub.f32 %v580_v63, %v1092_v0  ;;  %v2115_v12 = vmul.f32 %v1603_v1, %v1603_v1  ;;  %v593_v1 = vld [vmem:[#allocation3 + $0xfd8] sm:$0xff] }
 0x40b   :  { %v2613_v16 = vadd.f32 %v2612_v11, %v2101_v5  ;;  %v1093_v5 = vld [vmem:[#allocation6 + $0xf78] sm:$0xff] }
 0x40c   :  { %v1605_v11 = vsub.f32 %v581_v4, %v1093_v5  ;;  %v2116_v17 = vmul.f32 %v1604_v6, %v1604_v6  ;;  %v594_v6 = vld [vmem:[#allocation3 + $0xfe0] sm:$0xff] }
 0x40d   :  { %v2614_v21 = vadd.f32 %v2613_v16, %v2102_v10  ;;  %v1094_v10 = vld [vmem:[#allocation6 + $0xf80] sm:$0xff] }
 0x40e   :  { %v1606_v16 = vsub.f32 %v582_v9, %v1094_v10  ;;  %v2117_v22 = vmul.f32 %v1605_v11, %v1605_v11  ;;  %v595_v11 = vld [vmem:[#allocation3 + $0xfe8] sm:$0xff] }
 0x40f   :  { %v2615_v27 = vadd.f32 %v2614_v21, %v2103_v15  ;;  %v1095_v15 = vld [vmem:[#allocation6 + $0xf88] sm:$0xff] }
 0x410   :  { %v1607_v21 = vsub.f32 %v583_v14, %v1095_v15  ;;  %v2118_v28 = vmul.f32 %v1606_v16, %v1606_v16  ;;  %v596_v16 = vld [vmem:[#allocation3 + $0xff0] sm:$0xff] }
 0x411   :  { %v2616_v32 = vadd.f32 %v2615_v27, %v2104_v20  ;;  %v1096_v20 = vld [vmem:[#allocation6 + $0xf90] sm:$0xff] }
 0x412   :  { %v1608_v27 = vsub.f32 %v584_v19, %v1096_v20  ;;  %v2119_v33 = vmul.f32 %v1607_v21, %v1607_v21  ;;  %v597_v21 = vld [vmem:[#allocation3 + $0xff8] sm:$0xff] }
 0x413   :  { %v2617_v37 = vadd.f32 %v2616_v32, %v2105_v26  ;;  %v1097_v26 = vld [vmem:[#allocation6 + $0xf98] sm:$0xff] }
 0x414   :  { %v1609_v32 = vsub.f32 %v585_v25, %v1097_v26  ;;  %v2120_v38 = vmul.f32 %v1608_v27, %v1608_v27 }
 0x415   :  { %v2618_v42 = vadd.f32 %v2617_v37, %v2106_v31  ;;  %v1098_v31 = vld [vmem:[#allocation6 + $0xfa0] sm:$0xff] }
 0x416   :  { %v1610_v37 = vsub.f32 %v586_v30, %v1098_v31  ;;  %v2121_v43 = vmul.f32 %v1609_v32, %v1609_v32 }
 0x417   :  { %v2619_v47 = vadd.f32 %v2618_v42, %v2107_v36  ;;  %v1099_v36 = vld [vmem:[#allocation6 + $0xfa8] sm:$0xff] }
 0x418   :  { %v1611_v42 = vsub.f32 %v587_v35, %v1099_v36  ;;  %v2122_v48 = vmul.f32 %v1610_v37, %v1610_v37 }
 0x419   :  { %v2620_v52 = vadd.f32 %v2619_v47, %v2108_v41  ;;  %v1100_v41 = vld [vmem:[#allocation6 + $0xfb0] sm:$0xff] }
 0x41a   :  { %v1612_v47 = vsub.f32 %v588_v40, %v1100_v41  ;;  %v2123_v53 = vmul.f32 %v1611_v42, %v1611_v42  ;;  %v2697_v42 = vand.u32 127, %v2672_v24 }
 0x41b   :  { %v2621_v57 = vadd.f32 %v2620_v52, %v2109_v46  ;;  %v1101_v46 = vld [vmem:[#allocation6 + $0xfb8] sm:$0xff] }
 0x41c   :  { %v1613_v52 = vsub.f32 %v589_v45, %v1101_v46  ;;  %v2124_v58 = vmul.f32 %v1612_v47, %v1612_v47  ;;  %vm2698_vm1 = vcmp.eq.s32.totalorder %v2697_v42, 0 }
 0x41d   :  { %v2622_v62 = vadd.f32 %v2621_v57, %v2110_v51  ;;  %v1102_v51 = vld [vmem:[#allocation6 + $0xfc0] sm:$0xff] }
 0x41e   :  { %v1614_v57 = vsub.f32 %v590_v50, %v1102_v51  ;;  %v2125_v63 = vmul.f32 %v1613_v52, %v1613_v52 }
 0x41f   :  { %v2623_v3 = vadd.f32 %v2622_v62, %v2111_v56  ;;  %v1103_v56 = vld [vmem:[#allocation6 + $0xfc8] sm:$0xff] }
 0x420   :  { %v1615_v62 = vsub.f32 %v591_v55, %v1103_v56  ;;  %v2126_v4 = vmul.f32 %v1614_v57, %v1614_v57 }
 0x421   :  { %v2624_v8 = vadd.f32 %v2623_v3, %v2112_v61  ;;  %v1104_v61 = vld [vmem:[#allocation6 + $0xfd0] sm:$0xff] }
 0x422   :  { %v1616_v3 = vsub.f32 %v592_v60, %v1104_v61  ;;  %v2127_v9 = vmul.f32 %v1615_v62, %v1615_v62 }
 0x423   :  { %v2625_v13 = vadd.f32 %v2624_v8, %v2113_v2  ;;  %v1105_v2 = vld [vmem:[#allocation6 + $0xfd8] sm:$0xff] }
 0x424   :  { %v1617_v8 = vsub.f32 %v593_v1, %v1105_v2  ;;  %v2128_v14 = vmul.f32 %v1616_v3, %v1616_v3 }
 0x425   :  { %v2626_v18 = vadd.f32 %v2625_v13, %v2114_v7  ;;  %v1106_v7 = vld [vmem:[#allocation6 + $0xfe0] sm:$0xff] }
 0x426   :  { %v1618_v13 = vsub.f32 %v594_v6, %v1106_v7  ;;  %v2129_v19 = vmul.f32 %v1617_v8, %v1617_v8 }
 0x427   :  { %v2627_v23 = vadd.f32 %v2626_v18, %v2115_v12  ;;  %v1107_v12 = vld [vmem:[#allocation6 + $0xfe8] sm:$0xff] }
 0x428   :  { %v1619_v18 = vsub.f32 %v595_v11, %v1107_v12  ;;  %v2130_v25 = vmul.f32 %v1618_v13, %v1618_v13 }
 0x429   :  { %v2628_v29 = vadd.f32 %v2627_v23, %v2116_v17  ;;  %v1108_v17 = vld [vmem:[#allocation6 + $0xff0] sm:$0xff] }
 0x42a   :  { %v1620_v23 = vsub.f32 %v596_v16, %v1108_v17 }
 0x42b   :  { %v2629_v34 = vadd.f32 %v2628_v29, %v2117_v22  ;;  %v1109_v22 = vld [vmem:[#allocation6 + $0xff8] sm:$0xff] }
 0x42c   :  { %v1621_v27 = vsub.f32 %v597_v21, %v1109_v22  ;;  %v2132_v30 = vmul.f32 %v1620_v23, %v1620_v23 }
 0x42d   :  { %v2630_v39 = vadd.f32 %v2629_v34, %v2118_v28  ;;  %v2131_v28 = vmul.f32 %v1619_v18, %v1619_v18 }
 0x42e   :  { %v2133_v32 = vmul.f32 %v1621_v27, %v1621_v27 }
 0x42f   :  { %v2631_v44 = vadd.f32 %v2630_v39, %v2119_v33 }
 0x431   :  { %v2632_v49 = vadd.f32 %v2631_v44, %v2120_v38 }
 0x433   :  { %v2633_v54 = vadd.f32 %v2632_v49, %v2121_v43  ;;  %v2700_v43 = vstv %s2695_s10 }
 0x434   :  { %v2701_v45 = vsel %vm2698_vm1, %v2700_v43, 0.0 }
 0x435   :  { %v2634_v59 = vadd.f32 %v2633_v54, %v2122_v48 }
 0x437   :  { %v2635_v0 = vadd.f32 %v2634_v59, %v2123_v53 }
 0x439   :  { %v2636_v5 = vadd.f32 %v2635_v0, %v2124_v58 }
 0x43b   :  { %v2637_v10 = vadd.f32 %v2636_v5, %v2125_v63 }
 0x43d   :  { %v2638_v15 = vadd.f32 %v2637_v10, %v2126_v4 }
 0x43f   :  { %v2639_v20 = vadd.f32 %v2638_v15, %v2127_v9 }
 0x441   :  { %v2640_v26 = vadd.f32 %v2639_v20, %v2128_v14 }
 0x443   :  { %v2641_v29 = vadd.f32 %v2640_v26, %v2129_v19 }
 0x445   :  { %v2642_v31 = vadd.f32 %v2641_v29, %v2130_v25 }
 0x447   :  { %v2643_v33 = vadd.f32 %v2642_v31, %v2131_v28 }
 0x449   :  { %v2644_v34 = vadd.f32 %v2643_v33, %v2132_v30 }
 0x44b   :  { %v2645_v35 = vadd.f32 %v2644_v34, %v2133_v32 }
 0x44d   :  { %v2652_v36 = vrot.slane %v2645_v35, 4 }
 0x44f   :  { %v2653_v37 = vadd.f32 %v2652_v36, %v2645_v35 }
 0x451   :  { %v2654_v38 = vrot.slane %v2653_v37, 2 }
 0x453   :  { %v2655_v39 = vadd.f32 %v2654_v38, %v2653_v37 }
 0x455   :  { %v2656_v40 = vrot.slane %v2655_v39, 1 }
 0x457   :  { %v2657_v41 = vadd.f32 %v2656_v40, %v2655_v39 }
 0x459   :  { %2658 = vst [vmem:[#allocation11] sm:$0x1] %v2657_v41 }
 0x460   :  { %v2699_v44 = vld [vmem:[#allocation11] sm:$0x1] }
 0x461   :  { %v2702_v46 = vadd.f32 %v2701_v45, %v2699_v44 }
 0x463   :  { %2703 = vst [vmem:[#allocation11] sm:$0x1] %v2702_v46 }
 0x464   :  { %2831 = shalt.err (!%p2828_p8)
}
 0x465   :  { %s2832_s16 = scalar_lea.hbm %s2955_s4, 16 }
 0x466   :  { %p2833_p9 = scmp.ne.s32.totalorder %s2955_s4, %s2832_s16  ;;  %p2836_p10 = scmp.lt.u32.totalorder %s2832_s16, %s2955_s4 }
 0x468   :  { %p2838_p11 = pnand %p2836_p10, %p2833_p9 }
 0x46a   :  { %2841 = shalt.err (!%p2838_p11)
}
 0x46b   :  { %2713 = dma.vmem_to_hbm [thread:$0]  %s2711_s12, 16, %s2955_s4, [#allocation5]  }
 0x46c   :  { %2848 = dma.done.wait [#allocation5], 16  }
 0x46d   :  { %2849 = vsyncadd [#allocation5], 4294967280 }
 0x46e   :  { %2717 = vsyncpa [#allocation4], 1 }
 0x46f   :  { %2718 = vsyncpa [#allocation7], 1 }
 0x470   :  { %2719 = vsyncpa [#allocation10], 1 }
 0x471   :  { %2720 = vsyncpa [#allocation5], 1 }

</bundles_post_ra>
